<compile_context>
chip_gen: v5e
topology: v5e:2x2
jax: 0.10.0
libtpu: 0.0.40
codegen_flags: <defaults>
</compile_context>

<pallas_src>
import numpy as np
import jax
import jax.numpy as jnp
from jax.experimental import pallas as pl
from jax.experimental.pallas import tpu as pltpu


# Network configuration (canonical small UNet).
H = W = 16                  # full-resolution spatial size
H2 = W2 = 8                 # after the 2x2 max-pool
N_FULL = H * W              # 256 lanes, lane-dense
N_HALF = 128                # half-res maps padded 64 -> 128 lanes (cols 64: ignored)
CIN, FEAT, COUT = 4, 8, 2


def _relu(v):
    return jnp.maximum(v, 0.0)


def _conv3x3(parts, b_ref, mask_ref, w_row, n_cols):
    """'same' 3x3 conv in channels-on-sublanes (C, N) layout.

    parts    : list of (activation (Ci, n_cols), weight_ref (9, Cout, Ci)).
               More than one part folds a channel-concat into the conv.
    b_ref    : (Cout, 1) bias ref (accumulator starts from broadcast bias).
    mask_ref : (9, 1, n_cols) 0/1 validity mask per tap (implements zero pad).
    w_row    : row stride in columns (W at full res, W2 at half res).
    n_cols   : lane width (multiple of 128 so lane rolls are cheap/legal).
    """
    cout = parts[0][1].shape[1]
    acc = jnp.broadcast_to(b_ref[...], (cout, n_cols))
    for dy in range(3):
        for dx in range(3):
            t = dy * 3 + dx
            s = (dy - 1) * w_row + (dx - 1)          # source-column offset
            if t == 4:                               # centre tap: no shift/mask
                for a, w_ref in parts:
                    acc = acc + jnp.dot(w_ref[t], a,
                                        preferred_element_type=jnp.float32)
            else:
                m = mask_ref[t]                      # (1, n_cols)
                for a, w_ref in parts:
                    # shifted[n] = a[n + s]  (mask kills wrapped / OOB sources)
                    sh = pltpu.roll(a, shift=(-s) % n_cols, axis=1) * m
                    acc = acc + jnp.dot(w_ref[t], sh,
                                        preferred_element_type=jnp.float32)
    return acc


# ----------------------------------------------------------------------------
# Fused UNet kernel: one grid step == one image, all activations in vregs/VMEM.
# ----------------------------------------------------------------------------
def _unet_kernel(x_ref,
                 w1a, b1a, w1b, b1b,
                 w2a, b2a, w2b, b2b,
                 wup, bup,
                 wd1u, wd1s, bd1,
                 wd2, bd2,
                 wfin, bfin,
                 mask_f, mask_h, pool_g, up_u,
                 o_ref):
    x = x_ref[0]                                               # (4, 256)

    # ---------------- encoder level 1 (full res, N = 256) -------------------
    e1a = _relu(_conv3x3([(x, w1a)], b1a, mask_f, W, N_FULL))
    e1b = _relu(_conv3x3([(e1a, w1b)], b1b, mask_f, W, N_FULL))   # (8, 256)

    # ---------------- 2x2 / stride-2 max pool -------------------------------
    # two lane rolls + maxes, then a constant 0/1 compaction matmul gathering
    # the 64 (even h, even w) columns into the padded 128-lane half-res layout.
    m1 = jnp.maximum(e1b, pltpu.roll(e1b, shift=(-1) % N_FULL, axis=1))
    m2 = jnp.maximum(m1, pltpu.roll(m1, shift=(-W) % N_FULL, axis=1))
    p1 = jnp.dot(m2, pool_g[...], preferred_element_type=jnp.float32)  # (8, 128)

    # ---------------- encoder level 2 (half res, padded to 128 lanes) -------
    e2a = _relu(_conv3x3([(p1, w2a)], b2a, mask_h, W2, N_HALF))
    e2b = _relu(_conv3x3([(e2a, w2b)], b2b, mask_h, W2, N_HALF))      # (16, 128)

    # ---------------- nearest 2x upsample as constant 0/1 selection matmul --
    up = jnp.dot(e2b, up_u[...], preferred_element_type=jnp.float32)  # (16, 256)
    u = _relu(_conv3x3([(up, wup)], bup, mask_f, W, N_FULL))          # (8, 256)

    # ---------------- decoder: concat(u, e1b) folded via split weights ------
    d1a = _relu(_conv3x3([(u, wd1u), (e1b, wd1s)], bd1, mask_f, W, N_FULL))
    d1b = _relu(_conv3x3([(d1a, wd2)], bd2, mask_f, W, N_FULL))

    # ---------------- final 1x1 conv, lane-dense NCHW element order ---------
    o_ref[0] = (jnp.dot(wfin[...], d1b, preferred_element_type=jnp.float32)
                + bfin[...])                                          # (2, 256)


# ----------------------------------------------------------------------------
# Host-side constant builders (tap masks, pool/upsample selection matrices).
# ----------------------------------------------------------------------------
def _tap_weights(w):
    # (3, 3, cin, cout) -> (9, cout, cin): tap t multiplies as (Cout,Cin)x(Cin,N)
    return jnp.transpose(w.reshape(9, w.shape[2], w.shape[3]), (0, 2, 1))


def _tap_masks(h, w, n_pad):
    n = h * w
    hh, ww = np.arange(n) // w, np.arange(n) % w
    m = np.zeros((9, 1, n_pad), np.float32)
    for dy in range(3):
        for dx in range(3):
            valid = ((hh + dy - 1 >= 0) & (hh + dy - 1 < h) &
                     (ww + dx - 1 >= 0) & (ww + dx - 1 < w))
            m[dy * 3 + dx, 0, :n] = valid
    return jnp.asarray(m)


def _pool_select():
    # (256, 128) 0/1: half-res column m (< 64) gathers full-res column
    # (2*h2)*W + 2*w2 of the rolled-max map; columns 64: stay zero (padding).
    g = np.zeros((N_FULL, N_HALF), np.float32)
    for mcol in range(H2 * W2):
        h2, w2 = mcol // W2, mcol % W2
        g[(2 * h2) * W + 2 * w2, mcol] = 1.0
    return jnp.asarray(g)


def _upsample_select():
    # (128, 256) 0/1: full-res column n copies half-res column
    # (n // (2W))*W2 + (n % W)//2; padded rows 64: are zero (never selected).
    u = np.zeros((N_HALF, N_FULL), np.float32)
    for n in range(N_FULL):
        h, w = n // W, n % W
        u[(h // 2) * W2 + (w // 2), n] = 1.0
    return jnp.asarray(u)


# ----------------------------------------------------------------------------
# Wrapper: weight prep + one pallas_call for the whole forward pass.
# ----------------------------------------------------------------------------
def unet_forward_pallas(params, x_nchw):
    B = x_nchw.shape[0]
    # NCHW with flattened spatial IS the kernel's (C, H*W) layout: no transpose.
    x = x_nchw.reshape(B, CIN, H * W).astype(jnp.float32)

    w1a, b1a = params["enc1a"]
    w1b, b1b = params["enc1b"]
    w2a, b2a = params["enc2a"]
    w2b, b2b = params["enc2b"]
    wup, bup = params["upconv"]
    wd1, bd1 = params["dec1a"]
    wd2, bd2 = params["dec1b"]
    wfin, bfin = params["final"]

    feat = w1a.shape[-1]
    args = [
        x,
        _tap_weights(w1a), b1a.reshape(-1, 1),
        _tap_weights(w1b), b1b.reshape(-1, 1),
        _tap_weights(w2a), b2a.reshape(-1, 1),
        _tap_weights(w2b), b2b.reshape(-1, 1),
        _tap_weights(wup), bup.reshape(-1, 1),
        _tap_weights(wd1[:, :, :feat, :]),     # multiplies the upsampled branch
        _tap_weights(wd1[:, :, feat:, :]),     # multiplies the encoder skip e1b
        bd1.reshape(-1, 1),
        _tap_weights(wd2), bd2.reshape(-1, 1),
        wfin.reshape(wfin.shape[2], wfin.shape[3]).T,   # (Cout, Cin) = (2, 8)
        bfin.reshape(-1, 1),                            # (2, 1)
        _tap_masks(H, W, N_FULL),              # (9, 1, 256)
        _tap_masks(H2, W2, N_HALF),            # (9, 1, 128)
        _pool_select(),                        # (256, 128)
        _upsample_select(),                    # (128, 256)
    ]

    def _const(a):
        # whole array is one block; same block index every step -> DMA'd once.
        nd = a.ndim
        return pl.BlockSpec(a.shape, lambda i, nd=nd: (0,) * nd)

    in_specs = [pl.BlockSpec((1, CIN, H * W), lambda i: (i, 0, 0))]
    in_specs += [_const(a) for a in args[1:]]

    out = pl.pallas_call(
        _unet_kernel,
        out_shape=jax.ShapeDtypeStruct((B, COUT, H * W), jnp.float32),
        grid=(B,),
        in_specs=in_specs,
        out_specs=pl.BlockSpec((1, COUT, H * W), lambda i: (i, 0, 0)),
        compiler_params=pltpu.CompilerParams(
            dimension_semantics=("parallel",)),
        cost_estimate=pl.CostEstimate(
            flops=6_500_000, transcendentals=0, bytes_accessed=420_000),
    )(*args)

    # (B, 2, 256) is already NCHW element order -> free reshape, no transpose.
    return out.reshape(B, COUT, H, W)


def network1_forward(params, x1, future_seq=0, hidden_state=None):
    # network1.forward just runs self.segnet(x1) and ignores the extra args.
    return unet_forward_pallas(params, x1)


# ----------------------------------------------------------------------------
# Deterministic synthetic parameters (UNet body is not given with network1).
# ----------------------------------------------------------------------------
def _init_conv(key, K, cin, cout):
    kw, kb = jax.random.split(key)
    fan_in = K * K * cin
    w = jax.random.normal(kw, (K, K, cin, cout), jnp.float32) * jnp.sqrt(2.0 / fan_in)
    b = 0.1 * jax.random.normal(kb, (cout,), jnp.float32)
    return w, b


def init_unet_params(key, cin=CIN, feat=FEAT, cout=COUT):
    names_and_shapes = [
        ("enc1a", 3, cin, feat),
        ("enc1b", 3, feat, feat),
        ("enc2a", 3, feat, 2 * feat),
        ("enc2b", 3, 2 * feat, 2 * feat),
        ("upconv", 3, 2 * feat, feat),
        ("dec1a", 3, 2 * feat, feat),
        ("dec1b", 3, feat, feat),
        ("final", 1, feat, cout),
    ]
    keys = jax.random.split(key, len(names_and_shapes))
    return {name: _init_conv(k, K, ci, co)
            for k, (name, K, ci, co) in zip(keys, names_and_shapes)}


# ----------------------------------------------------------------------------
# Pure-JAX reference (for correctness check)
# ----------------------------------------------------------------------------
def _conv_ref(x, w, b, relu):
    K = w.shape[0]
    p = K // 2
    y = jax.lax.conv_general_dilated(
        x, w, window_strides=(1, 1), padding=((p, p), (p, p)),
        dimension_numbers=("NHWC", "HWIO", "NHWC"))
    y = y + b.reshape(1, 1, 1, -1)
    return jnp.maximum(y, 0.0) if relu else y


def _maxpool_ref(x):
    return jax.lax.reduce_window(x, -jnp.inf, jax.lax.max,
                                 (1, 2, 2, 1), (1, 2, 2, 1), "VALID")


def unet_forward_ref(params, x_nchw):
    x = jnp.transpose(x_nchw, (0, 2, 3, 1))
    e1 = _conv_ref(x, *params["enc1a"], True)
    e1 = _conv_ref(e1, *params["enc1b"], True)
    p1 = _maxpool_ref(e1)
    e2 = _conv_ref(p1, *params["enc2a"], True)
    e2 = _conv_ref(e2, *params["enc2b"], True)
    up = jnp.repeat(jnp.repeat(e2, 2, axis=1), 2, axis=2)
    up = _conv_ref(up, *params["upconv"], True)
    d1 = jnp.concatenate([up, e1], axis=-1)
    d1 = _conv_ref(d1, *params["dec1a"], True)
    d1 = _conv_ref(d1, *params["dec1b"], True)
    out = _conv_ref(d1, *params["final"], False)
    return jnp.transpose(out, (0, 3, 1, 2))


# ----------------------------------------------------------------------------
if __name__ == "__main__":
    key = jax.random.PRNGKey(0)
    k_params, k_x = jax.random.split(key)

    params = init_unet_params(k_params, cin=CIN, feat=FEAT, cout=COUT)
    x1 = jax.random.normal(k_x, (2, CIN, H, W), jnp.float32)   # NCHW, like PyTorch

    out = jax.block_until_ready(network1_forward(params, x1))
    ref = jax.block_until_ready(unet_forward_ref(params, x1))

    assert out.shape == (2, COUT, H, W), out.shape
    max_err = float(jnp.max(jnp.abs(out - ref)))
    assert max_err < 1e-3, max_err

    print("KERNEL_OK")
</pallas_src>

<mosaic_0001>
module attributes {stable_mosaic.version = 11 : i64} {
  func.func @_unet_kernel(%arg0: i32, %arg1: memref<1x4x256xf32, #tpu.memory_space<vmem>>, %arg2: memref<9x8x4xf32, #tpu.memory_space<vmem>>, %arg3: memref<8x1xf32, #tpu.memory_space<vmem>>, %arg4: memref<9x8x8xf32, #tpu.memory_space<vmem>>, %arg5: memref<8x1xf32, #tpu.memory_space<vmem>>, %arg6: memref<9x16x8xf32, #tpu.memory_space<vmem>>, %arg7: memref<16x1xf32, #tpu.memory_space<vmem>>, %arg8: memref<9x16x16xf32, #tpu.memory_space<vmem>>, %arg9: memref<16x1xf32, #tpu.memory_space<vmem>>, %arg10: memref<9x8x16xf32, #tpu.memory_space<vmem>>, %arg11: memref<8x1xf32, #tpu.memory_space<vmem>>, %arg12: memref<9x8x8xf32, #tpu.memory_space<vmem>>, %arg13: memref<9x8x8xf32, #tpu.memory_space<vmem>>, %arg14: memref<8x1xf32, #tpu.memory_space<vmem>>, %arg15: memref<9x8x8xf32, #tpu.memory_space<vmem>>, %arg16: memref<8x1xf32, #tpu.memory_space<vmem>>, %arg17: memref<2x8xf32, #tpu.memory_space<vmem>>, %arg18: memref<2x1xf32, #tpu.memory_space<vmem>>, %arg19: memref<9x1x256xf32, #tpu.memory_space<vmem>>, %arg20: memref<9x1x128xf32, #tpu.memory_space<vmem>>, %arg21: memref<256x128xf32, #tpu.memory_space<vmem>>, %arg22: memref<128x256xf32, #tpu.memory_space<vmem>>, %arg23: memref<1x2x256xf32, #tpu.memory_space<vmem>>) attributes {dimension_semantics = [#tpu.dimension_semantics<parallel>], iteration_bounds = array<i64: 2>, scalar_prefetch = 0 : i64, scratch_operands = 0 : i64, tpu.core_type = #tpu.core_type<tc>, window_params = [{transform_indices = @transform_0, window_bounds = array<i64: 1, 4, 256>}, {pipeline_mode = #tpu.pipeline_mode<synchronous>, transform_indices = @transform_1, window_bounds = array<i64: 9, 8, 4>}, {pipeline_mode = #tpu.pipeline_mode<synchronous>, transform_indices = @transform_2, window_bounds = array<i64: 8, 1>}, {pipeline_mode = #tpu.pipeline_mode<synchronous>, transform_indices = @transform_3, window_bounds = array<i64: 9, 8, 8>}, {pipeline_mode = #tpu.pipeline_mode<synchronous>, transform_indices = @transform_4, window_bounds = array<i64: 8, 1>}, {pipeline_mode = #tpu.pipeline_mode<synchronous>, transform_indices = @transform_5, window_bounds = array<i64: 9, 16, 8>}, {pipeline_mode = #tpu.pipeline_mode<synchronous>, transform_indices = @transform_6, window_bounds = array<i64: 16, 1>}, {pipeline_mode = #tpu.pipeline_mode<synchronous>, transform_indices = @transform_7, window_bounds = array<i64: 9, 16, 16>}, {pipeline_mode = #tpu.pipeline_mode<synchronous>, transform_indices = @transform_8, window_bounds = array<i64: 16, 1>}, {pipeline_mode = #tpu.pipeline_mode<synchronous>, transform_indices = @transform_9, window_bounds = array<i64: 9, 8, 16>}, {pipeline_mode = #tpu.pipeline_mode<synchronous>, transform_indices = @transform_10, window_bounds = array<i64: 8, 1>}, {pipeline_mode = #tpu.pipeline_mode<synchronous>, transform_indices = @transform_11, window_bounds = array<i64: 9, 8, 8>}, {pipeline_mode = #tpu.pipeline_mode<synchronous>, transform_indices = @transform_12, window_bounds = array<i64: 9, 8, 8>}, {pipeline_mode = #tpu.pipeline_mode<synchronous>, transform_indices = @transform_13, window_bounds = array<i64: 8, 1>}, {pipeline_mode = #tpu.pipeline_mode<synchronous>, transform_indices = @transform_14, window_bounds = array<i64: 9, 8, 8>}, {pipeline_mode = #tpu.pipeline_mode<synchronous>, transform_indices = @transform_15, window_bounds = array<i64: 8, 1>}, {pipeline_mode = #tpu.pipeline_mode<synchronous>, transform_indices = @transform_16, window_bounds = array<i64: 2, 8>}, {pipeline_mode = #tpu.pipeline_mode<synchronous>, transform_indices = @transform_17, window_bounds = array<i64: 2, 1>}, {pipeline_mode = #tpu.pipeline_mode<synchronous>, transform_indices = @transform_18, window_bounds = array<i64: 9, 1, 256>}, {pipeline_mode = #tpu.pipeline_mode<synchronous>, transform_indices = @transform_19, window_bounds = array<i64: 9, 1, 128>}, {pipeline_mode = #tpu.pipeline_mode<synchronous>, transform_indices = @transform_20, window_bounds = array<i64: 256, 128>}, {pipeline_mode = #tpu.pipeline_mode<synchronous>, transform_indices = @transform_21, window_bounds = array<i64: 128, 256>}, {transform_indices = @transform_22, window_bounds = array<i64: 1, 2, 256>}]} {
    %c0 = arith.constant 0 : index
    %c0_0 = arith.constant 0 : index
    %c0_1 = arith.constant 0 : index
    %0 = vector.load %arg1[%c0, %c0_0, %c0_1] : memref<1x4x256xf32, #tpu.memory_space<vmem>>, vector<1x4x256xf32>
    %1 = vector.shape_cast %0 : vector<1x4x256xf32> to vector<4x256xf32>
    %c0_2 = arith.constant 0 : index
    %c0_3 = arith.constant 0 : index
    %2 = vector.load %arg3[%c0_2, %c0_3] : memref<8x1xf32, #tpu.memory_space<vmem>>, vector<8x1xf32>
    %3 = vector.shape_cast %2 : vector<8x1xf32> to vector<8x1xf32>
    %4 = vector.broadcast %3 : vector<8x1xf32> to vector<8x256xf32>
    %c0_4 = arith.constant 0 : index
    %c0_5 = arith.constant 0 : index
    %c0_6 = arith.constant 0 : index
    %5 = vector.load %arg19[%c0_4, %c0_5, %c0_6] : memref<9x1x256xf32, #tpu.memory_space<vmem>>, vector<1x1x256xf32>
    %6 = vector.shape_cast %5 : vector<1x1x256xf32> to vector<1x256xf32>
    %c17_i32 = arith.constant 17 : i32
    %7 = tpu.dynamic_rotate %1 by %c17_i32 dim 1 : vector<4x256xf32>, i32 -> vector<4x256xf32>
    %8 = vector.broadcast %6 : vector<1x256xf32> to vector<4x256xf32>
    %9 = arith.mulf %7, %8 : vector<4x256xf32>
    %c0_7 = arith.constant 0 : index
    %c0_8 = arith.constant 0 : index
    %c0_9 = arith.constant 0 : index
    %10 = vector.load %arg2[%c0_7, %c0_8, %c0_9] : memref<9x8x4xf32, #tpu.memory_space<vmem>>, vector<1x8x4xf32>
    %11 = vector.shape_cast %10 : vector<1x8x4xf32> to vector<8x4xf32>
    %cst = arith.constant dense<0.000000e+00> : vector<8x256xf32>
    %12 = tpu.matmul %11, %9, %cst {dimension_numbers = #tpu.dot_dimension_numbers<[1], [0], [0], [1], [0, 0, 1, 1], [], []>} : vector<8x4xf32>, vector<4x256xf32>, vector<8x256xf32> -> vector<8x256xf32>
    %13 = arith.addf %4, %12 : vector<8x256xf32>
    %c1 = arith.constant 1 : index
    %c0_10 = arith.constant 0 : index
    %c0_11 = arith.constant 0 : index
    %14 = vector.load %arg19[%c1, %c0_10, %c0_11] : memref<9x1x256xf32, #tpu.memory_space<vmem>>, vector<1x1x256xf32>
    %15 = vector.shape_cast %14 : vector<1x1x256xf32> to vector<1x256xf32>
    %c16_i32 = arith.constant 16 : i32
    %16 = tpu.dynamic_rotate %1 by %c16_i32 dim 1 : vector<4x256xf32>, i32 -> vector<4x256xf32>
    %17 = vector.broadcast %15 : vector<1x256xf32> to vector<4x256xf32>
    %18 = arith.mulf %16, %17 : vector<4x256xf32>
    %c1_12 = arith.constant 1 : index
    %c0_13 = arith.constant 0 : index
    %c0_14 = arith.constant 0 : index
    %19 = vector.load %arg2[%c1_12, %c0_13, %c0_14] : memref<9x8x4xf32, #tpu.memory_space<vmem>>, vector<1x8x4xf32>
    %20 = vector.shape_cast %19 : vector<1x8x4xf32> to vector<8x4xf32>
    %cst_15 = arith.constant dense<0.000000e+00> : vector<8x256xf32>
    %21 = tpu.matmul %20, %18, %cst_15 {dimension_numbers = #tpu.dot_dimension_numbers<[1], [0], [0], [1], [0, 0, 1, 1], [], []>} : vector<8x4xf32>, vector<4x256xf32>, vector<8x256xf32> -> vector<8x256xf32>
    %22 = arith.addf %13, %21 : vector<8x256xf32>
    %c2 = arith.constant 2 : index
    %c0_16 = arith.constant 0 : index
    %c0_17 = arith.constant 0 : index
    %23 = vector.load %arg19[%c2, %c0_16, %c0_17] : memref<9x1x256xf32, #tpu.memory_space<vmem>>, vector<1x1x256xf32>
    %24 = vector.shape_cast %23 : vector<1x1x256xf32> to vector<1x256xf32>
    %c15_i32 = arith.constant 15 : i32
    %25 = tpu.dynamic_rotate %1 by %c15_i32 dim 1 : vector<4x256xf32>, i32 -> vector<4x256xf32>
    %26 = vector.broadcast %24 : vector<1x256xf32> to vector<4x256xf32>
    %27 = arith.mulf %25, %26 : vector<4x256xf32>
    %c2_18 = arith.constant 2 : index
    %c0_19 = arith.constant 0 : index
    %c0_20 = arith.constant 0 : index
    %28 = vector.load %arg2[%c2_18, %c0_19, %c0_20] : memref<9x8x4xf32, #tpu.memory_space<vmem>>, vector<1x8x4xf32>
    %29 = vector.shape_cast %28 : vector<1x8x4xf32> to vector<8x4xf32>
    %cst_21 = arith.constant dense<0.000000e+00> : vector<8x256xf32>
    %30 = tpu.matmul %29, %27, %cst_21 {dimension_numbers = #tpu.dot_dimension_numbers<[1], [0], [0], [1], [0, 0, 1, 1], [], []>} : vector<8x4xf32>, vector<4x256xf32>, vector<8x256xf32> -> vector<8x256xf32>
    %31 = arith.addf %22, %30 : vector<8x256xf32>
    %c3 = arith.constant 3 : index
    %c0_22 = arith.constant 0 : index
    %c0_23 = arith.constant 0 : index
    %32 = vector.load %arg19[%c3, %c0_22, %c0_23] : memref<9x1x256xf32, #tpu.memory_space<vmem>>, vector<1x1x256xf32>
    %33 = vector.shape_cast %32 : vector<1x1x256xf32> to vector<1x256xf32>
    %c1_i32 = arith.constant 1 : i32
    %34 = tpu.dynamic_rotate %1 by %c1_i32 dim 1 : vector<4x256xf32>, i32 -> vector<4x256xf32>
    %35 = vector.broadcast %33 : vector<1x256xf32> to vector<4x256xf32>
    %36 = arith.mulf %34, %35 : vector<4x256xf32>
    %c3_24 = arith.constant 3 : index
    %c0_25 = arith.constant 0 : index
    %c0_26 = arith.constant 0 : index
    %37 = vector.load %arg2[%c3_24, %c0_25, %c0_26] : memref<9x8x4xf32, #tpu.memory_space<vmem>>, vector<1x8x4xf32>
    %38 = vector.shape_cast %37 : vector<1x8x4xf32> to vector<8x4xf32>
    %cst_27 = arith.constant dense<0.000000e+00> : vector<8x256xf32>
    %39 = tpu.matmul %38, %36, %cst_27 {dimension_numbers = #tpu.dot_dimension_numbers<[1], [0], [0], [1], [0, 0, 1, 1], [], []>} : vector<8x4xf32>, vector<4x256xf32>, vector<8x256xf32> -> vector<8x256xf32>
    %40 = arith.addf %31, %39 : vector<8x256xf32>
    %c4 = arith.constant 4 : index
    %c0_28 = arith.constant 0 : index
    %c0_29 = arith.constant 0 : index
    %41 = vector.load %arg2[%c4, %c0_28, %c0_29] : memref<9x8x4xf32, #tpu.memory_space<vmem>>, vector<1x8x4xf32>
    %42 = vector.shape_cast %41 : vector<1x8x4xf32> to vector<8x4xf32>
    %cst_30 = arith.constant dense<0.000000e+00> : vector<8x256xf32>
    %43 = tpu.matmul %42, %1, %cst_30 {dimension_numbers = #tpu.dot_dimension_numbers<[1], [0], [0], [1], [0, 0, 1, 1], [], []>} : vector<8x4xf32>, vector<4x256xf32>, vector<8x256xf32> -> vector<8x256xf32>
    %44 = arith.addf %40, %43 : vector<8x256xf32>
    %c5 = arith.constant 5 : index
    %c0_31 = arith.constant 0 : index
    %c0_32 = arith.constant 0 : index
    %45 = vector.load %arg19[%c5, %c0_31, %c0_32] : memref<9x1x256xf32, #tpu.memory_space<vmem>>, vector<1x1x256xf32>
    %46 = vector.shape_cast %45 : vector<1x1x256xf32> to vector<1x256xf32>
    %c255_i32 = arith.constant 255 : i32
    %47 = tpu.dynamic_rotate %1 by %c255_i32 dim 1 : vector<4x256xf32>, i32 -> vector<4x256xf32>
    %48 = vector.broadcast %46 : vector<1x256xf32> to vector<4x256xf32>
    %49 = arith.mulf %47, %48 : vector<4x256xf32>
    %c5_33 = arith.constant 5 : index
    %c0_34 = arith.constant 0 : index
    %c0_35 = arith.constant 0 : index
    %50 = vector.load %arg2[%c5_33, %c0_34, %c0_35] : memref<9x8x4xf32, #tpu.memory_space<vmem>>, vector<1x8x4xf32>
    %51 = vector.shape_cast %50 : vector<1x8x4xf32> to vector<8x4xf32>
    %cst_36 = arith.constant dense<0.000000e+00> : vector<8x256xf32>
    %52 = tpu.matmul %51, %49, %cst_36 {dimension_numbers = #tpu.dot_dimension_numbers<[1], [0], [0], [1], [0, 0, 1, 1], [], []>} : vector<8x4xf32>, vector<4x256xf32>, vector<8x256xf32> -> vector<8x256xf32>
    %53 = arith.addf %44, %52 : vector<8x256xf32>
    %c6 = arith.constant 6 : index
    %c0_37 = arith.constant 0 : index
    %c0_38 = arith.constant 0 : index
    %54 = vector.load %arg19[%c6, %c0_37, %c0_38] : memref<9x1x256xf32, #tpu.memory_space<vmem>>, vector<1x1x256xf32>
    %55 = vector.shape_cast %54 : vector<1x1x256xf32> to vector<1x256xf32>
    %c241_i32 = arith.constant 241 : i32
    %56 = tpu.dynamic_rotate %1 by %c241_i32 dim 1 : vector<4x256xf32>, i32 -> vector<4x256xf32>
    %57 = vector.broadcast %55 : vector<1x256xf32> to vector<4x256xf32>
    %58 = arith.mulf %56, %57 : vector<4x256xf32>
    %c6_39 = arith.constant 6 : index
    %c0_40 = arith.constant 0 : index
    %c0_41 = arith.constant 0 : index
    %59 = vector.load %arg2[%c6_39, %c0_40, %c0_41] : memref<9x8x4xf32, #tpu.memory_space<vmem>>, vector<1x8x4xf32>
    %60 = vector.shape_cast %59 : vector<1x8x4xf32> to vector<8x4xf32>
    %cst_42 = arith.constant dense<0.000000e+00> : vector<8x256xf32>
    %61 = tpu.matmul %60, %58, %cst_42 {dimension_numbers = #tpu.dot_dimension_numbers<[1], [0], [0], [1], [0, 0, 1, 1], [], []>} : vector<8x4xf32>, vector<4x256xf32>, vector<8x256xf32> -> vector<8x256xf32>
    %62 = arith.addf %53, %61 : vector<8x256xf32>
    %c7 = arith.constant 7 : index
    %c0_43 = arith.constant 0 : index
    %c0_44 = arith.constant 0 : index
    %63 = vector.load %arg19[%c7, %c0_43, %c0_44] : memref<9x1x256xf32, #tpu.memory_space<vmem>>, vector<1x1x256xf32>
    %64 = vector.shape_cast %63 : vector<1x1x256xf32> to vector<1x256xf32>
    %c240_i32 = arith.constant 240 : i32
    %65 = tpu.dynamic_rotate %1 by %c240_i32 dim 1 : vector<4x256xf32>, i32 -> vector<4x256xf32>
    %66 = vector.broadcast %64 : vector<1x256xf32> to vector<4x256xf32>
    %67 = arith.mulf %65, %66 : vector<4x256xf32>
    %c7_45 = arith.constant 7 : index
    %c0_46 = arith.constant 0 : index
    %c0_47 = arith.constant 0 : index
    %68 = vector.load %arg2[%c7_45, %c0_46, %c0_47] : memref<9x8x4xf32, #tpu.memory_space<vmem>>, vector<1x8x4xf32>
    %69 = vector.shape_cast %68 : vector<1x8x4xf32> to vector<8x4xf32>
    %cst_48 = arith.constant dense<0.000000e+00> : vector<8x256xf32>
    %70 = tpu.matmul %69, %67, %cst_48 {dimension_numbers = #tpu.dot_dimension_numbers<[1], [0], [0], [1], [0, 0, 1, 1], [], []>} : vector<8x4xf32>, vector<4x256xf32>, vector<8x256xf32> -> vector<8x256xf32>
    %71 = arith.addf %62, %70 : vector<8x256xf32>
    %c8 = arith.constant 8 : index
    %c0_49 = arith.constant 0 : index
    %c0_50 = arith.constant 0 : index
    %72 = vector.load %arg19[%c8, %c0_49, %c0_50] : memref<9x1x256xf32, #tpu.memory_space<vmem>>, vector<1x1x256xf32>
    %73 = vector.shape_cast %72 : vector<1x1x256xf32> to vector<1x256xf32>
    %c239_i32 = arith.constant 239 : i32
    %74 = tpu.dynamic_rotate %1 by %c239_i32 dim 1 : vector<4x256xf32>, i32 -> vector<4x256xf32>
    %75 = vector.broadcast %73 : vector<1x256xf32> to vector<4x256xf32>
    %76 = arith.mulf %74, %75 : vector<4x256xf32>
    %c8_51 = arith.constant 8 : index
    %c0_52 = arith.constant 0 : index
    %c0_53 = arith.constant 0 : index
    %77 = vector.load %arg2[%c8_51, %c0_52, %c0_53] : memref<9x8x4xf32, #tpu.memory_space<vmem>>, vector<1x8x4xf32>
    %78 = vector.shape_cast %77 : vector<1x8x4xf32> to vector<8x4xf32>
    %cst_54 = arith.constant dense<0.000000e+00> : vector<8x256xf32>
    %79 = tpu.matmul %78, %76, %cst_54 {dimension_numbers = #tpu.dot_dimension_numbers<[1], [0], [0], [1], [0, 0, 1, 1], [], []>} : vector<8x4xf32>, vector<4x256xf32>, vector<8x256xf32> -> vector<8x256xf32>
    %80 = arith.addf %71, %79 : vector<8x256xf32>
    %cst_55 = arith.constant 0.000000e+00 : f32
    %81 = vector.broadcast %cst_55 : f32 to vector<8x256xf32>
    %82 = arith.maximumf %80, %81 : vector<8x256xf32>
    %c0_56 = arith.constant 0 : index
    %c0_57 = arith.constant 0 : index
    %83 = vector.load %arg5[%c0_56, %c0_57] : memref<8x1xf32, #tpu.memory_space<vmem>>, vector<8x1xf32>
    %84 = vector.shape_cast %83 : vector<8x1xf32> to vector<8x1xf32>
    %85 = vector.broadcast %84 : vector<8x1xf32> to vector<8x256xf32>
    %c0_58 = arith.constant 0 : index
    %c0_59 = arith.constant 0 : index
    %c0_60 = arith.constant 0 : index
    %86 = vector.load %arg19[%c0_58, %c0_59, %c0_60] : memref<9x1x256xf32, #tpu.memory_space<vmem>>, vector<1x1x256xf32>
    %87 = vector.shape_cast %86 : vector<1x1x256xf32> to vector<1x256xf32>
    %c17_i32_61 = arith.constant 17 : i32
    %88 = tpu.dynamic_rotate %82 by %c17_i32_61 dim 1 : vector<8x256xf32>, i32 -> vector<8x256xf32>
    %89 = vector.broadcast %87 : vector<1x256xf32> to vector<8x256xf32>
    %90 = arith.mulf %88, %89 : vector<8x256xf32>
    %c0_62 = arith.constant 0 : index
    %c0_63 = arith.constant 0 : index
    %c0_64 = arith.constant 0 : index
    %91 = vector.load %arg4[%c0_62, %c0_63, %c0_64] : memref<9x8x8xf32, #tpu.memory_space<vmem>>, vector<1x8x8xf32>
    %92 = vector.shape_cast %91 : vector<1x8x8xf32> to vector<8x8xf32>
    %cst_65 = arith.constant dense<0.000000e+00> : vector<8x256xf32>
    %93 = tpu.matmul %92, %90, %cst_65 {dimension_numbers = #tpu.dot_dimension_numbers<[1], [0], [0], [1], [0, 0, 1, 1], [], []>} : vector<8x8xf32>, vector<8x256xf32>, vector<8x256xf32> -> vector<8x256xf32>
    %94 = arith.addf %85, %93 : vector<8x256xf32>
    %c1_66 = arith.constant 1 : index
    %c0_67 = arith.constant 0 : index
    %c0_68 = arith.constant 0 : index
    %95 = vector.load %arg19[%c1_66, %c0_67, %c0_68] : memref<9x1x256xf32, #tpu.memory_space<vmem>>, vector<1x1x256xf32>
    %96 = vector.shape_cast %95 : vector<1x1x256xf32> to vector<1x256xf32>
    %c16_i32_69 = arith.constant 16 : i32
    %97 = tpu.dynamic_rotate %82 by %c16_i32_69 dim 1 : vector<8x256xf32>, i32 -> vector<8x256xf32>
    %98 = vector.broadcast %96 : vector<1x256xf32> to vector<8x256xf32>
    %99 = arith.mulf %97, %98 : vector<8x256xf32>
    %c1_70 = arith.constant 1 : index
    %c0_71 = arith.constant 0 : index
    %c0_72 = arith.constant 0 : index
    %100 = vector.load %arg4[%c1_70, %c0_71, %c0_72] : memref<9x8x8xf32, #tpu.memory_space<vmem>>, vector<1x8x8xf32>
    %101 = vector.shape_cast %100 : vector<1x8x8xf32> to vector<8x8xf32>
    %cst_73 = arith.constant dense<0.000000e+00> : vector<8x256xf32>
    %102 = tpu.matmul %101, %99, %cst_73 {dimension_numbers = #tpu.dot_dimension_numbers<[1], [0], [0], [1], [0, 0, 1, 1], [], []>} : vector<8x8xf32>, vector<8x256xf32>, vector<8x256xf32> -> vector<8x256xf32>
    %103 = arith.addf %94, %102 : vector<8x256xf32>
    %c2_74 = arith.constant 2 : index
    %c0_75 = arith.constant 0 : index
    %c0_76 = arith.constant 0 : index
    %104 = vector.load %arg19[%c2_74, %c0_75, %c0_76] : memref<9x1x256xf32, #tpu.memory_space<vmem>>, vector<1x1x256xf32>
    %105 = vector.shape_cast %104 : vector<1x1x256xf32> to vector<1x256xf32>
    %c15_i32_77 = arith.constant 15 : i32
    %106 = tpu.dynamic_rotate %82 by %c15_i32_77 dim 1 : vector<8x256xf32>, i32 -> vector<8x256xf32>
    %107 = vector.broadcast %105 : vector<1x256xf32> to vector<8x256xf32>
    %108 = arith.mulf %106, %107 : vector<8x256xf32>
    %c2_78 = arith.constant 2 : index
    %c0_79 = arith.constant 0 : index
    %c0_80 = arith.constant 0 : index
    %109 = vector.load %arg4[%c2_78, %c0_79, %c0_80] : memref<9x8x8xf32, #tpu.memory_space<vmem>>, vector<1x8x8xf32>
    %110 = vector.shape_cast %109 : vector<1x8x8xf32> to vector<8x8xf32>
    %cst_81 = arith.constant dense<0.000000e+00> : vector<8x256xf32>
    %111 = tpu.matmul %110, %108, %cst_81 {dimension_numbers = #tpu.dot_dimension_numbers<[1], [0], [0], [1], [0, 0, 1, 1], [], []>} : vector<8x8xf32>, vector<8x256xf32>, vector<8x256xf32> -> vector<8x256xf32>
    %112 = arith.addf %103, %111 : vector<8x256xf32>
    %c3_82 = arith.constant 3 : index
    %c0_83 = arith.constant 0 : index
    %c0_84 = arith.constant 0 : index
    %113 = vector.load %arg19[%c3_82, %c0_83, %c0_84] : memref<9x1x256xf32, #tpu.memory_space<vmem>>, vector<1x1x256xf32>
    %114 = vector.shape_cast %113 : vector<1x1x256xf32> to vector<1x256xf32>
    %c1_i32_85 = arith.constant 1 : i32
    %115 = tpu.dynamic_rotate %82 by %c1_i32_85 dim 1 : vector<8x256xf32>, i32 -> vector<8x256xf32>
    %116 = vector.broadcast %114 : vector<1x256xf32> to vector<8x256xf32>
    %117 = arith.mulf %115, %116 : vector<8x256xf32>
    %c3_86 = arith.constant 3 : index
    %c0_87 = arith.constant 0 : index
    %c0_88 = arith.constant 0 : index
    %118 = vector.load %arg4[%c3_86, %c0_87, %c0_88] : memref<9x8x8xf32, #tpu.memory_space<vmem>>, vector<1x8x8xf32>
    %119 = vector.shape_cast %118 : vector<1x8x8xf32> to vector<8x8xf32>
    %cst_89 = arith.constant dense<0.000000e+00> : vector<8x256xf32>
    %120 = tpu.matmul %119, %117, %cst_89 {dimension_numbers = #tpu.dot_dimension_numbers<[1], [0], [0], [1], [0, 0, 1, 1], [], []>} : vector<8x8xf32>, vector<8x256xf32>, vector<8x256xf32> -> vector<8x256xf32>
    %121 = arith.addf %112, %120 : vector<8x256xf32>
    %c4_90 = arith.constant 4 : index
    %c0_91 = arith.constant 0 : index
    %c0_92 = arith.constant 0 : index
    %122 = vector.load %arg4[%c4_90, %c0_91, %c0_92] : memref<9x8x8xf32, #tpu.memory_space<vmem>>, vector<1x8x8xf32>
    %123 = vector.shape_cast %122 : vector<1x8x8xf32> to vector<8x8xf32>
    %cst_93 = arith.constant dense<0.000000e+00> : vector<8x256xf32>
    %124 = tpu.matmul %123, %82, %cst_93 {dimension_numbers = #tpu.dot_dimension_numbers<[1], [0], [0], [1], [0, 0, 1, 1], [], []>} : vector<8x8xf32>, vector<8x256xf32>, vector<8x256xf32> -> vector<8x256xf32>
    %125 = arith.addf %121, %124 : vector<8x256xf32>
    %c5_94 = arith.constant 5 : index
    %c0_95 = arith.constant 0 : index
    %c0_96 = arith.constant 0 : index
    %126 = vector.load %arg19[%c5_94, %c0_95, %c0_96] : memref<9x1x256xf32, #tpu.memory_space<vmem>>, vector<1x1x256xf32>
    %127 = vector.shape_cast %126 : vector<1x1x256xf32> to vector<1x256xf32>
    %c255_i32_97 = arith.constant 255 : i32
    %128 = tpu.dynamic_rotate %82 by %c255_i32_97 dim 1 : vector<8x256xf32>, i32 -> vector<8x256xf32>
    %129 = vector.broadcast %127 : vector<1x256xf32> to vector<8x256xf32>
    %130 = arith.mulf %128, %129 : vector<8x256xf32>
    %c5_98 = arith.constant 5 : index
    %c0_99 = arith.constant 0 : index
    %c0_100 = arith.constant 0 : index
    %131 = vector.load %arg4[%c5_98, %c0_99, %c0_100] : memref<9x8x8xf32, #tpu.memory_space<vmem>>, vector<1x8x8xf32>
    %132 = vector.shape_cast %131 : vector<1x8x8xf32> to vector<8x8xf32>
    %cst_101 = arith.constant dense<0.000000e+00> : vector<8x256xf32>
    %133 = tpu.matmul %132, %130, %cst_101 {dimension_numbers = #tpu.dot_dimension_numbers<[1], [0], [0], [1], [0, 0, 1, 1], [], []>} : vector<8x8xf32>, vector<8x256xf32>, vector<8x256xf32> -> vector<8x256xf32>
    %134 = arith.addf %125, %133 : vector<8x256xf32>
    %c6_102 = arith.constant 6 : index
    %c0_103 = arith.constant 0 : index
    %c0_104 = arith.constant 0 : index
    %135 = vector.load %arg19[%c6_102, %c0_103, %c0_104] : memref<9x1x256xf32, #tpu.memory_space<vmem>>, vector<1x1x256xf32>
    %136 = vector.shape_cast %135 : vector<1x1x256xf32> to vector<1x256xf32>
    %c241_i32_105 = arith.constant 241 : i32
    %137 = tpu.dynamic_rotate %82 by %c241_i32_105 dim 1 : vector<8x256xf32>, i32 -> vector<8x256xf32>
    %138 = vector.broadcast %136 : vector<1x256xf32> to vector<8x256xf32>
    %139 = arith.mulf %137, %138 : vector<8x256xf32>
    %c6_106 = arith.constant 6 : index
    %c0_107 = arith.constant 0 : index
    %c0_108 = arith.constant 0 : index
    %140 = vector.load %arg4[%c6_106, %c0_107, %c0_108] : memref<9x8x8xf32, #tpu.memory_space<vmem>>, vector<1x8x8xf32>
    %141 = vector.shape_cast %140 : vector<1x8x8xf32> to vector<8x8xf32>
    %cst_109 = arith.constant dense<0.000000e+00> : vector<8x256xf32>
    %142 = tpu.matmul %141, %139, %cst_109 {dimension_numbers = #tpu.dot_dimension_numbers<[1], [0], [0], [1], [0, 0, 1, 1], [], []>} : vector<8x8xf32>, vector<8x256xf32>, vector<8x256xf32> -> vector<8x256xf32>
    %143 = arith.addf %134, %142 : vector<8x256xf32>
    %c7_110 = arith.constant 7 : index
    %c0_111 = arith.constant 0 : index
    %c0_112 = arith.constant 0 : index
    %144 = vector.load %arg19[%c7_110, %c0_111, %c0_112] : memref<9x1x256xf32, #tpu.memory_space<vmem>>, vector<1x1x256xf32>
    %145 = vector.shape_cast %144 : vector<1x1x256xf32> to vector<1x256xf32>
    %c240_i32_113 = arith.constant 240 : i32
    %146 = tpu.dynamic_rotate %82 by %c240_i32_113 dim 1 : vector<8x256xf32>, i32 -> vector<8x256xf32>
    %147 = vector.broadcast %145 : vector<1x256xf32> to vector<8x256xf32>
    %148 = arith.mulf %146, %147 : vector<8x256xf32>
    %c7_114 = arith.constant 7 : index
    %c0_115 = arith.constant 0 : index
    %c0_116 = arith.constant 0 : index
    %149 = vector.load %arg4[%c7_114, %c0_115, %c0_116] : memref<9x8x8xf32, #tpu.memory_space<vmem>>, vector<1x8x8xf32>
    %150 = vector.shape_cast %149 : vector<1x8x8xf32> to vector<8x8xf32>
    %cst_117 = arith.constant dense<0.000000e+00> : vector<8x256xf32>
    %151 = tpu.matmul %150, %148, %cst_117 {dimension_numbers = #tpu.dot_dimension_numbers<[1], [0], [0], [1], [0, 0, 1, 1], [], []>} : vector<8x8xf32>, vector<8x256xf32>, vector<8x256xf32> -> vector<8x256xf32>
    %152 = arith.addf %143, %151 : vector<8x256xf32>
    %c8_118 = arith.constant 8 : index
    %c0_119 = arith.constant 0 : index
    %c0_120 = arith.constant 0 : index
    %153 = vector.load %arg19[%c8_118, %c0_119, %c0_120] : memref<9x1x256xf32, #tpu.memory_space<vmem>>, vector<1x1x256xf32>
    %154 = vector.shape_cast %153 : vector<1x1x256xf32> to vector<1x256xf32>
    %c239_i32_121 = arith.constant 239 : i32
    %155 = tpu.dynamic_rotate %82 by %c239_i32_121 dim 1 : vector<8x256xf32>, i32 -> vector<8x256xf32>
    %156 = vector.broadcast %154 : vector<1x256xf32> to vector<8x256xf32>
    %157 = arith.mulf %155, %156 : vector<8x256xf32>
    %c8_122 = arith.constant 8 : index
    %c0_123 = arith.constant 0 : index
    %c0_124 = arith.constant 0 : index
    %158 = vector.load %arg4[%c8_122, %c0_123, %c0_124] : memref<9x8x8xf32, #tpu.memory_space<vmem>>, vector<1x8x8xf32>
    %159 = vector.shape_cast %158 : vector<1x8x8xf32> to vector<8x8xf32>
    %cst_125 = arith.constant dense<0.000000e+00> : vector<8x256xf32>
    %160 = tpu.matmul %159, %157, %cst_125 {dimension_numbers = #tpu.dot_dimension_numbers<[1], [0], [0], [1], [0, 0, 1, 1], [], []>} : vector<8x8xf32>, vector<8x256xf32>, vector<8x256xf32> -> vector<8x256xf32>
    %161 = arith.addf %152, %160 : vector<8x256xf32>
    %cst_126 = arith.constant 0.000000e+00 : f32
    %162 = vector.broadcast %cst_126 : f32 to vector<8x256xf32>
    %163 = arith.maximumf %161, %162 : vector<8x256xf32>
    %c255_i32_127 = arith.constant 255 : i32
    %164 = tpu.dynamic_rotate %163 by %c255_i32_127 dim 1 : vector<8x256xf32>, i32 -> vector<8x256xf32>
    %165 = arith.maximumf %163, %164 : vector<8x256xf32>
    %c240_i32_128 = arith.constant 240 : i32
    %166 = tpu.dynamic_rotate %165 by %c240_i32_128 dim 1 : vector<8x256xf32>, i32 -> vector<8x256xf32>
    %167 = arith.maximumf %165, %166 : vector<8x256xf32>
    %c0_129 = arith.constant 0 : index
    %c0_130 = arith.constant 0 : index
    %168 = vector.load %arg21[%c0_129, %c0_130] : memref<256x128xf32, #tpu.memory_space<vmem>>, vector<256x128xf32>
    %cst_131 = arith.constant dense<0.000000e+00> : vector<8x128xf32>
    %169 = tpu.matmul %167, %168, %cst_131 {dimension_numbers = #tpu.dot_dimension_numbers<[1], [0], [0], [1], [0, 0, 1, 1], [], []>} : vector<8x256xf32>, vector<256x128xf32>, vector<8x128xf32> -> vector<8x128xf32>
    %c0_132 = arith.constant 0 : index
    %c0_133 = arith.constant 0 : index
    %170 = vector.load %arg7[%c0_132, %c0_133] : memref<16x1xf32, #tpu.memory_space<vmem>>, vector<16x1xf32>
    %171 = vector.shape_cast %170 : vector<16x1xf32> to vector<16x1xf32>
    %172 = vector.broadcast %171 : vector<16x1xf32> to vector<16x128xf32>
    %c0_134 = arith.constant 0 : index
    %c0_135 = arith.constant 0 : index
    %c0_136 = arith.constant 0 : index
    %173 = vector.load %arg20[%c0_134, %c0_135, %c0_136] : memref<9x1x128xf32, #tpu.memory_space<vmem>>, vector<1x1x128xf32>
    %174 = vector.shape_cast %173 : vector<1x1x128xf32> to vector<1x128xf32>
    %c9_i32 = arith.constant 9 : i32
    %175 = tpu.dynamic_rotate %169 by %c9_i32 dim 1 : vector<8x128xf32>, i32 -> vector<8x128xf32>
    %176 = vector.broadcast %174 : vector<1x128xf32> to vector<8x128xf32>
    %177 = arith.mulf %175, %176 : vector<8x128xf32>
    %c0_137 = arith.constant 0 : index
    %c0_138 = arith.constant 0 : index
    %c0_139 = arith.constant 0 : index
    %178 = vector.load %arg6[%c0_137, %c0_138, %c0_139] : memref<9x16x8xf32, #tpu.memory_space<vmem>>, vector<1x16x8xf32>
    %179 = vector.shape_cast %178 : vector<1x16x8xf32> to vector<16x8xf32>
    %cst_140 = arith.constant dense<0.000000e+00> : vector<16x128xf32>
    %180 = tpu.matmul %179, %177, %cst_140 {dimension_numbers = #tpu.dot_dimension_numbers<[1], [0], [0], [1], [0, 0, 1, 1], [], []>} : vector<16x8xf32>, vector<8x128xf32>, vector<16x128xf32> -> vector<16x128xf32>
    %181 = arith.addf %172, %180 : vector<16x128xf32>
    %c1_141 = arith.constant 1 : index
    %c0_142 = arith.constant 0 : index
    %c0_143 = arith.constant 0 : index
    %182 = vector.load %arg20[%c1_141, %c0_142, %c0_143] : memref<9x1x128xf32, #tpu.memory_space<vmem>>, vector<1x1x128xf32>
    %183 = vector.shape_cast %182 : vector<1x1x128xf32> to vector<1x128xf32>
    %c8_i32 = arith.constant 8 : i32
    %184 = tpu.dynamic_rotate %169 by %c8_i32 dim 1 : vector<8x128xf32>, i32 -> vector<8x128xf32>
    %185 = vector.broadcast %183 : vector<1x128xf32> to vector<8x128xf32>
    %186 = arith.mulf %184, %185 : vector<8x128xf32>
    %c1_144 = arith.constant 1 : index
    %c0_145 = arith.constant 0 : index
    %c0_146 = arith.constant 0 : index
    %187 = vector.load %arg6[%c1_144, %c0_145, %c0_146] : memref<9x16x8xf32, #tpu.memory_space<vmem>>, vector<1x16x8xf32>
    %188 = vector.shape_cast %187 : vector<1x16x8xf32> to vector<16x8xf32>
    %cst_147 = arith.constant dense<0.000000e+00> : vector<16x128xf32>
    %189 = tpu.matmul %188, %186, %cst_147 {dimension_numbers = #tpu.dot_dimension_numbers<[1], [0], [0], [1], [0, 0, 1, 1], [], []>} : vector<16x8xf32>, vector<8x128xf32>, vector<16x128xf32> -> vector<16x128xf32>
    %190 = arith.addf %181, %189 : vector<16x128xf32>
    %c2_148 = arith.constant 2 : index
    %c0_149 = arith.constant 0 : index
    %c0_150 = arith.constant 0 : index
    %191 = vector.load %arg20[%c2_148, %c0_149, %c0_150] : memref<9x1x128xf32, #tpu.memory_space<vmem>>, vector<1x1x128xf32>
    %192 = vector.shape_cast %191 : vector<1x1x128xf32> to vector<1x128xf32>
    %c7_i32 = arith.constant 7 : i32
    %193 = tpu.dynamic_rotate %169 by %c7_i32 dim 1 : vector<8x128xf32>, i32 -> vector<8x128xf32>
    %194 = vector.broadcast %192 : vector<1x128xf32> to vector<8x128xf32>
    %195 = arith.mulf %193, %194 : vector<8x128xf32>
    %c2_151 = arith.constant 2 : index
    %c0_152 = arith.constant 0 : index
    %c0_153 = arith.constant 0 : index
    %196 = vector.load %arg6[%c2_151, %c0_152, %c0_153] : memref<9x16x8xf32, #tpu.memory_space<vmem>>, vector<1x16x8xf32>
    %197 = vector.shape_cast %196 : vector<1x16x8xf32> to vector<16x8xf32>
    %cst_154 = arith.constant dense<0.000000e+00> : vector<16x128xf32>
    %198 = tpu.matmul %197, %195, %cst_154 {dimension_numbers = #tpu.dot_dimension_numbers<[1], [0], [0], [1], [0, 0, 1, 1], [], []>} : vector<16x8xf32>, vector<8x128xf32>, vector<16x128xf32> -> vector<16x128xf32>
    %199 = arith.addf %190, %198 : vector<16x128xf32>
    %c3_155 = arith.constant 3 : index
    %c0_156 = arith.constant 0 : index
    %c0_157 = arith.constant 0 : index
    %200 = vector.load %arg20[%c3_155, %c0_156, %c0_157] : memref<9x1x128xf32, #tpu.memory_space<vmem>>, vector<1x1x128xf32>
    %201 = vector.shape_cast %200 : vector<1x1x128xf32> to vector<1x128xf32>
    %c1_i32_158 = arith.constant 1 : i32
    %202 = tpu.dynamic_rotate %169 by %c1_i32_158 dim 1 : vector<8x128xf32>, i32 -> vector<8x128xf32>
    %203 = vector.broadcast %201 : vector<1x128xf32> to vector<8x128xf32>
    %204 = arith.mulf %202, %203 : vector<8x128xf32>
    %c3_159 = arith.constant 3 : index
    %c0_160 = arith.constant 0 : index
    %c0_161 = arith.constant 0 : index
    %205 = vector.load %arg6[%c3_159, %c0_160, %c0_161] : memref<9x16x8xf32, #tpu.memory_space<vmem>>, vector<1x16x8xf32>
    %206 = vector.shape_cast %205 : vector<1x16x8xf32> to vector<16x8xf32>
    %cst_162 = arith.constant dense<0.000000e+00> : vector<16x128xf32>
    %207 = tpu.matmul %206, %204, %cst_162 {dimension_numbers = #tpu.dot_dimension_numbers<[1], [0], [0], [1], [0, 0, 1, 1], [], []>} : vector<16x8xf32>, vector<8x128xf32>, vector<16x128xf32> -> vector<16x128xf32>
    %208 = arith.addf %199, %207 : vector<16x128xf32>
    %c4_163 = arith.constant 4 : index
    %c0_164 = arith.constant 0 : index
    %c0_165 = arith.constant 0 : index
    %209 = vector.load %arg6[%c4_163, %c0_164, %c0_165] : memref<9x16x8xf32, #tpu.memory_space<vmem>>, vector<1x16x8xf32>
    %210 = vector.shape_cast %209 : vector<1x16x8xf32> to vector<16x8xf32>
    %cst_166 = arith.constant dense<0.000000e+00> : vector<16x128xf32>
    %211 = tpu.matmul %210, %169, %cst_166 {dimension_numbers = #tpu.dot_dimension_numbers<[1], [0], [0], [1], [0, 0, 1, 1], [], []>} : vector<16x8xf32>, vector<8x128xf32>, vector<16x128xf32> -> vector<16x128xf32>
    %212 = arith.addf %208, %211 : vector<16x128xf32>
    %c5_167 = arith.constant 5 : index
    %c0_168 = arith.constant 0 : index
    %c0_169 = arith.constant 0 : index
    %213 = vector.load %arg20[%c5_167, %c0_168, %c0_169] : memref<9x1x128xf32, #tpu.memory_space<vmem>>, vector<1x1x128xf32>
    %214 = vector.shape_cast %213 : vector<1x1x128xf32> to vector<1x128xf32>
    %c127_i32 = arith.constant 127 : i32
    %215 = tpu.dynamic_rotate %169 by %c127_i32 dim 1 : vector<8x128xf32>, i32 -> vector<8x128xf32>
    %216 = vector.broadcast %214 : vector<1x128xf32> to vector<8x128xf32>
    %217 = arith.mulf %215, %216 : vector<8x128xf32>
    %c5_170 = arith.constant 5 : index
    %c0_171 = arith.constant 0 : index
    %c0_172 = arith.constant 0 : index
    %218 = vector.load %arg6[%c5_170, %c0_171, %c0_172] : memref<9x16x8xf32, #tpu.memory_space<vmem>>, vector<1x16x8xf32>
    %219 = vector.shape_cast %218 : vector<1x16x8xf32> to vector<16x8xf32>
    %cst_173 = arith.constant dense<0.000000e+00> : vector<16x128xf32>
    %220 = tpu.matmul %219, %217, %cst_173 {dimension_numbers = #tpu.dot_dimension_numbers<[1], [0], [0], [1], [0, 0, 1, 1], [], []>} : vector<16x8xf32>, vector<8x128xf32>, vector<16x128xf32> -> vector<16x128xf32>
    %221 = arith.addf %212, %220 : vector<16x128xf32>
    %c6_174 = arith.constant 6 : index
    %c0_175 = arith.constant 0 : index
    %c0_176 = arith.constant 0 : index
    %222 = vector.load %arg20[%c6_174, %c0_175, %c0_176] : memref<9x1x128xf32, #tpu.memory_space<vmem>>, vector<1x1x128xf32>
    %223 = vector.shape_cast %222 : vector<1x1x128xf32> to vector<1x128xf32>
    %c121_i32 = arith.constant 121 : i32
    %224 = tpu.dynamic_rotate %169 by %c121_i32 dim 1 : vector<8x128xf32>, i32 -> vector<8x128xf32>
    %225 = vector.broadcast %223 : vector<1x128xf32> to vector<8x128xf32>
    %226 = arith.mulf %224, %225 : vector<8x128xf32>
    %c6_177 = arith.constant 6 : index
    %c0_178 = arith.constant 0 : index
    %c0_179 = arith.constant 0 : index
    %227 = vector.load %arg6[%c6_177, %c0_178, %c0_179] : memref<9x16x8xf32, #tpu.memory_space<vmem>>, vector<1x16x8xf32>
    %228 = vector.shape_cast %227 : vector<1x16x8xf32> to vector<16x8xf32>
    %cst_180 = arith.constant dense<0.000000e+00> : vector<16x128xf32>
    %229 = tpu.matmul %228, %226, %cst_180 {dimension_numbers = #tpu.dot_dimension_numbers<[1], [0], [0], [1], [0, 0, 1, 1], [], []>} : vector<16x8xf32>, vector<8x128xf32>, vector<16x128xf32> -> vector<16x128xf32>
    %230 = arith.addf %221, %229 : vector<16x128xf32>
    %c7_181 = arith.constant 7 : index
    %c0_182 = arith.constant 0 : index
    %c0_183 = arith.constant 0 : index
    %231 = vector.load %arg20[%c7_181, %c0_182, %c0_183] : memref<9x1x128xf32, #tpu.memory_space<vmem>>, vector<1x1x128xf32>
    %232 = vector.shape_cast %231 : vector<1x1x128xf32> to vector<1x128xf32>
    %c120_i32 = arith.constant 120 : i32
    %233 = tpu.dynamic_rotate %169 by %c120_i32 dim 1 : vector<8x128xf32>, i32 -> vector<8x128xf32>
    %234 = vector.broadcast %232 : vector<1x128xf32> to vector<8x128xf32>
    %235 = arith.mulf %233, %234 : vector<8x128xf32>
    %c7_184 = arith.constant 7 : index
    %c0_185 = arith.constant 0 : index
    %c0_186 = arith.constant 0 : index
    %236 = vector.load %arg6[%c7_184, %c0_185, %c0_186] : memref<9x16x8xf32, #tpu.memory_space<vmem>>, vector<1x16x8xf32>
    %237 = vector.shape_cast %236 : vector<1x16x8xf32> to vector<16x8xf32>
    %cst_187 = arith.constant dense<0.000000e+00> : vector<16x128xf32>
    %238 = tpu.matmul %237, %235, %cst_187 {dimension_numbers = #tpu.dot_dimension_numbers<[1], [0], [0], [1], [0, 0, 1, 1], [], []>} : vector<16x8xf32>, vector<8x128xf32>, vector<16x128xf32> -> vector<16x128xf32>
    %239 = arith.addf %230, %238 : vector<16x128xf32>
    %c8_188 = arith.constant 8 : index
    %c0_189 = arith.constant 0 : index
    %c0_190 = arith.constant 0 : index
    %240 = vector.load %arg20[%c8_188, %c0_189, %c0_190] : memref<9x1x128xf32, #tpu.memory_space<vmem>>, vector<1x1x128xf32>
    %241 = vector.shape_cast %240 : vector<1x1x128xf32> to vector<1x128xf32>
    %c119_i32 = arith.constant 119 : i32
    %242 = tpu.dynamic_rotate %169 by %c119_i32 dim 1 : vector<8x128xf32>, i32 -> vector<8x128xf32>
    %243 = vector.broadcast %241 : vector<1x128xf32> to vector<8x128xf32>
    %244 = arith.mulf %242, %243 : vector<8x128xf32>
    %c8_191 = arith.constant 8 : index
    %c0_192 = arith.constant 0 : index
    %c0_193 = arith.constant 0 : index
    %245 = vector.load %arg6[%c8_191, %c0_192, %c0_193] : memref<9x16x8xf32, #tpu.memory_space<vmem>>, vector<1x16x8xf32>
    %246 = vector.shape_cast %245 : vector<1x16x8xf32> to vector<16x8xf32>
    %cst_194 = arith.constant dense<0.000000e+00> : vector<16x128xf32>
    %247 = tpu.matmul %246, %244, %cst_194 {dimension_numbers = #tpu.dot_dimension_numbers<[1], [0], [0], [1], [0, 0, 1, 1], [], []>} : vector<16x8xf32>, vector<8x128xf32>, vector<16x128xf32> -> vector<16x128xf32>
    %248 = arith.addf %239, %247 : vector<16x128xf32>
    %cst_195 = arith.constant 0.000000e+00 : f32
    %249 = vector.broadcast %cst_195 : f32 to vector<16x128xf32>
    %250 = arith.maximumf %248, %249 : vector<16x128xf32>
    %c0_196 = arith.constant 0 : index
    %c0_197 = arith.constant 0 : index
    %251 = vector.load %arg9[%c0_196, %c0_197] : memref<16x1xf32, #tpu.memory_space<vmem>>, vector<16x1xf32>
    %252 = vector.shape_cast %251 : vector<16x1xf32> to vector<16x1xf32>
    %253 = vector.broadcast %252 : vector<16x1xf32> to vector<16x128xf32>
    %c0_198 = arith.constant 0 : index
    %c0_199 = arith.constant 0 : index
    %c0_200 = arith.constant 0 : index
    %254 = vector.load %arg20[%c0_198, %c0_199, %c0_200] : memref<9x1x128xf32, #tpu.memory_space<vmem>>, vector<1x1x128xf32>
    %255 = vector.shape_cast %254 : vector<1x1x128xf32> to vector<1x128xf32>
    %c9_i32_201 = arith.constant 9 : i32
    %256 = tpu.dynamic_rotate %250 by %c9_i32_201 dim 1 : vector<16x128xf32>, i32 -> vector<16x128xf32>
    %257 = vector.broadcast %255 : vector<1x128xf32> to vector<16x128xf32>
    %258 = arith.mulf %256, %257 : vector<16x128xf32>
    %c0_202 = arith.constant 0 : index
    %c0_203 = arith.constant 0 : index
    %c0_204 = arith.constant 0 : index
    %259 = vector.load %arg8[%c0_202, %c0_203, %c0_204] : memref<9x16x16xf32, #tpu.memory_space<vmem>>, vector<1x16x16xf32>
    %260 = vector.shape_cast %259 : vector<1x16x16xf32> to vector<16x16xf32>
    %cst_205 = arith.constant dense<0.000000e+00> : vector<16x128xf32>
    %261 = tpu.matmul %260, %258, %cst_205 {dimension_numbers = #tpu.dot_dimension_numbers<[1], [0], [0], [1], [0, 0, 1, 1], [], []>} : vector<16x16xf32>, vector<16x128xf32>, vector<16x128xf32> -> vector<16x128xf32>
    %262 = arith.addf %253, %261 : vector<16x128xf32>
    %c1_206 = arith.constant 1 : index
    %c0_207 = arith.constant 0 : index
    %c0_208 = arith.constant 0 : index
    %263 = vector.load %arg20[%c1_206, %c0_207, %c0_208] : memref<9x1x128xf32, #tpu.memory_space<vmem>>, vector<1x1x128xf32>
    %264 = vector.shape_cast %263 : vector<1x1x128xf32> to vector<1x128xf32>
    %c8_i32_209 = arith.constant 8 : i32
    %265 = tpu.dynamic_rotate %250 by %c8_i32_209 dim 1 : vector<16x128xf32>, i32 -> vector<16x128xf32>
    %266 = vector.broadcast %264 : vector<1x128xf32> to vector<16x128xf32>
    %267 = arith.mulf %265, %266 : vector<16x128xf32>
    %c1_210 = arith.constant 1 : index
    %c0_211 = arith.constant 0 : index
    %c0_212 = arith.constant 0 : index
    %268 = vector.load %arg8[%c1_210, %c0_211, %c0_212] : memref<9x16x16xf32, #tpu.memory_space<vmem>>, vector<1x16x16xf32>
    %269 = vector.shape_cast %268 : vector<1x16x16xf32> to vector<16x16xf32>
    %cst_213 = arith.constant dense<0.000000e+00> : vector<16x128xf32>
    %270 = tpu.matmul %269, %267, %cst_213 {dimension_numbers = #tpu.dot_dimension_numbers<[1], [0], [0], [1], [0, 0, 1, 1], [], []>} : vector<16x16xf32>, vector<16x128xf32>, vector<16x128xf32> -> vector<16x128xf32>
    %271 = arith.addf %262, %270 : vector<16x128xf32>
    %c2_214 = arith.constant 2 : index
    %c0_215 = arith.constant 0 : index
    %c0_216 = arith.constant 0 : index
    %272 = vector.load %arg20[%c2_214, %c0_215, %c0_216] : memref<9x1x128xf32, #tpu.memory_space<vmem>>, vector<1x1x128xf32>
    %273 = vector.shape_cast %272 : vector<1x1x128xf32> to vector<1x128xf32>
    %c7_i32_217 = arith.constant 7 : i32
    %274 = tpu.dynamic_rotate %250 by %c7_i32_217 dim 1 : vector<16x128xf32>, i32 -> vector<16x128xf32>
    %275 = vector.broadcast %273 : vector<1x128xf32> to vector<16x128xf32>
    %276 = arith.mulf %274, %275 : vector<16x128xf32>
    %c2_218 = arith.constant 2 : index
    %c0_219 = arith.constant 0 : index
    %c0_220 = arith.constant 0 : index
    %277 = vector.load %arg8[%c2_218, %c0_219, %c0_220] : memref<9x16x16xf32, #tpu.memory_space<vmem>>, vector<1x16x16xf32>
    %278 = vector.shape_cast %277 : vector<1x16x16xf32> to vector<16x16xf32>
    %cst_221 = arith.constant dense<0.000000e+00> : vector<16x128xf32>
    %279 = tpu.matmul %278, %276, %cst_221 {dimension_numbers = #tpu.dot_dimension_numbers<[1], [0], [0], [1], [0, 0, 1, 1], [], []>} : vector<16x16xf32>, vector<16x128xf32>, vector<16x128xf32> -> vector<16x128xf32>
    %280 = arith.addf %271, %279 : vector<16x128xf32>
    %c3_222 = arith.constant 3 : index
    %c0_223 = arith.constant 0 : index
    %c0_224 = arith.constant 0 : index
    %281 = vector.load %arg20[%c3_222, %c0_223, %c0_224] : memref<9x1x128xf32, #tpu.memory_space<vmem>>, vector<1x1x128xf32>
    %282 = vector.shape_cast %281 : vector<1x1x128xf32> to vector<1x128xf32>
    %c1_i32_225 = arith.constant 1 : i32
    %283 = tpu.dynamic_rotate %250 by %c1_i32_225 dim 1 : vector<16x128xf32>, i32 -> vector<16x128xf32>
    %284 = vector.broadcast %282 : vector<1x128xf32> to vector<16x128xf32>
    %285 = arith.mulf %283, %284 : vector<16x128xf32>
    %c3_226 = arith.constant 3 : index
    %c0_227 = arith.constant 0 : index
    %c0_228 = arith.constant 0 : index
    %286 = vector.load %arg8[%c3_226, %c0_227, %c0_228] : memref<9x16x16xf32, #tpu.memory_space<vmem>>, vector<1x16x16xf32>
    %287 = vector.shape_cast %286 : vector<1x16x16xf32> to vector<16x16xf32>
    %cst_229 = arith.constant dense<0.000000e+00> : vector<16x128xf32>
    %288 = tpu.matmul %287, %285, %cst_229 {dimension_numbers = #tpu.dot_dimension_numbers<[1], [0], [0], [1], [0, 0, 1, 1], [], []>} : vector<16x16xf32>, vector<16x128xf32>, vector<16x128xf32> -> vector<16x128xf32>
    %289 = arith.addf %280, %288 : vector<16x128xf32>
    %c4_230 = arith.constant 4 : index
    %c0_231 = arith.constant 0 : index
    %c0_232 = arith.constant 0 : index
    %290 = vector.load %arg8[%c4_230, %c0_231, %c0_232] : memref<9x16x16xf32, #tpu.memory_space<vmem>>, vector<1x16x16xf32>
    %291 = vector.shape_cast %290 : vector<1x16x16xf32> to vector<16x16xf32>
    %cst_233 = arith.constant dense<0.000000e+00> : vector<16x128xf32>
    %292 = tpu.matmul %291, %250, %cst_233 {dimension_numbers = #tpu.dot_dimension_numbers<[1], [0], [0], [1], [0, 0, 1, 1], [], []>} : vector<16x16xf32>, vector<16x128xf32>, vector<16x128xf32> -> vector<16x128xf32>
    %293 = arith.addf %289, %292 : vector<16x128xf32>
    %c5_234 = arith.constant 5 : index
    %c0_235 = arith.constant 0 : index
    %c0_236 = arith.constant 0 : index
    %294 = vector.load %arg20[%c5_234, %c0_235, %c0_236] : memref<9x1x128xf32, #tpu.memory_space<vmem>>, vector<1x1x128xf32>
    %295 = vector.shape_cast %294 : vector<1x1x128xf32> to vector<1x128xf32>
    %c127_i32_237 = arith.constant 127 : i32
    %296 = tpu.dynamic_rotate %250 by %c127_i32_237 dim 1 : vector<16x128xf32>, i32 -> vector<16x128xf32>
    %297 = vector.broadcast %295 : vector<1x128xf32> to vector<16x128xf32>
    %298 = arith.mulf %296, %297 : vector<16x128xf32>
    %c5_238 = arith.constant 5 : index
    %c0_239 = arith.constant 0 : index
    %c0_240 = arith.constant 0 : index
    %299 = vector.load %arg8[%c5_238, %c0_239, %c0_240] : memref<9x16x16xf32, #tpu.memory_space<vmem>>, vector<1x16x16xf32>
    %300 = vector.shape_cast %299 : vector<1x16x16xf32> to vector<16x16xf32>
    %cst_241 = arith.constant dense<0.000000e+00> : vector<16x128xf32>
    %301 = tpu.matmul %300, %298, %cst_241 {dimension_numbers = #tpu.dot_dimension_numbers<[1], [0], [0], [1], [0, 0, 1, 1], [], []>} : vector<16x16xf32>, vector<16x128xf32>, vector<16x128xf32> -> vector<16x128xf32>
    %302 = arith.addf %293, %301 : vector<16x128xf32>
    %c6_242 = arith.constant 6 : index
    %c0_243 = arith.constant 0 : index
    %c0_244 = arith.constant 0 : index
    %303 = vector.load %arg20[%c6_242, %c0_243, %c0_244] : memref<9x1x128xf32, #tpu.memory_space<vmem>>, vector<1x1x128xf32>
    %304 = vector.shape_cast %303 : vector<1x1x128xf32> to vector<1x128xf32>
    %c121_i32_245 = arith.constant 121 : i32
    %305 = tpu.dynamic_rotate %250 by %c121_i32_245 dim 1 : vector<16x128xf32>, i32 -> vector<16x128xf32>
    %306 = vector.broadcast %304 : vector<1x128xf32> to vector<16x128xf32>
    %307 = arith.mulf %305, %306 : vector<16x128xf32>
    %c6_246 = arith.constant 6 : index
    %c0_247 = arith.constant 0 : index
    %c0_248 = arith.constant 0 : index
    %308 = vector.load %arg8[%c6_246, %c0_247, %c0_248] : memref<9x16x16xf32, #tpu.memory_space<vmem>>, vector<1x16x16xf32>
    %309 = vector.shape_cast %308 : vector<1x16x16xf32> to vector<16x16xf32>
    %cst_249 = arith.constant dense<0.000000e+00> : vector<16x128xf32>
    %310 = tpu.matmul %309, %307, %cst_249 {dimension_numbers = #tpu.dot_dimension_numbers<[1], [0], [0], [1], [0, 0, 1, 1], [], []>} : vector<16x16xf32>, vector<16x128xf32>, vector<16x128xf32> -> vector<16x128xf32>
    %311 = arith.addf %302, %310 : vector<16x128xf32>
    %c7_250 = arith.constant 7 : index
    %c0_251 = arith.constant 0 : index
    %c0_252 = arith.constant 0 : index
    %312 = vector.load %arg20[%c7_250, %c0_251, %c0_252] : memref<9x1x128xf32, #tpu.memory_space<vmem>>, vector<1x1x128xf32>
    %313 = vector.shape_cast %312 : vector<1x1x128xf32> to vector<1x128xf32>
    %c120_i32_253 = arith.constant 120 : i32
    %314 = tpu.dynamic_rotate %250 by %c120_i32_253 dim 1 : vector<16x128xf32>, i32 -> vector<16x128xf32>
    %315 = vector.broadcast %313 : vector<1x128xf32> to vector<16x128xf32>
    %316 = arith.mulf %314, %315 : vector<16x128xf32>
    %c7_254 = arith.constant 7 : index
    %c0_255 = arith.constant 0 : index
    %c0_256 = arith.constant 0 : index
    %317 = vector.load %arg8[%c7_254, %c0_255, %c0_256] : memref<9x16x16xf32, #tpu.memory_space<vmem>>, vector<1x16x16xf32>
    %318 = vector.shape_cast %317 : vector<1x16x16xf32> to vector<16x16xf32>
    %cst_257 = arith.constant dense<0.000000e+00> : vector<16x128xf32>
    %319 = tpu.matmul %318, %316, %cst_257 {dimension_numbers = #tpu.dot_dimension_numbers<[1], [0], [0], [1], [0, 0, 1, 1], [], []>} : vector<16x16xf32>, vector<16x128xf32>, vector<16x128xf32> -> vector<16x128xf32>
    %320 = arith.addf %311, %319 : vector<16x128xf32>
    %c8_258 = arith.constant 8 : index
    %c0_259 = arith.constant 0 : index
    %c0_260 = arith.constant 0 : index
    %321 = vector.load %arg20[%c8_258, %c0_259, %c0_260] : memref<9x1x128xf32, #tpu.memory_space<vmem>>, vector<1x1x128xf32>
    %322 = vector.shape_cast %321 : vector<1x1x128xf32> to vector<1x128xf32>
    %c119_i32_261 = arith.constant 119 : i32
    %323 = tpu.dynamic_rotate %250 by %c119_i32_261 dim 1 : vector<16x128xf32>, i32 -> vector<16x128xf32>
    %324 = vector.broadcast %322 : vector<1x128xf32> to vector<16x128xf32>
    %325 = arith.mulf %323, %324 : vector<16x128xf32>
    %c8_262 = arith.constant 8 : index
    %c0_263 = arith.constant 0 : index
    %c0_264 = arith.constant 0 : index
    %326 = vector.load %arg8[%c8_262, %c0_263, %c0_264] : memref<9x16x16xf32, #tpu.memory_space<vmem>>, vector<1x16x16xf32>
    %327 = vector.shape_cast %326 : vector<1x16x16xf32> to vector<16x16xf32>
    %cst_265 = arith.constant dense<0.000000e+00> : vector<16x128xf32>
    %328 = tpu.matmul %327, %325, %cst_265 {dimension_numbers = #tpu.dot_dimension_numbers<[1], [0], [0], [1], [0, 0, 1, 1], [], []>} : vector<16x16xf32>, vector<16x128xf32>, vector<16x128xf32> -> vector<16x128xf32>
    %329 = arith.addf %320, %328 : vector<16x128xf32>
    %cst_266 = arith.constant 0.000000e+00 : f32
    %330 = vector.broadcast %cst_266 : f32 to vector<16x128xf32>
    %331 = arith.maximumf %329, %330 : vector<16x128xf32>
    %c0_267 = arith.constant 0 : index
    %c0_268 = arith.constant 0 : index
    %332 = vector.load %arg22[%c0_267, %c0_268] : memref<128x256xf32, #tpu.memory_space<vmem>>, vector<128x256xf32>
    %cst_269 = arith.constant dense<0.000000e+00> : vector<16x256xf32>
    %333 = tpu.matmul %331, %332, %cst_269 {dimension_numbers = #tpu.dot_dimension_numbers<[1], [0], [0], [1], [0, 0, 1, 1], [], []>} : vector<16x128xf32>, vector<128x256xf32>, vector<16x256xf32> -> vector<16x256xf32>
    %c0_270 = arith.constant 0 : index
    %c0_271 = arith.constant 0 : index
    %334 = vector.load %arg11[%c0_270, %c0_271] : memref<8x1xf32, #tpu.memory_space<vmem>>, vector<8x1xf32>
    %335 = vector.shape_cast %334 : vector<8x1xf32> to vector<8x1xf32>
    %336 = vector.broadcast %335 : vector<8x1xf32> to vector<8x256xf32>
    %c0_272 = arith.constant 0 : index
    %c0_273 = arith.constant 0 : index
    %c0_274 = arith.constant 0 : index
    %337 = vector.load %arg19[%c0_272, %c0_273, %c0_274] : memref<9x1x256xf32, #tpu.memory_space<vmem>>, vector<1x1x256xf32>
    %338 = vector.shape_cast %337 : vector<1x1x256xf32> to vector<1x256xf32>
    %c17_i32_275 = arith.constant 17 : i32
    %339 = tpu.dynamic_rotate %333 by %c17_i32_275 dim 1 : vector<16x256xf32>, i32 -> vector<16x256xf32>
    %340 = vector.broadcast %338 : vector<1x256xf32> to vector<16x256xf32>
    %341 = arith.mulf %339, %340 : vector<16x256xf32>
    %c0_276 = arith.constant 0 : index
    %c0_277 = arith.constant 0 : index
    %c0_278 = arith.constant 0 : index
    %342 = vector.load %arg10[%c0_276, %c0_277, %c0_278] : memref<9x8x16xf32, #tpu.memory_space<vmem>>, vector<1x8x16xf32>
    %343 = vector.shape_cast %342 : vector<1x8x16xf32> to vector<8x16xf32>
    %cst_279 = arith.constant dense<0.000000e+00> : vector<8x256xf32>
    %344 = tpu.matmul %343, %341, %cst_279 {dimension_numbers = #tpu.dot_dimension_numbers<[1], [0], [0], [1], [0, 0, 1, 1], [], []>} : vector<8x16xf32>, vector<16x256xf32>, vector<8x256xf32> -> vector<8x256xf32>
    %345 = arith.addf %336, %344 : vector<8x256xf32>
    %c1_280 = arith.constant 1 : index
    %c0_281 = arith.constant 0 : index
    %c0_282 = arith.constant 0 : index
    %346 = vector.load %arg19[%c1_280, %c0_281, %c0_282] : memref<9x1x256xf32, #tpu.memory_space<vmem>>, vector<1x1x256xf32>
    %347 = vector.shape_cast %346 : vector<1x1x256xf32> to vector<1x256xf32>
    %c16_i32_283 = arith.constant 16 : i32
    %348 = tpu.dynamic_rotate %333 by %c16_i32_283 dim 1 : vector<16x256xf32>, i32 -> vector<16x256xf32>
    %349 = vector.broadcast %347 : vector<1x256xf32> to vector<16x256xf32>
    %350 = arith.mulf %348, %349 : vector<16x256xf32>
    %c1_284 = arith.constant 1 : index
    %c0_285 = arith.constant 0 : index
    %c0_286 = arith.constant 0 : index
    %351 = vector.load %arg10[%c1_284, %c0_285, %c0_286] : memref<9x8x16xf32, #tpu.memory_space<vmem>>, vector<1x8x16xf32>
    %352 = vector.shape_cast %351 : vector<1x8x16xf32> to vector<8x16xf32>
    %cst_287 = arith.constant dense<0.000000e+00> : vector<8x256xf32>
    %353 = tpu.matmul %352, %350, %cst_287 {dimension_numbers = #tpu.dot_dimension_numbers<[1], [0], [0], [1], [0, 0, 1, 1], [], []>} : vector<8x16xf32>, vector<16x256xf32>, vector<8x256xf32> -> vector<8x256xf32>
    %354 = arith.addf %345, %353 : vector<8x256xf32>
    %c2_288 = arith.constant 2 : index
    %c0_289 = arith.constant 0 : index
    %c0_290 = arith.constant 0 : index
    %355 = vector.load %arg19[%c2_288, %c0_289, %c0_290] : memref<9x1x256xf32, #tpu.memory_space<vmem>>, vector<1x1x256xf32>
    %356 = vector.shape_cast %355 : vector<1x1x256xf32> to vector<1x256xf32>
    %c15_i32_291 = arith.constant 15 : i32
    %357 = tpu.dynamic_rotate %333 by %c15_i32_291 dim 1 : vector<16x256xf32>, i32 -> vector<16x256xf32>
    %358 = vector.broadcast %356 : vector<1x256xf32> to vector<16x256xf32>
    %359 = arith.mulf %357, %358 : vector<16x256xf32>
    %c2_292 = arith.constant 2 : index
    %c0_293 = arith.constant 0 : index
    %c0_294 = arith.constant 0 : index
    %360 = vector.load %arg10[%c2_292, %c0_293, %c0_294] : memref<9x8x16xf32, #tpu.memory_space<vmem>>, vector<1x8x16xf32>
    %361 = vector.shape_cast %360 : vector<1x8x16xf32> to vector<8x16xf32>
    %cst_295 = arith.constant dense<0.000000e+00> : vector<8x256xf32>
    %362 = tpu.matmul %361, %359, %cst_295 {dimension_numbers = #tpu.dot_dimension_numbers<[1], [0], [0], [1], [0, 0, 1, 1], [], []>} : vector<8x16xf32>, vector<16x256xf32>, vector<8x256xf32> -> vector<8x256xf32>
    %363 = arith.addf %354, %362 : vector<8x256xf32>
    %c3_296 = arith.constant 3 : index
    %c0_297 = arith.constant 0 : index
    %c0_298 = arith.constant 0 : index
    %364 = vector.load %arg19[%c3_296, %c0_297, %c0_298] : memref<9x1x256xf32, #tpu.memory_space<vmem>>, vector<1x1x256xf32>
    %365 = vector.shape_cast %364 : vector<1x1x256xf32> to vector<1x256xf32>
    %c1_i32_299 = arith.constant 1 : i32
    %366 = tpu.dynamic_rotate %333 by %c1_i32_299 dim 1 : vector<16x256xf32>, i32 -> vector<16x256xf32>
    %367 = vector.broadcast %365 : vector<1x256xf32> to vector<16x256xf32>
    %368 = arith.mulf %366, %367 : vector<16x256xf32>
    %c3_300 = arith.constant 3 : index
    %c0_301 = arith.constant 0 : index
    %c0_302 = arith.constant 0 : index
    %369 = vector.load %arg10[%c3_300, %c0_301, %c0_302] : memref<9x8x16xf32, #tpu.memory_space<vmem>>, vector<1x8x16xf32>
    %370 = vector.shape_cast %369 : vector<1x8x16xf32> to vector<8x16xf32>
    %cst_303 = arith.constant dense<0.000000e+00> : vector<8x256xf32>
    %371 = tpu.matmul %370, %368, %cst_303 {dimension_numbers = #tpu.dot_dimension_numbers<[1], [0], [0], [1], [0, 0, 1, 1], [], []>} : vector<8x16xf32>, vector<16x256xf32>, vector<8x256xf32> -> vector<8x256xf32>
    %372 = arith.addf %363, %371 : vector<8x256xf32>
    %c4_304 = arith.constant 4 : index
    %c0_305 = arith.constant 0 : index
    %c0_306 = arith.constant 0 : index
    %373 = vector.load %arg10[%c4_304, %c0_305, %c0_306] : memref<9x8x16xf32, #tpu.memory_space<vmem>>, vector<1x8x16xf32>
    %374 = vector.shape_cast %373 : vector<1x8x16xf32> to vector<8x16xf32>
    %cst_307 = arith.constant dense<0.000000e+00> : vector<8x256xf32>
    %375 = tpu.matmul %374, %333, %cst_307 {dimension_numbers = #tpu.dot_dimension_numbers<[1], [0], [0], [1], [0, 0, 1, 1], [], []>} : vector<8x16xf32>, vector<16x256xf32>, vector<8x256xf32> -> vector<8x256xf32>
    %376 = arith.addf %372, %375 : vector<8x256xf32>
    %c5_308 = arith.constant 5 : index
    %c0_309 = arith.constant 0 : index
    %c0_310 = arith.constant 0 : index
    %377 = vector.load %arg19[%c5_308, %c0_309, %c0_310] : memref<9x1x256xf32, #tpu.memory_space<vmem>>, vector<1x1x256xf32>
    %378 = vector.shape_cast %377 : vector<1x1x256xf32> to vector<1x256xf32>
    %c255_i32_311 = arith.constant 255 : i32
    %379 = tpu.dynamic_rotate %333 by %c255_i32_311 dim 1 : vector<16x256xf32>, i32 -> vector<16x256xf32>
    %380 = vector.broadcast %378 : vector<1x256xf32> to vector<16x256xf32>
    %381 = arith.mulf %379, %380 : vector<16x256xf32>
    %c5_312 = arith.constant 5 : index
    %c0_313 = arith.constant 0 : index
    %c0_314 = arith.constant 0 : index
    %382 = vector.load %arg10[%c5_312, %c0_313, %c0_314] : memref<9x8x16xf32, #tpu.memory_space<vmem>>, vector<1x8x16xf32>
    %383 = vector.shape_cast %382 : vector<1x8x16xf32> to vector<8x16xf32>
    %cst_315 = arith.constant dense<0.000000e+00> : vector<8x256xf32>
    %384 = tpu.matmul %383, %381, %cst_315 {dimension_numbers = #tpu.dot_dimension_numbers<[1], [0], [0], [1], [0, 0, 1, 1], [], []>} : vector<8x16xf32>, vector<16x256xf32>, vector<8x256xf32> -> vector<8x256xf32>
    %385 = arith.addf %376, %384 : vector<8x256xf32>
    %c6_316 = arith.constant 6 : index
    %c0_317 = arith.constant 0 : index
    %c0_318 = arith.constant 0 : index
    %386 = vector.load %arg19[%c6_316, %c0_317, %c0_318] : memref<9x1x256xf32, #tpu.memory_space<vmem>>, vector<1x1x256xf32>
    %387 = vector.shape_cast %386 : vector<1x1x256xf32> to vector<1x256xf32>
    %c241_i32_319 = arith.constant 241 : i32
    %388 = tpu.dynamic_rotate %333 by %c241_i32_319 dim 1 : vector<16x256xf32>, i32 -> vector<16x256xf32>
    %389 = vector.broadcast %387 : vector<1x256xf32> to vector<16x256xf32>
    %390 = arith.mulf %388, %389 : vector<16x256xf32>
    %c6_320 = arith.constant 6 : index
    %c0_321 = arith.constant 0 : index
    %c0_322 = arith.constant 0 : index
    %391 = vector.load %arg10[%c6_320, %c0_321, %c0_322] : memref<9x8x16xf32, #tpu.memory_space<vmem>>, vector<1x8x16xf32>
    %392 = vector.shape_cast %391 : vector<1x8x16xf32> to vector<8x16xf32>
    %cst_323 = arith.constant dense<0.000000e+00> : vector<8x256xf32>
    %393 = tpu.matmul %392, %390, %cst_323 {dimension_numbers = #tpu.dot_dimension_numbers<[1], [0], [0], [1], [0, 0, 1, 1], [], []>} : vector<8x16xf32>, vector<16x256xf32>, vector<8x256xf32> -> vector<8x256xf32>
    %394 = arith.addf %385, %393 : vector<8x256xf32>
    %c7_324 = arith.constant 7 : index
    %c0_325 = arith.constant 0 : index
    %c0_326 = arith.constant 0 : index
    %395 = vector.load %arg19[%c7_324, %c0_325, %c0_326] : memref<9x1x256xf32, #tpu.memory_space<vmem>>, vector<1x1x256xf32>
    %396 = vector.shape_cast %395 : vector<1x1x256xf32> to vector<1x256xf32>
    %c240_i32_327 = arith.constant 240 : i32
    %397 = tpu.dynamic_rotate %333 by %c240_i32_327 dim 1 : vector<16x256xf32>, i32 -> vector<16x256xf32>
    %398 = vector.broadcast %396 : vector<1x256xf32> to vector<16x256xf32>
    %399 = arith.mulf %397, %398 : vector<16x256xf32>
    %c7_328 = arith.constant 7 : index
    %c0_329 = arith.constant 0 : index
    %c0_330 = arith.constant 0 : index
    %400 = vector.load %arg10[%c7_328, %c0_329, %c0_330] : memref<9x8x16xf32, #tpu.memory_space<vmem>>, vector<1x8x16xf32>
    %401 = vector.shape_cast %400 : vector<1x8x16xf32> to vector<8x16xf32>
    %cst_331 = arith.constant dense<0.000000e+00> : vector<8x256xf32>
    %402 = tpu.matmul %401, %399, %cst_331 {dimension_numbers = #tpu.dot_dimension_numbers<[1], [0], [0], [1], [0, 0, 1, 1], [], []>} : vector<8x16xf32>, vector<16x256xf32>, vector<8x256xf32> -> vector<8x256xf32>
    %403 = arith.addf %394, %402 : vector<8x256xf32>
    %c8_332 = arith.constant 8 : index
    %c0_333 = arith.constant 0 : index
    %c0_334 = arith.constant 0 : index
    %404 = vector.load %arg19[%c8_332, %c0_333, %c0_334] : memref<9x1x256xf32, #tpu.memory_space<vmem>>, vector<1x1x256xf32>
    %405 = vector.shape_cast %404 : vector<1x1x256xf32> to vector<1x256xf32>
    %c239_i32_335 = arith.constant 239 : i32
    %406 = tpu.dynamic_rotate %333 by %c239_i32_335 dim 1 : vector<16x256xf32>, i32 -> vector<16x256xf32>
    %407 = vector.broadcast %405 : vector<1x256xf32> to vector<16x256xf32>
    %408 = arith.mulf %406, %407 : vector<16x256xf32>
    %c8_336 = arith.constant 8 : index
    %c0_337 = arith.constant 0 : index
    %c0_338 = arith.constant 0 : index
    %409 = vector.load %arg10[%c8_336, %c0_337, %c0_338] : memref<9x8x16xf32, #tpu.memory_space<vmem>>, vector<1x8x16xf32>
    %410 = vector.shape_cast %409 : vector<1x8x16xf32> to vector<8x16xf32>
    %cst_339 = arith.constant dense<0.000000e+00> : vector<8x256xf32>
    %411 = tpu.matmul %410, %408, %cst_339 {dimension_numbers = #tpu.dot_dimension_numbers<[1], [0], [0], [1], [0, 0, 1, 1], [], []>} : vector<8x16xf32>, vector<16x256xf32>, vector<8x256xf32> -> vector<8x256xf32>
    %412 = arith.addf %403, %411 : vector<8x256xf32>
    %cst_340 = arith.constant 0.000000e+00 : f32
    %413 = vector.broadcast %cst_340 : f32 to vector<8x256xf32>
    %414 = arith.maximumf %412, %413 : vector<8x256xf32>
    %c0_341 = arith.constant 0 : index
    %c0_342 = arith.constant 0 : index
    %415 = vector.load %arg14[%c0_341, %c0_342] : memref<8x1xf32, #tpu.memory_space<vmem>>, vector<8x1xf32>
    %416 = vector.shape_cast %415 : vector<8x1xf32> to vector<8x1xf32>
    %417 = vector.broadcast %416 : vector<8x1xf32> to vector<8x256xf32>
    %c0_343 = arith.constant 0 : index
    %c0_344 = arith.constant 0 : index
    %c0_345 = arith.constant 0 : index
    %418 = vector.load %arg19[%c0_343, %c0_344, %c0_345] : memref<9x1x256xf32, #tpu.memory_space<vmem>>, vector<1x1x256xf32>
    %419 = vector.shape_cast %418 : vector<1x1x256xf32> to vector<1x256xf32>
    %c17_i32_346 = arith.constant 17 : i32
    %420 = tpu.dynamic_rotate %414 by %c17_i32_346 dim 1 : vector<8x256xf32>, i32 -> vector<8x256xf32>
    %421 = vector.broadcast %419 : vector<1x256xf32> to vector<8x256xf32>
    %422 = arith.mulf %420, %421 : vector<8x256xf32>
    %c0_347 = arith.constant 0 : index
    %c0_348 = arith.constant 0 : index
    %c0_349 = arith.constant 0 : index
    %423 = vector.load %arg12[%c0_347, %c0_348, %c0_349] : memref<9x8x8xf32, #tpu.memory_space<vmem>>, vector<1x8x8xf32>
    %424 = vector.shape_cast %423 : vector<1x8x8xf32> to vector<8x8xf32>
    %cst_350 = arith.constant dense<0.000000e+00> : vector<8x256xf32>
    %425 = tpu.matmul %424, %422, %cst_350 {dimension_numbers = #tpu.dot_dimension_numbers<[1], [0], [0], [1], [0, 0, 1, 1], [], []>} : vector<8x8xf32>, vector<8x256xf32>, vector<8x256xf32> -> vector<8x256xf32>
    %426 = arith.addf %417, %425 : vector<8x256xf32>
    %c17_i32_351 = arith.constant 17 : i32
    %427 = tpu.dynamic_rotate %163 by %c17_i32_351 dim 1 : vector<8x256xf32>, i32 -> vector<8x256xf32>
    %428 = vector.broadcast %419 : vector<1x256xf32> to vector<8x256xf32>
    %429 = arith.mulf %427, %428 : vector<8x256xf32>
    %c0_352 = arith.constant 0 : index
    %c0_353 = arith.constant 0 : index
    %c0_354 = arith.constant 0 : index
    %430 = vector.load %arg13[%c0_352, %c0_353, %c0_354] : memref<9x8x8xf32, #tpu.memory_space<vmem>>, vector<1x8x8xf32>
    %431 = vector.shape_cast %430 : vector<1x8x8xf32> to vector<8x8xf32>
    %cst_355 = arith.constant dense<0.000000e+00> : vector<8x256xf32>
    %432 = tpu.matmul %431, %429, %cst_355 {dimension_numbers = #tpu.dot_dimension_numbers<[1], [0], [0], [1], [0, 0, 1, 1], [], []>} : vector<8x8xf32>, vector<8x256xf32>, vector<8x256xf32> -> vector<8x256xf32>
    %433 = arith.addf %426, %432 : vector<8x256xf32>
    %c1_356 = arith.constant 1 : index
    %c0_357 = arith.constant 0 : index
    %c0_358 = arith.constant 0 : index
    %434 = vector.load %arg19[%c1_356, %c0_357, %c0_358] : memref<9x1x256xf32, #tpu.memory_space<vmem>>, vector<1x1x256xf32>
    %435 = vector.shape_cast %434 : vector<1x1x256xf32> to vector<1x256xf32>
    %c16_i32_359 = arith.constant 16 : i32
    %436 = tpu.dynamic_rotate %414 by %c16_i32_359 dim 1 : vector<8x256xf32>, i32 -> vector<8x256xf32>
    %437 = vector.broadcast %435 : vector<1x256xf32> to vector<8x256xf32>
    %438 = arith.mulf %436, %437 : vector<8x256xf32>
    %c1_360 = arith.constant 1 : index
    %c0_361 = arith.constant 0 : index
    %c0_362 = arith.constant 0 : index
    %439 = vector.load %arg12[%c1_360, %c0_361, %c0_362] : memref<9x8x8xf32, #tpu.memory_space<vmem>>, vector<1x8x8xf32>
    %440 = vector.shape_cast %439 : vector<1x8x8xf32> to vector<8x8xf32>
    %cst_363 = arith.constant dense<0.000000e+00> : vector<8x256xf32>
    %441 = tpu.matmul %440, %438, %cst_363 {dimension_numbers = #tpu.dot_dimension_numbers<[1], [0], [0], [1], [0, 0, 1, 1], [], []>} : vector<8x8xf32>, vector<8x256xf32>, vector<8x256xf32> -> vector<8x256xf32>
    %442 = arith.addf %433, %441 : vector<8x256xf32>
    %c16_i32_364 = arith.constant 16 : i32
    %443 = tpu.dynamic_rotate %163 by %c16_i32_364 dim 1 : vector<8x256xf32>, i32 -> vector<8x256xf32>
    %444 = vector.broadcast %435 : vector<1x256xf32> to vector<8x256xf32>
    %445 = arith.mulf %443, %444 : vector<8x256xf32>
    %c1_365 = arith.constant 1 : index
    %c0_366 = arith.constant 0 : index
    %c0_367 = arith.constant 0 : index
    %446 = vector.load %arg13[%c1_365, %c0_366, %c0_367] : memref<9x8x8xf32, #tpu.memory_space<vmem>>, vector<1x8x8xf32>
    %447 = vector.shape_cast %446 : vector<1x8x8xf32> to vector<8x8xf32>
    %cst_368 = arith.constant dense<0.000000e+00> : vector<8x256xf32>
    %448 = tpu.matmul %447, %445, %cst_368 {dimension_numbers = #tpu.dot_dimension_numbers<[1], [0], [0], [1], [0, 0, 1, 1], [], []>} : vector<8x8xf32>, vector<8x256xf32>, vector<8x256xf32> -> vector<8x256xf32>
    %449 = arith.addf %442, %448 : vector<8x256xf32>
    %c2_369 = arith.constant 2 : index
    %c0_370 = arith.constant 0 : index
    %c0_371 = arith.constant 0 : index
    %450 = vector.load %arg19[%c2_369, %c0_370, %c0_371] : memref<9x1x256xf32, #tpu.memory_space<vmem>>, vector<1x1x256xf32>
    %451 = vector.shape_cast %450 : vector<1x1x256xf32> to vector<1x256xf32>
    %c15_i32_372 = arith.constant 15 : i32
    %452 = tpu.dynamic_rotate %414 by %c15_i32_372 dim 1 : vector<8x256xf32>, i32 -> vector<8x256xf32>
    %453 = vector.broadcast %451 : vector<1x256xf32> to vector<8x256xf32>
    %454 = arith.mulf %452, %453 : vector<8x256xf32>
    %c2_373 = arith.constant 2 : index
    %c0_374 = arith.constant 0 : index
    %c0_375 = arith.constant 0 : index
    %455 = vector.load %arg12[%c2_373, %c0_374, %c0_375] : memref<9x8x8xf32, #tpu.memory_space<vmem>>, vector<1x8x8xf32>
    %456 = vector.shape_cast %455 : vector<1x8x8xf32> to vector<8x8xf32>
    %cst_376 = arith.constant dense<0.000000e+00> : vector<8x256xf32>
    %457 = tpu.matmul %456, %454, %cst_376 {dimension_numbers = #tpu.dot_dimension_numbers<[1], [0], [0], [1], [0, 0, 1, 1], [], []>} : vector<8x8xf32>, vector<8x256xf32>, vector<8x256xf32> -> vector<8x256xf32>
    %458 = arith.addf %449, %457 : vector<8x256xf32>
    %c15_i32_377 = arith.constant 15 : i32
    %459 = tpu.dynamic_rotate %163 by %c15_i32_377 dim 1 : vector<8x256xf32>, i32 -> vector<8x256xf32>
    %460 = vector.broadcast %451 : vector<1x256xf32> to vector<8x256xf32>
    %461 = arith.mulf %459, %460 : vector<8x256xf32>
    %c2_378 = arith.constant 2 : index
    %c0_379 = arith.constant 0 : index
    %c0_380 = arith.constant 0 : index
    %462 = vector.load %arg13[%c2_378, %c0_379, %c0_380] : memref<9x8x8xf32, #tpu.memory_space<vmem>>, vector<1x8x8xf32>
    %463 = vector.shape_cast %462 : vector<1x8x8xf32> to vector<8x8xf32>
    %cst_381 = arith.constant dense<0.000000e+00> : vector<8x256xf32>
    %464 = tpu.matmul %463, %461, %cst_381 {dimension_numbers = #tpu.dot_dimension_numbers<[1], [0], [0], [1], [0, 0, 1, 1], [], []>} : vector<8x8xf32>, vector<8x256xf32>, vector<8x256xf32> -> vector<8x256xf32>
    %465 = arith.addf %458, %464 : vector<8x256xf32>
    %c3_382 = arith.constant 3 : index
    %c0_383 = arith.constant 0 : index
    %c0_384 = arith.constant 0 : index
    %466 = vector.load %arg19[%c3_382, %c0_383, %c0_384] : memref<9x1x256xf32, #tpu.memory_space<vmem>>, vector<1x1x256xf32>
    %467 = vector.shape_cast %466 : vector<1x1x256xf32> to vector<1x256xf32>
    %c1_i32_385 = arith.constant 1 : i32
    %468 = tpu.dynamic_rotate %414 by %c1_i32_385 dim 1 : vector<8x256xf32>, i32 -> vector<8x256xf32>
    %469 = vector.broadcast %467 : vector<1x256xf32> to vector<8x256xf32>
    %470 = arith.mulf %468, %469 : vector<8x256xf32>
    %c3_386 = arith.constant 3 : index
    %c0_387 = arith.constant 0 : index
    %c0_388 = arith.constant 0 : index
    %471 = vector.load %arg12[%c3_386, %c0_387, %c0_388] : memref<9x8x8xf32, #tpu.memory_space<vmem>>, vector<1x8x8xf32>
    %472 = vector.shape_cast %471 : vector<1x8x8xf32> to vector<8x8xf32>
    %cst_389 = arith.constant dense<0.000000e+00> : vector<8x256xf32>
    %473 = tpu.matmul %472, %470, %cst_389 {dimension_numbers = #tpu.dot_dimension_numbers<[1], [0], [0], [1], [0, 0, 1, 1], [], []>} : vector<8x8xf32>, vector<8x256xf32>, vector<8x256xf32> -> vector<8x256xf32>
    %474 = arith.addf %465, %473 : vector<8x256xf32>
    %c1_i32_390 = arith.constant 1 : i32
    %475 = tpu.dynamic_rotate %163 by %c1_i32_390 dim 1 : vector<8x256xf32>, i32 -> vector<8x256xf32>
    %476 = vector.broadcast %467 : vector<1x256xf32> to vector<8x256xf32>
    %477 = arith.mulf %475, %476 : vector<8x256xf32>
    %c3_391 = arith.constant 3 : index
    %c0_392 = arith.constant 0 : index
    %c0_393 = arith.constant 0 : index
    %478 = vector.load %arg13[%c3_391, %c0_392, %c0_393] : memref<9x8x8xf32, #tpu.memory_space<vmem>>, vector<1x8x8xf32>
    %479 = vector.shape_cast %478 : vector<1x8x8xf32> to vector<8x8xf32>
    %cst_394 = arith.constant dense<0.000000e+00> : vector<8x256xf32>
    %480 = tpu.matmul %479, %477, %cst_394 {dimension_numbers = #tpu.dot_dimension_numbers<[1], [0], [0], [1], [0, 0, 1, 1], [], []>} : vector<8x8xf32>, vector<8x256xf32>, vector<8x256xf32> -> vector<8x256xf32>
    %481 = arith.addf %474, %480 : vector<8x256xf32>
    %c4_395 = arith.constant 4 : index
    %c0_396 = arith.constant 0 : index
    %c0_397 = arith.constant 0 : index
    %482 = vector.load %arg12[%c4_395, %c0_396, %c0_397] : memref<9x8x8xf32, #tpu.memory_space<vmem>>, vector<1x8x8xf32>
    %483 = vector.shape_cast %482 : vector<1x8x8xf32> to vector<8x8xf32>
    %cst_398 = arith.constant dense<0.000000e+00> : vector<8x256xf32>
    %484 = tpu.matmul %483, %414, %cst_398 {dimension_numbers = #tpu.dot_dimension_numbers<[1], [0], [0], [1], [0, 0, 1, 1], [], []>} : vector<8x8xf32>, vector<8x256xf32>, vector<8x256xf32> -> vector<8x256xf32>
    %485 = arith.addf %481, %484 : vector<8x256xf32>
    %c4_399 = arith.constant 4 : index
    %c0_400 = arith.constant 0 : index
    %c0_401 = arith.constant 0 : index
    %486 = vector.load %arg13[%c4_399, %c0_400, %c0_401] : memref<9x8x8xf32, #tpu.memory_space<vmem>>, vector<1x8x8xf32>
    %487 = vector.shape_cast %486 : vector<1x8x8xf32> to vector<8x8xf32>
    %cst_402 = arith.constant dense<0.000000e+00> : vector<8x256xf32>
    %488 = tpu.matmul %487, %163, %cst_402 {dimension_numbers = #tpu.dot_dimension_numbers<[1], [0], [0], [1], [0, 0, 1, 1], [], []>} : vector<8x8xf32>, vector<8x256xf32>, vector<8x256xf32> -> vector<8x256xf32>
    %489 = arith.addf %485, %488 : vector<8x256xf32>
    %c5_403 = arith.constant 5 : index
    %c0_404 = arith.constant 0 : index
    %c0_405 = arith.constant 0 : index
    %490 = vector.load %arg19[%c5_403, %c0_404, %c0_405] : memref<9x1x256xf32, #tpu.memory_space<vmem>>, vector<1x1x256xf32>
    %491 = vector.shape_cast %490 : vector<1x1x256xf32> to vector<1x256xf32>
    %c255_i32_406 = arith.constant 255 : i32
    %492 = tpu.dynamic_rotate %414 by %c255_i32_406 dim 1 : vector<8x256xf32>, i32 -> vector<8x256xf32>
    %493 = vector.broadcast %491 : vector<1x256xf32> to vector<8x256xf32>
    %494 = arith.mulf %492, %493 : vector<8x256xf32>
    %c5_407 = arith.constant 5 : index
    %c0_408 = arith.constant 0 : index
    %c0_409 = arith.constant 0 : index
    %495 = vector.load %arg12[%c5_407, %c0_408, %c0_409] : memref<9x8x8xf32, #tpu.memory_space<vmem>>, vector<1x8x8xf32>
    %496 = vector.shape_cast %495 : vector<1x8x8xf32> to vector<8x8xf32>
    %cst_410 = arith.constant dense<0.000000e+00> : vector<8x256xf32>
    %497 = tpu.matmul %496, %494, %cst_410 {dimension_numbers = #tpu.dot_dimension_numbers<[1], [0], [0], [1], [0, 0, 1, 1], [], []>} : vector<8x8xf32>, vector<8x256xf32>, vector<8x256xf32> -> vector<8x256xf32>
    %498 = arith.addf %489, %497 : vector<8x256xf32>
    %c255_i32_411 = arith.constant 255 : i32
    %499 = tpu.dynamic_rotate %163 by %c255_i32_411 dim 1 : vector<8x256xf32>, i32 -> vector<8x256xf32>
    %500 = vector.broadcast %491 : vector<1x256xf32> to vector<8x256xf32>
    %501 = arith.mulf %499, %500 : vector<8x256xf32>
    %c5_412 = arith.constant 5 : index
    %c0_413 = arith.constant 0 : index
    %c0_414 = arith.constant 0 : index
    %502 = vector.load %arg13[%c5_412, %c0_413, %c0_414] : memref<9x8x8xf32, #tpu.memory_space<vmem>>, vector<1x8x8xf32>
    %503 = vector.shape_cast %502 : vector<1x8x8xf32> to vector<8x8xf32>
    %cst_415 = arith.constant dense<0.000000e+00> : vector<8x256xf32>
    %504 = tpu.matmul %503, %501, %cst_415 {dimension_numbers = #tpu.dot_dimension_numbers<[1], [0], [0], [1], [0, 0, 1, 1], [], []>} : vector<8x8xf32>, vector<8x256xf32>, vector<8x256xf32> -> vector<8x256xf32>
    %505 = arith.addf %498, %504 : vector<8x256xf32>
    %c6_416 = arith.constant 6 : index
    %c0_417 = arith.constant 0 : index
    %c0_418 = arith.constant 0 : index
    %506 = vector.load %arg19[%c6_416, %c0_417, %c0_418] : memref<9x1x256xf32, #tpu.memory_space<vmem>>, vector<1x1x256xf32>
    %507 = vector.shape_cast %506 : vector<1x1x256xf32> to vector<1x256xf32>
    %c241_i32_419 = arith.constant 241 : i32
    %508 = tpu.dynamic_rotate %414 by %c241_i32_419 dim 1 : vector<8x256xf32>, i32 -> vector<8x256xf32>
    %509 = vector.broadcast %507 : vector<1x256xf32> to vector<8x256xf32>
    %510 = arith.mulf %508, %509 : vector<8x256xf32>
    %c6_420 = arith.constant 6 : index
    %c0_421 = arith.constant 0 : index
    %c0_422 = arith.constant 0 : index
    %511 = vector.load %arg12[%c6_420, %c0_421, %c0_422] : memref<9x8x8xf32, #tpu.memory_space<vmem>>, vector<1x8x8xf32>
    %512 = vector.shape_cast %511 : vector<1x8x8xf32> to vector<8x8xf32>
    %cst_423 = arith.constant dense<0.000000e+00> : vector<8x256xf32>
    %513 = tpu.matmul %512, %510, %cst_423 {dimension_numbers = #tpu.dot_dimension_numbers<[1], [0], [0], [1], [0, 0, 1, 1], [], []>} : vector<8x8xf32>, vector<8x256xf32>, vector<8x256xf32> -> vector<8x256xf32>
    %514 = arith.addf %505, %513 : vector<8x256xf32>
    %c241_i32_424 = arith.constant 241 : i32
    %515 = tpu.dynamic_rotate %163 by %c241_i32_424 dim 1 : vector<8x256xf32>, i32 -> vector<8x256xf32>
    %516 = vector.broadcast %507 : vector<1x256xf32> to vector<8x256xf32>
    %517 = arith.mulf %515, %516 : vector<8x256xf32>
    %c6_425 = arith.constant 6 : index
    %c0_426 = arith.constant 0 : index
    %c0_427 = arith.constant 0 : index
    %518 = vector.load %arg13[%c6_425, %c0_426, %c0_427] : memref<9x8x8xf32, #tpu.memory_space<vmem>>, vector<1x8x8xf32>
    %519 = vector.shape_cast %518 : vector<1x8x8xf32> to vector<8x8xf32>
    %cst_428 = arith.constant dense<0.000000e+00> : vector<8x256xf32>
    %520 = tpu.matmul %519, %517, %cst_428 {dimension_numbers = #tpu.dot_dimension_numbers<[1], [0], [0], [1], [0, 0, 1, 1], [], []>} : vector<8x8xf32>, vector<8x256xf32>, vector<8x256xf32> -> vector<8x256xf32>
    %521 = arith.addf %514, %520 : vector<8x256xf32>
    %c7_429 = arith.constant 7 : index
    %c0_430 = arith.constant 0 : index
    %c0_431 = arith.constant 0 : index
    %522 = vector.load %arg19[%c7_429, %c0_430, %c0_431] : memref<9x1x256xf32, #tpu.memory_space<vmem>>, vector<1x1x256xf32>
    %523 = vector.shape_cast %522 : vector<1x1x256xf32> to vector<1x256xf32>
    %c240_i32_432 = arith.constant 240 : i32
    %524 = tpu.dynamic_rotate %414 by %c240_i32_432 dim 1 : vector<8x256xf32>, i32 -> vector<8x256xf32>
    %525 = vector.broadcast %523 : vector<1x256xf32> to vector<8x256xf32>
    %526 = arith.mulf %524, %525 : vector<8x256xf32>
    %c7_433 = arith.constant 7 : index
    %c0_434 = arith.constant 0 : index
    %c0_435 = arith.constant 0 : index
    %527 = vector.load %arg12[%c7_433, %c0_434, %c0_435] : memref<9x8x8xf32, #tpu.memory_space<vmem>>, vector<1x8x8xf32>
    %528 = vector.shape_cast %527 : vector<1x8x8xf32> to vector<8x8xf32>
    %cst_436 = arith.constant dense<0.000000e+00> : vector<8x256xf32>
    %529 = tpu.matmul %528, %526, %cst_436 {dimension_numbers = #tpu.dot_dimension_numbers<[1], [0], [0], [1], [0, 0, 1, 1], [], []>} : vector<8x8xf32>, vector<8x256xf32>, vector<8x256xf32> -> vector<8x256xf32>
    %530 = arith.addf %521, %529 : vector<8x256xf32>
    %c240_i32_437 = arith.constant 240 : i32
    %531 = tpu.dynamic_rotate %163 by %c240_i32_437 dim 1 : vector<8x256xf32>, i32 -> vector<8x256xf32>
    %532 = vector.broadcast %523 : vector<1x256xf32> to vector<8x256xf32>
    %533 = arith.mulf %531, %532 : vector<8x256xf32>
    %c7_438 = arith.constant 7 : index
    %c0_439 = arith.constant 0 : index
    %c0_440 = arith.constant 0 : index
    %534 = vector.load %arg13[%c7_438, %c0_439, %c0_440] : memref<9x8x8xf32, #tpu.memory_space<vmem>>, vector<1x8x8xf32>
    %535 = vector.shape_cast %534 : vector<1x8x8xf32> to vector<8x8xf32>
    %cst_441 = arith.constant dense<0.000000e+00> : vector<8x256xf32>
    %536 = tpu.matmul %535, %533, %cst_441 {dimension_numbers = #tpu.dot_dimension_numbers<[1], [0], [0], [1], [0, 0, 1, 1], [], []>} : vector<8x8xf32>, vector<8x256xf32>, vector<8x256xf32> -> vector<8x256xf32>
    %537 = arith.addf %530, %536 : vector<8x256xf32>
    %c8_442 = arith.constant 8 : index
    %c0_443 = arith.constant 0 : index
    %c0_444 = arith.constant 0 : index
    %538 = vector.load %arg19[%c8_442, %c0_443, %c0_444] : memref<9x1x256xf32, #tpu.memory_space<vmem>>, vector<1x1x256xf32>
    %539 = vector.shape_cast %538 : vector<1x1x256xf32> to vector<1x256xf32>
    %c239_i32_445 = arith.constant 239 : i32
    %540 = tpu.dynamic_rotate %414 by %c239_i32_445 dim 1 : vector<8x256xf32>, i32 -> vector<8x256xf32>
    %541 = vector.broadcast %539 : vector<1x256xf32> to vector<8x256xf32>
    %542 = arith.mulf %540, %541 : vector<8x256xf32>
    %c8_446 = arith.constant 8 : index
    %c0_447 = arith.constant 0 : index
    %c0_448 = arith.constant 0 : index
    %543 = vector.load %arg12[%c8_446, %c0_447, %c0_448] : memref<9x8x8xf32, #tpu.memory_space<vmem>>, vector<1x8x8xf32>
    %544 = vector.shape_cast %543 : vector<1x8x8xf32> to vector<8x8xf32>
    %cst_449 = arith.constant dense<0.000000e+00> : vector<8x256xf32>
    %545 = tpu.matmul %544, %542, %cst_449 {dimension_numbers = #tpu.dot_dimension_numbers<[1], [0], [0], [1], [0, 0, 1, 1], [], []>} : vector<8x8xf32>, vector<8x256xf32>, vector<8x256xf32> -> vector<8x256xf32>
    %546 = arith.addf %537, %545 : vector<8x256xf32>
    %c239_i32_450 = arith.constant 239 : i32
    %547 = tpu.dynamic_rotate %163 by %c239_i32_450 dim 1 : vector<8x256xf32>, i32 -> vector<8x256xf32>
    %548 = vector.broadcast %539 : vector<1x256xf32> to vector<8x256xf32>
    %549 = arith.mulf %547, %548 : vector<8x256xf32>
    %c8_451 = arith.constant 8 : index
    %c0_452 = arith.constant 0 : index
    %c0_453 = arith.constant 0 : index
    %550 = vector.load %arg13[%c8_451, %c0_452, %c0_453] : memref<9x8x8xf32, #tpu.memory_space<vmem>>, vector<1x8x8xf32>
    %551 = vector.shape_cast %550 : vector<1x8x8xf32> to vector<8x8xf32>
    %cst_454 = arith.constant dense<0.000000e+00> : vector<8x256xf32>
    %552 = tpu.matmul %551, %549, %cst_454 {dimension_numbers = #tpu.dot_dimension_numbers<[1], [0], [0], [1], [0, 0, 1, 1], [], []>} : vector<8x8xf32>, vector<8x256xf32>, vector<8x256xf32> -> vector<8x256xf32>
    %553 = arith.addf %546, %552 : vector<8x256xf32>
    %cst_455 = arith.constant 0.000000e+00 : f32
    %554 = vector.broadcast %cst_455 : f32 to vector<8x256xf32>
    %555 = arith.maximumf %553, %554 : vector<8x256xf32>
    %c0_456 = arith.constant 0 : index
    %c0_457 = arith.constant 0 : index
    %556 = vector.load %arg16[%c0_456, %c0_457] : memref<8x1xf32, #tpu.memory_space<vmem>>, vector<8x1xf32>
    %557 = vector.shape_cast %556 : vector<8x1xf32> to vector<8x1xf32>
    %558 = vector.broadcast %557 : vector<8x1xf32> to vector<8x256xf32>
    %c0_458 = arith.constant 0 : index
    %c0_459 = arith.constant 0 : index
    %c0_460 = arith.constant 0 : index
    %559 = vector.load %arg19[%c0_458, %c0_459, %c0_460] : memref<9x1x256xf32, #tpu.memory_space<vmem>>, vector<1x1x256xf32>
    %560 = vector.shape_cast %559 : vector<1x1x256xf32> to vector<1x256xf32>
    %c17_i32_461 = arith.constant 17 : i32
    %561 = tpu.dynamic_rotate %555 by %c17_i32_461 dim 1 : vector<8x256xf32>, i32 -> vector<8x256xf32>
    %562 = vector.broadcast %560 : vector<1x256xf32> to vector<8x256xf32>
    %563 = arith.mulf %561, %562 : vector<8x256xf32>
    %c0_462 = arith.constant 0 : index
    %c0_463 = arith.constant 0 : index
    %c0_464 = arith.constant 0 : index
    %564 = vector.load %arg15[%c0_462, %c0_463, %c0_464] : memref<9x8x8xf32, #tpu.memory_space<vmem>>, vector<1x8x8xf32>
    %565 = vector.shape_cast %564 : vector<1x8x8xf32> to vector<8x8xf32>
    %cst_465 = arith.constant dense<0.000000e+00> : vector<8x256xf32>
    %566 = tpu.matmul %565, %563, %cst_465 {dimension_numbers = #tpu.dot_dimension_numbers<[1], [0], [0], [1], [0, 0, 1, 1], [], []>} : vector<8x8xf32>, vector<8x256xf32>, vector<8x256xf32> -> vector<8x256xf32>
    %567 = arith.addf %558, %566 : vector<8x256xf32>
    %c1_466 = arith.constant 1 : index
    %c0_467 = arith.constant 0 : index
    %c0_468 = arith.constant 0 : index
    %568 = vector.load %arg19[%c1_466, %c0_467, %c0_468] : memref<9x1x256xf32, #tpu.memory_space<vmem>>, vector<1x1x256xf32>
    %569 = vector.shape_cast %568 : vector<1x1x256xf32> to vector<1x256xf32>
    %c16_i32_469 = arith.constant 16 : i32
    %570 = tpu.dynamic_rotate %555 by %c16_i32_469 dim 1 : vector<8x256xf32>, i32 -> vector<8x256xf32>
    %571 = vector.broadcast %569 : vector<1x256xf32> to vector<8x256xf32>
    %572 = arith.mulf %570, %571 : vector<8x256xf32>
    %c1_470 = arith.constant 1 : index
    %c0_471 = arith.constant 0 : index
    %c0_472 = arith.constant 0 : index
    %573 = vector.load %arg15[%c1_470, %c0_471, %c0_472] : memref<9x8x8xf32, #tpu.memory_space<vmem>>, vector<1x8x8xf32>
    %574 = vector.shape_cast %573 : vector<1x8x8xf32> to vector<8x8xf32>
    %cst_473 = arith.constant dense<0.000000e+00> : vector<8x256xf32>
    %575 = tpu.matmul %574, %572, %cst_473 {dimension_numbers = #tpu.dot_dimension_numbers<[1], [0], [0], [1], [0, 0, 1, 1], [], []>} : vector<8x8xf32>, vector<8x256xf32>, vector<8x256xf32> -> vector<8x256xf32>
    %576 = arith.addf %567, %575 : vector<8x256xf32>
    %c2_474 = arith.constant 2 : index
    %c0_475 = arith.constant 0 : index
    %c0_476 = arith.constant 0 : index
    %577 = vector.load %arg19[%c2_474, %c0_475, %c0_476] : memref<9x1x256xf32, #tpu.memory_space<vmem>>, vector<1x1x256xf32>
    %578 = vector.shape_cast %577 : vector<1x1x256xf32> to vector<1x256xf32>
    %c15_i32_477 = arith.constant 15 : i32
    %579 = tpu.dynamic_rotate %555 by %c15_i32_477 dim 1 : vector<8x256xf32>, i32 -> vector<8x256xf32>
    %580 = vector.broadcast %578 : vector<1x256xf32> to vector<8x256xf32>
    %581 = arith.mulf %579, %580 : vector<8x256xf32>
    %c2_478 = arith.constant 2 : index
    %c0_479 = arith.constant 0 : index
    %c0_480 = arith.constant 0 : index
    %582 = vector.load %arg15[%c2_478, %c0_479, %c0_480] : memref<9x8x8xf32, #tpu.memory_space<vmem>>, vector<1x8x8xf32>
    %583 = vector.shape_cast %582 : vector<1x8x8xf32> to vector<8x8xf32>
    %cst_481 = arith.constant dense<0.000000e+00> : vector<8x256xf32>
    %584 = tpu.matmul %583, %581, %cst_481 {dimension_numbers = #tpu.dot_dimension_numbers<[1], [0], [0], [1], [0, 0, 1, 1], [], []>} : vector<8x8xf32>, vector<8x256xf32>, vector<8x256xf32> -> vector<8x256xf32>
    %585 = arith.addf %576, %584 : vector<8x256xf32>
    %c3_482 = arith.constant 3 : index
    %c0_483 = arith.constant 0 : index
    %c0_484 = arith.constant 0 : index
    %586 = vector.load %arg19[%c3_482, %c0_483, %c0_484] : memref<9x1x256xf32, #tpu.memory_space<vmem>>, vector<1x1x256xf32>
    %587 = vector.shape_cast %586 : vector<1x1x256xf32> to vector<1x256xf32>
    %c1_i32_485 = arith.constant 1 : i32
    %588 = tpu.dynamic_rotate %555 by %c1_i32_485 dim 1 : vector<8x256xf32>, i32 -> vector<8x256xf32>
    %589 = vector.broadcast %587 : vector<1x256xf32> to vector<8x256xf32>
    %590 = arith.mulf %588, %589 : vector<8x256xf32>
    %c3_486 = arith.constant 3 : index
    %c0_487 = arith.constant 0 : index
    %c0_488 = arith.constant 0 : index
    %591 = vector.load %arg15[%c3_486, %c0_487, %c0_488] : memref<9x8x8xf32, #tpu.memory_space<vmem>>, vector<1x8x8xf32>
    %592 = vector.shape_cast %591 : vector<1x8x8xf32> to vector<8x8xf32>
    %cst_489 = arith.constant dense<0.000000e+00> : vector<8x256xf32>
    %593 = tpu.matmul %592, %590, %cst_489 {dimension_numbers = #tpu.dot_dimension_numbers<[1], [0], [0], [1], [0, 0, 1, 1], [], []>} : vector<8x8xf32>, vector<8x256xf32>, vector<8x256xf32> -> vector<8x256xf32>
    %594 = arith.addf %585, %593 : vector<8x256xf32>
    %c4_490 = arith.constant 4 : index
    %c0_491 = arith.constant 0 : index
    %c0_492 = arith.constant 0 : index
    %595 = vector.load %arg15[%c4_490, %c0_491, %c0_492] : memref<9x8x8xf32, #tpu.memory_space<vmem>>, vector<1x8x8xf32>
    %596 = vector.shape_cast %595 : vector<1x8x8xf32> to vector<8x8xf32>
    %cst_493 = arith.constant dense<0.000000e+00> : vector<8x256xf32>
    %597 = tpu.matmul %596, %555, %cst_493 {dimension_numbers = #tpu.dot_dimension_numbers<[1], [0], [0], [1], [0, 0, 1, 1], [], []>} : vector<8x8xf32>, vector<8x256xf32>, vector<8x256xf32> -> vector<8x256xf32>
    %598 = arith.addf %594, %597 : vector<8x256xf32>
    %c5_494 = arith.constant 5 : index
    %c0_495 = arith.constant 0 : index
    %c0_496 = arith.constant 0 : index
    %599 = vector.load %arg19[%c5_494, %c0_495, %c0_496] : memref<9x1x256xf32, #tpu.memory_space<vmem>>, vector<1x1x256xf32>
    %600 = vector.shape_cast %599 : vector<1x1x256xf32> to vector<1x256xf32>
    %c255_i32_497 = arith.constant 255 : i32
    %601 = tpu.dynamic_rotate %555 by %c255_i32_497 dim 1 : vector<8x256xf32>, i32 -> vector<8x256xf32>
    %602 = vector.broadcast %600 : vector<1x256xf32> to vector<8x256xf32>
    %603 = arith.mulf %601, %602 : vector<8x256xf32>
    %c5_498 = arith.constant 5 : index
    %c0_499 = arith.constant 0 : index
    %c0_500 = arith.constant 0 : index
    %604 = vector.load %arg15[%c5_498, %c0_499, %c0_500] : memref<9x8x8xf32, #tpu.memory_space<vmem>>, vector<1x8x8xf32>
    %605 = vector.shape_cast %604 : vector<1x8x8xf32> to vector<8x8xf32>
    %cst_501 = arith.constant dense<0.000000e+00> : vector<8x256xf32>
    %606 = tpu.matmul %605, %603, %cst_501 {dimension_numbers = #tpu.dot_dimension_numbers<[1], [0], [0], [1], [0, 0, 1, 1], [], []>} : vector<8x8xf32>, vector<8x256xf32>, vector<8x256xf32> -> vector<8x256xf32>
    %607 = arith.addf %598, %606 : vector<8x256xf32>
    %c6_502 = arith.constant 6 : index
    %c0_503 = arith.constant 0 : index
    %c0_504 = arith.constant 0 : index
    %608 = vector.load %arg19[%c6_502, %c0_503, %c0_504] : memref<9x1x256xf32, #tpu.memory_space<vmem>>, vector<1x1x256xf32>
    %609 = vector.shape_cast %608 : vector<1x1x256xf32> to vector<1x256xf32>
    %c241_i32_505 = arith.constant 241 : i32
    %610 = tpu.dynamic_rotate %555 by %c241_i32_505 dim 1 : vector<8x256xf32>, i32 -> vector<8x256xf32>
    %611 = vector.broadcast %609 : vector<1x256xf32> to vector<8x256xf32>
    %612 = arith.mulf %610, %611 : vector<8x256xf32>
    %c6_506 = arith.constant 6 : index
    %c0_507 = arith.constant 0 : index
    %c0_508 = arith.constant 0 : index
    %613 = vector.load %arg15[%c6_506, %c0_507, %c0_508] : memref<9x8x8xf32, #tpu.memory_space<vmem>>, vector<1x8x8xf32>
    %614 = vector.shape_cast %613 : vector<1x8x8xf32> to vector<8x8xf32>
    %cst_509 = arith.constant dense<0.000000e+00> : vector<8x256xf32>
    %615 = tpu.matmul %614, %612, %cst_509 {dimension_numbers = #tpu.dot_dimension_numbers<[1], [0], [0], [1], [0, 0, 1, 1], [], []>} : vector<8x8xf32>, vector<8x256xf32>, vector<8x256xf32> -> vector<8x256xf32>
    %616 = arith.addf %607, %615 : vector<8x256xf32>
    %c7_510 = arith.constant 7 : index
    %c0_511 = arith.constant 0 : index
    %c0_512 = arith.constant 0 : index
    %617 = vector.load %arg19[%c7_510, %c0_511, %c0_512] : memref<9x1x256xf32, #tpu.memory_space<vmem>>, vector<1x1x256xf32>
    %618 = vector.shape_cast %617 : vector<1x1x256xf32> to vector<1x256xf32>
    %c240_i32_513 = arith.constant 240 : i32
    %619 = tpu.dynamic_rotate %555 by %c240_i32_513 dim 1 : vector<8x256xf32>, i32 -> vector<8x256xf32>
    %620 = vector.broadcast %618 : vector<1x256xf32> to vector<8x256xf32>
    %621 = arith.mulf %619, %620 : vector<8x256xf32>
    %c7_514 = arith.constant 7 : index
    %c0_515 = arith.constant 0 : index
    %c0_516 = arith.constant 0 : index
    %622 = vector.load %arg15[%c7_514, %c0_515, %c0_516] : memref<9x8x8xf32, #tpu.memory_space<vmem>>, vector<1x8x8xf32>
    %623 = vector.shape_cast %622 : vector<1x8x8xf32> to vector<8x8xf32>
    %cst_517 = arith.constant dense<0.000000e+00> : vector<8x256xf32>
    %624 = tpu.matmul %623, %621, %cst_517 {dimension_numbers = #tpu.dot_dimension_numbers<[1], [0], [0], [1], [0, 0, 1, 1], [], []>} : vector<8x8xf32>, vector<8x256xf32>, vector<8x256xf32> -> vector<8x256xf32>
    %625 = arith.addf %616, %624 : vector<8x256xf32>
    %c8_518 = arith.constant 8 : index
    %c0_519 = arith.constant 0 : index
    %c0_520 = arith.constant 0 : index
    %626 = vector.load %arg19[%c8_518, %c0_519, %c0_520] : memref<9x1x256xf32, #tpu.memory_space<vmem>>, vector<1x1x256xf32>
    %627 = vector.shape_cast %626 : vector<1x1x256xf32> to vector<1x256xf32>
    %c239_i32_521 = arith.constant 239 : i32
    %628 = tpu.dynamic_rotate %555 by %c239_i32_521 dim 1 : vector<8x256xf32>, i32 -> vector<8x256xf32>
    %629 = vector.broadcast %627 : vector<1x256xf32> to vector<8x256xf32>
    %630 = arith.mulf %628, %629 : vector<8x256xf32>
    %c8_522 = arith.constant 8 : index
    %c0_523 = arith.constant 0 : index
    %c0_524 = arith.constant 0 : index
    %631 = vector.load %arg15[%c8_522, %c0_523, %c0_524] : memref<9x8x8xf32, #tpu.memory_space<vmem>>, vector<1x8x8xf32>
    %632 = vector.shape_cast %631 : vector<1x8x8xf32> to vector<8x8xf32>
    %cst_525 = arith.constant dense<0.000000e+00> : vector<8x256xf32>
    %633 = tpu.matmul %632, %630, %cst_525 {dimension_numbers = #tpu.dot_dimension_numbers<[1], [0], [0], [1], [0, 0, 1, 1], [], []>} : vector<8x8xf32>, vector<8x256xf32>, vector<8x256xf32> -> vector<8x256xf32>
    %634 = arith.addf %625, %633 : vector<8x256xf32>
    %cst_526 = arith.constant 0.000000e+00 : f32
    %635 = vector.broadcast %cst_526 : f32 to vector<8x256xf32>
    %636 = arith.maximumf %634, %635 : vector<8x256xf32>
    %c0_527 = arith.constant 0 : index
    %c0_528 = arith.constant 0 : index
    %637 = vector.load %arg17[%c0_527, %c0_528] : memref<2x8xf32, #tpu.memory_space<vmem>>, vector<2x8xf32>
    %cst_529 = arith.constant dense<0.000000e+00> : vector<2x256xf32>
    %638 = tpu.matmul %637, %636, %cst_529 {dimension_numbers = #tpu.dot_dimension_numbers<[1], [0], [0], [1], [0, 0, 1, 1], [], []>} : vector<2x8xf32>, vector<8x256xf32>, vector<2x256xf32> -> vector<2x256xf32>
    %c0_530 = arith.constant 0 : index
    %c0_531 = arith.constant 0 : index
    %639 = vector.load %arg18[%c0_530, %c0_531] : memref<2x1xf32, #tpu.memory_space<vmem>>, vector<2x1xf32>
    %640 = vector.broadcast %639 : vector<2x1xf32> to vector<2x256xf32>
    %641 = arith.addf %638, %640 : vector<2x256xf32>
    %c0_532 = arith.constant 0 : index
    %c0_533 = arith.constant 0 : index
    %c0_534 = arith.constant 0 : index
    %642 = vector.load %arg23[%c0_532, %c0_533, %c0_534] : memref<1x2x256xf32, #tpu.memory_space<vmem>>, vector<1x2x256xf32>
    %643 = vector.shape_cast %642 : vector<1x2x256xf32> to vector<2x256xf32>
    %644 = vector.shape_cast %641 : vector<2x256xf32> to vector<1x2x256xf32>
    tpu.vector_store %arg23[%c0_532, %c0_533, %c0_534], %644 {strides = array<i32>} : memref<1x2x256xf32, #tpu.memory_space<vmem>>, vector<1x2x256xf32>,
    return
  }
  func.func @transform_0(%arg0: i32) -> (i32, i32, i32) {
    %c0_i32 = arith.constant 0 : i32
    %c0_i32_0 = arith.constant 0 : i32
    %c0_i32_1 = arith.constant 0 : i32
    return %arg0, %c0_i32, %c0_i32_0 : i32, i32, i32
  }
  func.func @transform_1(%arg0: i32) -> (i32, i32, i32) {
    %c0_i32 = arith.constant 0 : i32
    %c0_i32_0 = arith.constant 0 : i32
    %c0_i32_1 = arith.constant 0 : i32
    %c0_i32_2 = arith.constant 0 : i32
    return %c0_i32, %c0_i32_0, %c0_i32_1 : i32, i32, i32
  }
  func.func @transform_2(%arg0: i32) -> (i32, i32) {
    %c0_i32 = arith.constant 0 : i32
    %c0_i32_0 = arith.constant 0 : i32
    %c0_i32_1 = arith.constant 0 : i32
    return %c0_i32, %c0_i32_0 : i32, i32
  }
  func.func @transform_3(%arg0: i32) -> (i32, i32, i32) {
    %c0_i32 = arith.constant 0 : i32
    %c0_i32_0 = arith.constant 0 : i32
    %c0_i32_1 = arith.constant 0 : i32
    %c0_i32_2 = arith.constant 0 : i32
    return %c0_i32, %c0_i32_0, %c0_i32_1 : i32, i32, i32
  }
  func.func @transform_4(%arg0: i32) -> (i32, i32) {
    %c0_i32 = arith.constant 0 : i32
    %c0_i32_0 = arith.constant 0 : i32
    %c0_i32_1 = arith.constant 0 : i32
    return %c0_i32, %c0_i32_0 : i32, i32
  }
  func.func @transform_5(%arg0: i32) -> (i32, i32, i32) {
    %c0_i32 = arith.constant 0 : i32
    %c0_i32_0 = arith.constant 0 : i32
    %c0_i32_1 = arith.constant 0 : i32
    %c0_i32_2 = arith.constant 0 : i32
    return %c0_i32, %c0_i32_0, %c0_i32_1 : i32, i32, i32
  }
  func.func @transform_6(%arg0: i32) -> (i32, i32) {
    %c0_i32 = arith.constant 0 : i32
    %c0_i32_0 = arith.constant 0 : i32
    %c0_i32_1 = arith.constant 0 : i32
    return %c0_i32, %c0_i32_0 : i32, i32
  }
  func.func @transform_7(%arg0: i32) -> (i32, i32, i32) {
    %c0_i32 = arith.constant 0 : i32
    %c0_i32_0 = arith.constant 0 : i32
    %c0_i32_1 = arith.constant 0 : i32
    %c0_i32_2 = arith.constant 0 : i32
    return %c0_i32, %c0_i32_0, %c0_i32_1 : i32, i32, i32
  }
  func.func @transform_8(%arg0: i32) -> (i32, i32) {
    %c0_i32 = arith.constant 0 : i32
    %c0_i32_0 = arith.constant 0 : i32
    %c0_i32_1 = arith.constant 0 : i32
    return %c0_i32, %c0_i32_0 : i32, i32
  }
  func.func @transform_9(%arg0: i32) -> (i32, i32, i32) {
    %c0_i32 = arith.constant 0 : i32
    %c0_i32_0 = arith.constant 0 : i32
    %c0_i32_1 = arith.constant 0 : i32
    %c0_i32_2 = arith.constant 0 : i32
    return %c0_i32, %c0_i32_0, %c0_i32_1 : i32, i32, i32
  }
  func.func @transform_10(%arg0: i32) -> (i32, i32) {
    %c0_i32 = arith.constant 0 : i32
    %c0_i32_0 = arith.constant 0 : i32
    %c0_i32_1 = arith.constant 0 : i32
    return %c0_i32, %c0_i32_0 : i32, i32
  }
  func.func @transform_11(%arg0: i32) -> (i32, i32, i32) {
    %c0_i32 = arith.constant 0 : i32
    %c0_i32_0 = arith.constant 0 : i32
    %c0_i32_1 = arith.constant 0 : i32
    %c0_i32_2 = arith.constant 0 : i32
    return %c0_i32, %c0_i32_0, %c0_i32_1 : i32, i32, i32
  }
  func.func @transform_12(%arg0: i32) -> (i32, i32, i32) {
    %c0_i32 = arith.constant 0 : i32
    %c0_i32_0 = arith.constant 0 : i32
    %c0_i32_1 = arith.constant 0 : i32
    %c0_i32_2 = arith.constant 0 : i32
    return %c0_i32, %c0_i32_0, %c0_i32_1 : i32, i32, i32
  }
  func.func @transform_13(%arg0: i32) -> (i32, i32) {
    %c0_i32 = arith.constant 0 : i32
    %c0_i32_0 = arith.constant 0 : i32
    %c0_i32_1 = arith.constant 0 : i32
    return %c0_i32, %c0_i32_0 : i32, i32
  }
  func.func @transform_14(%arg0: i32) -> (i32, i32, i32) {
    %c0_i32 = arith.constant 0 : i32
    %c0_i32_0 = arith.constant 0 : i32
    %c0_i32_1 = arith.constant 0 : i32
    %c0_i32_2 = arith.constant 0 : i32
    return %c0_i32, %c0_i32_0, %c0_i32_1 : i32, i32, i32
  }
  func.func @transform_15(%arg0: i32) -> (i32, i32) {
    %c0_i32 = arith.constant 0 : i32
    %c0_i32_0 = arith.constant 0 : i32
    %c0_i32_1 = arith.constant 0 : i32
    return %c0_i32, %c0_i32_0 : i32, i32
  }
  func.func @transform_16(%arg0: i32) -> (i32, i32) {
    %c0_i32 = arith.constant 0 : i32
    %c0_i32_0 = arith.constant 0 : i32
    %c0_i32_1 = arith.constant 0 : i32
    return %c0_i32, %c0_i32_0 : i32, i32
  }
  func.func @transform_17(%arg0: i32) -> (i32, i32) {
    %c0_i32 = arith.constant 0 : i32
    %c0_i32_0 = arith.constant 0 : i32
    %c0_i32_1 = arith.constant 0 : i32
    return %c0_i32, %c0_i32_0 : i32, i32
  }
  func.func @transform_18(%arg0: i32) -> (i32, i32, i32) {
    %c0_i32 = arith.constant 0 : i32
    %c0_i32_0 = arith.constant 0 : i32
    %c0_i32_1 = arith.constant 0 : i32
    %c0_i32_2 = arith.constant 0 : i32
    return %c0_i32, %c0_i32_0, %c0_i32_1 : i32, i32, i32
  }
  func.func @transform_19(%arg0: i32) -> (i32, i32, i32) {
    %c0_i32 = arith.constant 0 : i32
    %c0_i32_0 = arith.constant 0 : i32
    %c0_i32_1 = arith.constant 0 : i32
    %c0_i32_2 = arith.constant 0 : i32
    return %c0_i32, %c0_i32_0, %c0_i32_1 : i32, i32, i32
  }
  func.func @transform_20(%arg0: i32) -> (i32, i32) {
    %c0_i32 = arith.constant 0 : i32
    %c0_i32_0 = arith.constant 0 : i32
    %c0_i32_1 = arith.constant 0 : i32
    return %c0_i32, %c0_i32_0 : i32, i32
  }
  func.func @transform_21(%arg0: i32) -> (i32, i32) {
    %c0_i32 = arith.constant 0 : i32
    %c0_i32_0 = arith.constant 0 : i32
    %c0_i32_1 = arith.constant 0 : i32
    return %c0_i32, %c0_i32_0 : i32, i32
  }
  func.func @transform_22(%arg0: i32) -> (i32, i32, i32) {
    %c0_i32 = arith.constant 0 : i32
    %c0_i32_0 = arith.constant 0 : i32
    %c0_i32_1 = arith.constant 0 : i32
    return %arg0, %c0_i32, %c0_i32_0 : i32, i32, i32
  }
}

</mosaic_0001>

<bundles_post_ra>
// kernel: tpu_custom_call.1
= control target key start
LH: loop header
LB: loop body
LE: loop exit
PB: predicated region body
PF: predicated region fallthrough
CT: control target
= control target key end

     0   :  { %s7109_s0 = inlined_call_operand.hbm [shape: f32[2,4,256], index: 0, kind: input, shape index: {}]   ;;  %s7110_s1 = inlined_call_operand.vmem [shape: f32[9,8,4], index: 1, kind: input, shape index: {}]   ;;  %s7111_s2 = inlined_call_operand.vmem [shape: f32[8,1], index: 2, kind: input, shape index: {}]   ;;  %s7112_s3 = inlined_call_operand.vmem [shape: f32[9,8,8], index: 3, kind: input, shape index: {}]   ;;  %s7113_s4 = inlined_call_operand.vmem [shape: f32[8,1], index: 4, kind: input, shape index: {}]   ;;  %s7114_s5 = inlined_call_operand.vmem [shape: f32[9,16,8], index: 5, kind: input, shape index: {}]   ;;  %s7115_s6 = inlined_call_operand.vmem [shape: f32[16,1], index: 6, kind: input, shape index: {}]   ;;  %s7116_s7 = inlined_call_operand.vmem [shape: f32[9,16,16], index: 7, kind: input, shape index: {}]   ;;  %s7117_s8 = inlined_call_operand.vmem [shape: f32[16,1], index: 8, kind: input, shape index: {}]   ;;  %s7118_s9 = inlined_call_operand.vmem [shape: f32[9,8,16], index: 9, kind: input, shape index: {}]   ;;  %s7119_s10 = inlined_call_operand.vmem [shape: f32[8,1], index: 10, kind: input, shape index: {}]   ;;  %s7120_s11 = inlined_call_operand.vmem [shape: f32[9,8,8], index: 11, kind: input, shape index: {}]   ;;  %s7121_s12 = inlined_call_operand.vmem [shape: f32[9,8,8], index: 12, kind: input, shape index: {}]   ;;  %s7122_s13 = inlined_call_operand.vmem [shape: f32[8,1], index: 13, kind: input, shape index: {}]   ;;  %s7123_s14 = inlined_call_operand.vmem [shape: f32[9,8,8], index: 14, kind: input, shape index: {}]   ;;  %s7124_s15 = inlined_call_operand.vmem [shape: f32[8,1], index: 15, kind: input, shape index: {}]   ;;  %s7125_s16 = inlined_call_operand.hbm [shape: f32[2,8], index: 16, kind: input, shape index: {}]   ;;  %s7126_s17 = inlined_call_operand.vmem [shape: f32[2,1], index: 17, kind: input, shape index: {}]   ;;  %s7127_s18 = inlined_call_operand.vmem [shape: f32[9,1,256], index: 18, kind: input, shape index: {}]   ;;  %s7128_s19 = inlined_call_operand.vmem [shape: f32[9,1,128], index: 19, kind: input, shape index: {}]   ;;  %s7129_s20 = inlined_call_operand.vmem [shape: f32[256,128], index: 20, kind: input, shape index: {}]   ;;  %s7130_s21 = inlined_call_operand.vmem [shape: f32[128,256], index: 21, kind: input, shape index: {}]   ;;  %s7131_s22 = inlined_call_operand.hbm [shape: f32[2,2,256], index: 22, kind: output, shape index: {}]  }
   0x1   :  { %7176 = sst [smem:[#allocation17_spill]] %s7109_s0 }
   0x2   :  { %7177 = sst [smem:[#allocation18_spill]] %s7110_s1 }
   0x3   :  { %7178 = sst [smem:[#allocation19_spill]] %s7111_s2 }
   0x4   :  { %7179 = sst [smem:[#allocation20_spill]] %s7112_s3 }
   0x5   :  { %7180 = sst [smem:[#allocation21_spill]] %s7113_s4 }
   0x6   :  { %7181 = sst [smem:[#allocation22_spill]] %s7114_s5 }
   0x7   :  { %7182 = sst [smem:[#allocation23_spill]] %s7115_s6 }
   0x8   :  { %7183 = sst [smem:[#allocation24_spill]] %s7116_s7 }
   0x9   :  { %7184 = sst [smem:[#allocation25_spill]] %s7117_s8 }
   0xa   :  { %7185 = sst [smem:[#allocation26_spill]] %s7123_s14 }
   0xb   :  { %7186 = sst [smem:[#allocation27_spill]] %s7125_s16 }
   0xc   :  { %7187 = sst [smem:[#allocation28_spill]] %s7126_s17 }
   0xd   :  { %7188 = sst [smem:[#allocation29_spill]] %s7131_s22 }
   0xe   :  { %27 = vsyncpa [#allocation3], 0 }
   0xf   :  { %29 = vsyncpa [#allocation3 + $0x1], 0 }
  0x10   :  { %30 = vsyncpa [#allocation6], 0 }
  0x11   :  { %31 = vsyncpa [#allocation4], 0 }
  0x12   :  { %33 = vsyncpa [#allocation4 + $0x1], 0  ;;  %s5593_s3 = smov 0   ;;  %s5595_s28 = smov 0  }
  0x13   :  { %s5597_s29 = smov 0   ;;  %s5599_s30 = smov 0  }
  0x14 LB: > { %7189 = sst [smem:[#allocation11_spill]] %s5448_s3  ;;  %s5614_s4 = sadd.s32 4294967295, %s5460_s30   ;;  %s5460_s30 = sphi %s5599_s30, %s7234_s30   ;;  %s5456_s29 = sphi %s5597_s29, %s7236_s29   ;;  %s5452_s28 = sphi %s5595_s28, %s7238_s28   ;;  %s5448_s3 = sphi %s5593_s3, %s7237_s3  }
  0x15   : > { %7190 = sst [smem:[#allocation12_spill]] %s5456_s29  ;;  %s4966_s0 = sadd.s32 4294967294, %s5460_s30  }
  0x16   : > { %p59_p0 = scmp.ne.s32.totalorder %s5452_s28, %s5448_s3  ;;  %p60_p1 = scmp.eq.s32.totalorder %s5614_s4, 0 }
  0x17   : > { %p524_p2 = scmp.eq.s32.totalorder %s5614_s4, 1  ;;  %p530_p3 = scmp.eq.s32.totalorder %s4966_s0, 1 }
  0x18   : > { %p5623_p4 = por %p60_p1, %p59_p0  ;;  %p4967_p5 = scmp.ge.s32.totalorder %s5460_s30, 1 }
  0x19   : > { %p5628_p6 = por %p530_p3, %p59_p0  ;;  %p537_p7 = scmp.lt.s32.totalorder %s5460_s30, 3 }
  0x1a   : > { %s7194_s16 = sld [smem:[#allocation27_spill]]  ;;  %s5462_s26 = smov [#allocation5]  }
  0x1b   : > { %s7192_s1 = scalar_select %p5628_p6, 1, 0 }
  0x1c   : > { %p5636_p8 = pnand %p4967_p5, %p537_p7  ;;  %s596_s2 = sshll.u32 %s5462_s26, 4  ;;  %s597_s2 = int_to_ptr.vmem [resolvable:$true] %s596_s2 }
  0x1d   : > { %7193 = sst [smem:[#allocation13_spill]] %s7192_s1  ;;  %s5646_s27 = sadd.s32 1, %s5460_s30  }
  0x1e   : > { %p5250_p10 = pneg %p5636_p8  ;;  %7196 = sst [smem:[#allocation14_spill]] %s5646_s27 }
  0x1f   : > { %s46_s0 = sadd.s32 1, %s5456_s29  ;;  %s43_s5 = ssub.s32 %s5460_s30, %s5646_s27 }
  0x20   : > { %s594_s6 = sshll.u32 %s7194_s16, 4  ;;  %p5251_p11 = pnand %p5250_p10, %p60_p1  ;;  %s595_s6 = int_to_ptr.hbm [resolvable:$true] %s594_s6 }
  0x21   : > { %p44_p12 = scmp.eq.s32.totalorder %s43_s5, 0  ;;  %p53_p13 = scmp.ne.s32.totalorder %s5456_s29, %s5452_s28 }
  0x22   : > { %5253 = dma.hbm_to_vmem [thread:$0]  (!%p5251_p11), %s595_s6, 32, %s597_s2, [#allocation6]  }
  0x23   : > { %p54_p0 = scmp.eq.s32.totalorder %s5460_s30, 0  ;;  %p5659_p3 = por %p524_p2, %p53_p13 }
  0x24   : > { %s5655_s24 = scalar_select %p44_p12, %s5456_s29, %s46_s0  }
  0x25   : > { %s7198_s16 = scalar_select %p5659_p3, 1, 0 }
  0x26   : > { %7197 = sst [smem:[#allocation15_spill]] %s5655_s24  ;;  %p5263_p5 = scmp.lt.s32.totalorder %s5460_s30, 2 }
  0x27   : > { %7199 = sst [smem:[#allocation16_spill]] %s7198_s16  ;;  %s622_s26 = sand.u32 1, %s5456_s29  }
  0x28   : > { %s5240_s1 = sshll.u32 %s5460_s30, 3  ;;  %p55_p7 = por %p54_p0, %p53_p13 }
  0x29   : > { %s4970_s3 = sshll.u32 %s622_s26, 3  ;;  %s7200_s17 = sld [smem:[#allocation17_spill]] }
  0x2a   : > { %s626_s2 = scalar_lea.vmem [#allocation2], %s4970_s3  ;;  %p5669_p10 = pnand %p5263_p5, %p55_p7 }
  0x2b   : > { %s635_s5 = sshll.u32 %s626_s2, 4  ;;  %s623_s24 = scalar_lea.sflag [#allocation3], %s622_s26  ;;  %s636_s5 = int_to_ptr.vmem [resolvable:$true] %s635_s5 }
  0x2c   : > { %p5364_p11 = pneg %p5669_p10 }
  0x2f   : > { %s631_s27 = scalar_lea.hbm %s7200_s17, %s5240_s1  ;;  %s5367_s3 = scalar_lea.hbm %s7200_s17, 16 }
  0x30   : > { %s633_s6 = sshll.u32 %s631_s27, 4  ;;  %s634_s6 = int_to_ptr.hbm [resolvable:$true] %s633_s6 }
  0x31   : > { %s5360_s16 = sshra.s32 %s634_s6, 4  ;;  %s5361_s16 = int_to_ptr.hbm [resolvable:$true] %s5360_s16 }
  0x32   : > { %s5362_s29 = scalar_lea.hbm %s5361_s16, 8  ;;  %p5368_p0 = scmp.lt.s32.totalorder %s5361_s16, %s7200_s17 }
  0x33   : > { %p5363_p2 = scmp.ne.s32.totalorder %s5361_s16, %s5362_s29  ;;  %p5369_p5 = scmp.lt.s32.totalorder %s5367_s3, %s5362_s29 }
  0x35   : > { %p5365_p12 = pnand %p5364_p11, %p5363_p2  ;;  %p5370_p7 = por %p5369_p5, %p5368_p0 }
  0x37   : > { %p5366_p13 = pneg %p5365_p12 }
  0x39   : > { %p5371_p9 = pnand %p5370_p7, %p5366_p13 }
  0x3b   : > { %5374 = shalt.err (!%p5371_p9)
}
  0x3c   : > { %5257 = dma.hbm_to_vmem [thread:$0]  (!%p5669_p10), %s634_s6, 128, %s636_s5, %s623_s24  }
  0x3d   : > { %644 = sbr.rel (%p5636_p8) target bundleno = 2844 (0xb1c), region = 108  ;;  %s5686_s26 = sand.u32 (!%p5636_p8), 1, %s5452_s28  }
  0x3e   : > { %s4974_s2 = sshll.u32 (!%p5636_p8), %s5686_s26, 3  ;;  %s647_s14 = scalar_lea.sflag (!%p5636_p8), [#allocation3], %s5686_s26 }
  0x3f   : > { %s650_s22 = scalar_lea.vmem (!%p5636_p8), [#allocation2], %s4974_s2 }
  0x42   : > { %5435 = dma.done.wait (%p5623_p4), %s647_s14, 128  }
  0x43   : > { %5437 = vsyncadd (%p5623_p4), %s647_s14, 4294967168 }
  0x44   : > { %5439 = dma.done.wait (%p60_p1), [#allocation6], 32  }
  0x45   : > { %5441 = vsyncadd (%p60_p1), [#allocation6], 4294967264  ;;  %v717_v0 = vld [vmem:[%s650_s22] sm:$0xff]  ;;  %s7154_s16 = smov 17   ;;  %s7156_s29 = smov 16   ;;  %v735_v20 = vlaneseq  ;;  %vm752_vm2 = vcmask 1043456  }
  0x46   : > { %726 = vst [vmem:[#allocation1] ss:$2 sm:$0xff] %v717_v0  ;;  %s7152_s23 = smov 15   ;;  %s7170_s25 = smov 1   ;;  %v724_v23 = vld [vmem:[%s7127_s18] sm:$0x3] }
  0x47   : > { %s7158_s24 = smov 127   ;;  %s7150_s6 = smov 113   ;;  %v5714_v22 = vand.u32 127, %v735_v20  ;;  %v4987_v24 = vld [vmem:[%s7127_s18 + $0x4] sm:$0x3]  ;;  %v5724_v26 = vperm.slane %v724_v23, 0 }
  0x48   : > { %s7146_s5 = smov 112   ;;  %s7148_s0 = smov 111   ;;  %v5726_v27 = vperm.slane %v724_v23, 1  ;;  %v5728_v28 = vperm.slane %v4987_v24, 0  ;;  %v5730_v29 = vperm.slane %v4987_v24, 1  ;;  %vm748_vm3 = vcmask 31744  }
  0x49   : > { %vm886_vm0 = vcmp.lt.s32.totalorder %v5714_v22, 15  ;;  %vm737_vm1 = vcmp.lt.s32.totalorder %v5714_v22, 17  ;;  %s7202_s3 = sld [smem:[#allocation18_spill]]  ;;  %v4981_v41 = vld [vmem:[%s7127_s18 + $0x2] sm:$0x3]  ;;  %vm812_vm4 = vcmp.lt.s32.totalorder %v5714_v22, 16 }
  0x4a   : > { %v5755_v42 = vperm.slane %v4981_v41, 0  ;;  %v5757_v43 = vperm.slane %v4981_v41, 1  ;;  %v5471_v46 = vmov 0   ;;  %v4993_v52 = vld [vmem:[%s7127_s18 + $0x6] sm:$0x3]  ;;  %vm960_vm5 = vcmp.lt.s32.totalorder %v5714_v22, 1 }
  0x4b   : > { %5314 = vset.pattern.permute.xlu1 %v5471_v46  ;;  %5315 = vset.pattern.permute.xlu0 %v5471_v46  ;;  %v5786_v54 = vperm.slane %v4993_v52, 0  ;;  %v5788_v55 = vperm.slane %v4993_v52, 1  ;;  %vm1088_vm6 = vcmp.lt.s32.totalorder %v5714_v22, 127  ;;  %vm1162_vm7 = vcmp.lt.s32.totalorder %v5714_v22, 113  ;;  %v5016_v20 = vld [vmem:[%s7127_s18 + $0xe] sm:$0x3] }
  0x4c   : > { %5321 = vset.pattern.permute.xlu2 %v5471_v46  ;;  %vm1236_vm8 = vcmp.lt.s32.totalorder %v5714_v22, 112  ;;  %v5858_v23 = vperm.slane %v5016_v20, 1  ;;  %vm1310_vm9 = vcmp.lt.s32.totalorder %v5714_v22, 111  ;;  %s7205_s2 = smov 112   ;;  %vm1390_vm10 = vcmask 64512   ;;  %s7207_s14 = sld [smem:[#allocation20_spill]] }
  0x4d   : > { %v727_v1 = vld.sshfl [vmem:[#allocation1] sm:$0xff pattern:$0x75316420]  ;;  %v728_v2 = vld.sshfl [vmem:[#allocation1 + $0x8] sm:$0xff pattern:$0x75316420] }
  0x4e   : > { %731 = vrot.lane.b32.xlu0 %v727_v1, %s7154_s16  ;;  %803 = vst [vmem:[#allocation1] ss:$2 sm:$0xff] %v717_v0  ;;  %s7172_s27 = smov 119   ;;  %s7218_s8 = sld [smem:[#allocation25_spill]]  ;;  %vm2360_vm11 = vcmask 130048   ;;  %vm4865_vm12 = vcmask 1041408  }
  0x4f   : > { %s7203_s1 = smov %s7202_s3  ;;  %v747_v38 = vld [vmem:[%s7202_s3] sm:$0xff]  ;;  %s7204_s3 = sld [smem:[#allocation19_spill]] }
  0x50   : > { %v4982_v51 = vld [vmem:[%s7203_s1 + $0x8] sm:$0xff]  ;;  %v4988_v53 = vld [vmem:[%s7203_s1 + $0x10] sm:$0xff]  ;;  %v4994_v62 = vld [vmem:[%s7203_s1 + $0x18] sm:$0xff]  ;;  %s7220_s7 = sld [smem:[#allocation24_spill]]  ;;  %s7225_s22 = smov 111  }
  0x51   : > { %v4999_v63 = vld [vmem:[%s7203_s1 + $0x20] sm:$0xff] }
  0x52   : > { %v5023_v46 = vld [vmem:[%s7203_s1 + $0x40] sm:$0xff] }
  0x55   : > { %v804_v3 = vld.sshfl [vmem:[#allocation1] sm:$0xff pattern:$0x75316420]  ;;  %v805_v4 = vld.sshfl [vmem:[#allocation1 + $0x8] sm:$0xff pattern:$0x75316420] }
  0x56   : > { %808 = vrot.lane.b32.xlu1 %v804_v3, %s7156_s29  ;;  %733 = vrot.lane.b32.xlu0 %v728_v2, %s7154_s16  ;;  %877 = vst [vmem:[#allocation1] ss:$2 sm:$0xff] %v717_v0  ;;  %v718_v44 = vld [vmem:[%s7204_s3] sm:$0xff]  ;;  %s7206_s3 = sld [smem:[#allocation21_spill]] }
  0x5d   : > { %v878_v5 = vld.sshfl [vmem:[#allocation1] sm:$0xff pattern:$0x75316420]  ;;  %v879_v6 = vld.sshfl [vmem:[#allocation1 + $0x8] sm:$0xff pattern:$0x75316420] }
  0x5e   : > { %810 = vrot.lane.b32.xlu1 %v805_v4, %s7156_s29  ;;  %951 = vst [vmem:[#allocation1] ss:$2 sm:$0xff] %v717_v0  ;;  %882 = vrot.lane.b32.xlu2 %v878_v5, %s7152_s23 }
  0x65   : > { %v953_v7 = vld.sshfl [vmem:[#allocation1 + $0x8] sm:$0xff pattern:$0x75316420]  ;;  %v952_v8 = vld.sshfl [vmem:[#allocation1] sm:$0xff pattern:$0x75316420] }
  0x66   : > { %958 = vrot.lane.b32.xlu1 %v953_v7, %s7170_s25  ;;  %956 = vrot.lane.b32.xlu0 %v952_v8, %s7170_s25  ;;  %1025 = vst [vmem:[#allocation1] ss:$2 sm:$0xff] %v717_v0 }
  0x67   : > { %884 = vrot.lane.b32.xlu2 %v879_v6, %s7152_s23 }
  0x6d   : > { %v1026_v9 = vld.sshfl [vmem:[#allocation1] sm:$0xff pattern:$0x75316420]  ;;  %v1027_v10 = vld.sshfl [vmem:[#allocation1 + $0x8] sm:$0xff pattern:$0x75316420] }
  0x6e   : > { %1079 = vst [vmem:[#allocation1] ss:$2 sm:$0xff] %v717_v0 }
  0x75   : > { %v1081_v11 = vld.sshfl [vmem:[#allocation1 + $0x8] sm:$0xff pattern:$0x75316420]  ;;  %v1080_v12 = vld.sshfl [vmem:[#allocation1] sm:$0xff pattern:$0x75316420] }
  0x76   : > { %1086 = vrot.lane.b32.xlu0 %v1081_v11, %s7158_s24  ;;  %1153 = vst [vmem:[#allocation1] ss:$2 sm:$0xff] %v717_v0  ;;  %1084 = vrot.lane.b32.xlu2 %v1080_v12, %s7158_s24 }
  0x7d   : > { %v1155_v13 = vld.sshfl [vmem:[#allocation1 + $0x8] sm:$0xff pattern:$0x75316420]  ;;  %v1154_v14 = vld.sshfl [vmem:[#allocation1] sm:$0xff pattern:$0x75316420] }
  0x7e   : > { %1158 = vrot.lane.b32.xlu1 %v1154_v14, %s7150_s6  ;;  %1227 = vst [vmem:[#allocation1] ss:$2 sm:$0xff] %v717_v0  ;;  %1160 = vrot.lane.b32.xlu2 %v1155_v13, %s7150_s6 }
  0x85   : > { %v1229_v15 = vld.sshfl [vmem:[#allocation1 + $0x8] sm:$0xff pattern:$0x75316420]  ;;  %v1228_v16 = vld.sshfl [vmem:[#allocation1] sm:$0xff pattern:$0x75316420] }
  0x86   : > { %1234 = vrot.lane.b32.xlu1 %v1229_v15, %s7146_s5  ;;  %1232 = vrot.lane.b32.xlu0 %v1228_v16, %s7146_s5  ;;  %1301 = vst [vmem:[#allocation1] ss:$2 sm:$0xff] %v717_v0  ;;  %v5004_v0 = vld [vmem:[%s7127_s18 + $0xa] sm:$0x3] }
  0x87   : > { %v5814_v2 = vperm.slane %v5004_v0, 0  ;;  %v5816_v3 = vperm.slane %v5004_v0, 1 }
  0x8d   : > { %v1303_v17 = vld.sshfl [vmem:[#allocation1 + $0x8] sm:$0xff pattern:$0x75316420]  ;;  %v1302_v18 = vld.sshfl [vmem:[#allocation1] sm:$0xff pattern:$0x75316420] }
  0x8e   : > { %1308 = vrot.lane.b32.xlu0 %v1303_v17, %s7148_s0  ;;  %1306 = vrot.lane.b32.xlu2 %v1302_v18, %s7148_s0 }
  0x8f   : > { %721 = vperm.xlu1 %5314, %v718_v44  }
  0xb8   : > { %v883_v19 = vpop.permute.xlu2 %882 }
  0xc0   : > { %v732_v21 = vpop.permute.xlu0 %731 }
  0xc1   : > { %v885_v25 = vpop.permute.xlu2 %884 }
  0xc2   : > { %v887_v30 = vsel %vm886_vm0, %v883_v19, %v885_v25  ;;  %v888_v31 = vsel %vm886_vm0, %v885_v25, %v883_v19  ;;  %v5011_v19 = vld [vmem:[%s7203_s1 + $0x30] sm:$0xff] }
  0xc3   : > { %v894_v39 = vmul.f32 %v5728_v28, %v888_v31  ;;  %v895_v40 = vmul.f32 %v5730_v29, %v887_v30 }
  0xc8   : > { %v809_v32 = vpop.permute.xlu1 %808  ;;  %v734_v33 = vpop.permute.xlu0 %733 }
  0xc9   : > { %v738_v34 = vsel %vm737_vm1, %v732_v21, %v734_v33  ;;  %v739_v35 = vsel %vm737_vm1, %v734_v33, %v732_v21  ;;  %v5856_v21 = vperm.slane %v5016_v20, 0 }
  0xca   : > { %v745_v36 = vmul.f32 %v5724_v26, %v739_v35  ;;  %v746_v37 = vmul.f32 %v5726_v27, %v738_v34  ;;  %v5017_v34 = vld [vmem:[%s7203_s1 + $0x38] sm:$0xff]  ;;  %v5022_v35 = vld [vmem:[%s7127_s18 + $0x10] sm:$0x3] }
  0xcc   : > { %4977 = vmatpush.msk.msra.mxu0 %vm752_vm2, %v745_v36  ;;  %4979 = vmatpush.msk.msra.mxu1 %vm752_vm2, %v746_v37  ;;  %v5877_v36 = vperm.slane %v5022_v35, 0  ;;  %v5879_v37 = vperm.slane %v5022_v35, 1 }
  0xcd   : > { %4978 = vmatmul.msk.f32.vlgmr.msra.gmra.mxu0 %vm748_vm3, %v747_v38  ;;  %4980 = vmatmul.msk.f32.vlgmr.msra.gmra.mxu1 %vm748_vm3, %v747_v38 }
  0xce   : > { %4989 = vmatpush.msk.msrb.mxu0 %vm752_vm2, %v894_v39  ;;  %4991 = vmatpush.msk.msrb.mxu1 %vm752_vm2, %v895_v40 }
  0xd0   : > { %5000 = vmatpush.msk.msra.mxu0 %vm752_vm2, %v1026_v9  ;;  %5002 = vmatpush.msk.msra.mxu1 %vm752_vm2, %v1027_v10  ;;  %v811_v45 = vpop.permute.xlu1 %810  ;;  %v1085_v1 = vpop.permute.xlu2 %1084  ;;  %v5005_v9 = vld [vmem:[%s7203_s1 + $0x28] sm:$0xff]  ;;  %s7226_s1 = sld [smem:[#allocation28_spill]] }
  0xd1   : > { %v813_v47 = vsel %vm812_vm4, %v809_v32, %v811_v45  ;;  %v814_v48 = vsel %vm812_vm4, %v811_v45, %v809_v32  ;;  %v5010_v10 = vld [vmem:[%s7127_s18 + $0xc] sm:$0x3] }
  0xd2   : > { %v820_v49 = vmul.f32 %v5755_v42, %v814_v48  ;;  %v821_v50 = vmul.f32 %v5757_v43, %v813_v47  ;;  %v5835_v12 = vperm.slane %v5010_v10, 0  ;;  %v5837_v13 = vperm.slane %v5010_v10, 1 }
  0xd4   : > { %4983 = vmatpush.msk.msra.mxu2 %vm752_vm2, %v820_v49  ;;  %4985 = vmatpush.msk.msra.mxu3 %vm752_vm2, %v821_v50 }
  0xd5   : > { %4984 = vmatmul.msk.f32.vlgmr.msra.gmra.mxu2 %vm748_vm3, %v4982_v51  ;;  %4986 = vmatmul.msk.f32.vlgmr.msra.gmra.mxu3 %vm748_vm3, %v4982_v51 }
  0xd6   : > { %4990 = vmatmul.msk.f32.vlgmr.msrb.gmra.mxu0 %vm748_vm3, %v4988_v53  ;;  %4992 = vmatmul.msk.f32.vlgmr.msrb.gmra.mxu1 %vm748_vm3, %v4988_v53 }
  0xd8   : > { %v959_v56 = vpop.permute.xlu1 %958  ;;  %v957_v57 = vpop.permute.xlu0 %956 }
  0xd9   : > { %v961_v58 = vsel %vm960_vm5, %v957_v57, %v959_v56  ;;  %v962_v59 = vsel %vm960_vm5, %v959_v56, %v957_v57  ;;  %v1161_v11 = vpop.permute.xlu2 %1160 }
  0xda   : > { %v968_v60 = vmul.f32 %v5786_v54, %v962_v59  ;;  %v969_v61 = vmul.f32 %v5788_v55, %v961_v58 }
  0xdc   : > { %4995 = vmatpush.msk.msrb.mxu2 %vm752_vm2, %v968_v60  ;;  %4997 = vmatpush.msk.msrb.mxu3 %vm752_vm2, %v969_v61 }
  0xdd   : > { %4996 = vmatmul.msk.f32.vlgmr.msrb.gmra.mxu2 %vm748_vm3, %v4994_v62  ;;  %4998 = vmatmul.msk.f32.vlgmr.msrb.gmra.mxu3 %vm748_vm3, %v4994_v62 }
  0xde   : > { %5001 = vmatmul.msk.f32.vlgmr.msra.gmra.mxu0 %vm748_vm3, %v4999_v63  ;;  %5003 = vmatmul.msk.f32.vlgmr.msra.gmra.mxu1 %vm748_vm3, %v4999_v63 }
  0xe8   : > { %v1087_v4 = vpop.permute.xlu0 %1086  ;;  %v1307_v38 = vpop.permute.xlu2 %1306 }
  0xe9   : > { %v1089_v5 = vsel %vm1088_vm6, %v1085_v1, %v1087_v4  ;;  %v1090_v6 = vsel %vm1088_vm6, %v1087_v4, %v1085_v1 }
  0xea   : > { %v1096_v7 = vmul.f32 %v5814_v2, %v1089_v5  ;;  %v1097_v8 = vmul.f32 %v5816_v3, %v1090_v6 }
  0xec   : > { %5006 = vmatpush.msk.msra.mxu2 %vm752_vm2, %v1096_v7  ;;  %5008 = vmatpush.msk.msra.mxu3 %vm752_vm2, %v1097_v8 }
  0xed   : > { %5007 = vmatmul.msk.f32.vlgmr.msra.gmra.mxu2 %vm748_vm3, %v5005_v9  ;;  %5009 = vmatmul.msk.f32.vlgmr.msra.gmra.mxu3 %vm748_vm3, %v5005_v9 }
  0xf0   : > { %v1159_v14 = vpop.permute.xlu1 %1158 }
  0xf1   : > { %v1163_v15 = vsel %vm1162_vm7, %v1159_v14, %v1161_v11  ;;  %v1164_v16 = vsel %vm1162_vm7, %v1161_v11, %v1159_v14 }
  0xf2   : > { %v1170_v17 = vmul.f32 %v5835_v12, %v1163_v15  ;;  %v1171_v18 = vmul.f32 %v5837_v13, %v1164_v16 }
  0xf4   : > { %5012 = vmatpush.msk.msrb.mxu0 %vm752_vm2, %v1170_v17  ;;  %5014 = vmatpush.msk.msrb.mxu1 %vm752_vm2, %v1171_v18 }
  0xf5   : > { %5013 = vmatmul.msk.f32.vlgmr.msrb.gmra.mxu0 %vm748_vm3, %v5011_v19  ;;  %5015 = vmatmul.msk.f32.vlgmr.msrb.gmra.mxu1 %vm748_vm3, %v5011_v19 }
  0xf8   : > { %v1235_v24 = vpop.permute.xlu1 %1234  ;;  %v1233_v25 = vpop.permute.xlu0 %1232 }
  0xf9   : > { %v1237_v30 = vsel %vm1236_vm8, %v1233_v25, %v1235_v24  ;;  %v1238_v31 = vsel %vm1236_vm8, %v1235_v24, %v1233_v25 }
  0xfa   : > { %v1244_v32 = vmul.f32 %v5856_v21, %v1237_v30  ;;  %v1245_v33 = vmul.f32 %v5858_v23, %v1238_v31 }
  0xfc   : > { %5018 = vmatpush.msk.msrb.mxu2 %vm752_vm2, %v1244_v32  ;;  %5020 = vmatpush.msk.msrb.mxu3 %vm752_vm2, %v1245_v33 }
  0xfd   : > { %5019 = vmatmul.msk.f32.vlgmr.msrb.gmra.mxu2 %vm748_vm3, %v5017_v34  ;;  %5021 = vmatmul.msk.f32.vlgmr.msrb.gmra.mxu3 %vm748_vm3, %v5017_v34 }
 0x100   : > { %v1309_v39 = vpop.permute.xlu0 %1308 }
 0x101   : > { %v1311_v40 = vsel %vm1310_vm9, %v1307_v38, %v1309_v39  ;;  %v1312_v41 = vsel %vm1310_vm9, %v1309_v39, %v1307_v38  ;;  %v722_v51 = vpop.permute.xlu1 %721  ;;  %v1375_v39 = vld [vmem:[%s7206_s3] sm:$0xff]  ;;  %s7208_s3 = sld [smem:[#allocation23_spill]] }
 0x102   : > { %v1318_v44 = vmul.f32 %v5877_v36, %v1311_v40  ;;  %v1319_v45 = vmul.f32 %v5879_v37, %v1312_v41 }
 0x104   : > { %5024 = vmatpush.msk.msra.mxu0 %vm752_vm2, %v1318_v44  ;;  %5026 = vmatpush.msk.msra.mxu1 %vm752_vm2, %v1319_v45 }
 0x105   : > { %5025 = vmatmul.msk.f32.vlgmr.msra.gmra.mxu0 %vm748_vm3, %v5023_v46  ;;  %5027 = vmatmul.msk.f32.vlgmr.msra.gmra.mxu1 %vm748_vm3, %v5023_v46 }
 0x107   : > { %s7209_s5 = smov %s7208_s3 }
 0x14a   : > { %v776_v47 = vpop.f32.mrf.mxu0  ;;  %v796_v48 = vpop.f32.mrf.mxu1 }
 0x14b   : > { %v799_v56 = vadd.f32 %v776_v47, %v722_v51  ;;  %v800_v57 = vadd.f32 %v796_v48, %v722_v51 }
 0x153   : > { %v924_v52 = vpop.f32.mrf.mxu0  ;;  %v944_v53 = vpop.f32.mrf.mxu1 }
 0x158   : > { %v850_v49 = vpop.f32.mrf.mxu2  ;;  %v870_v50 = vpop.f32.mrf.mxu3 }
 0x159   : > { %v873_v58 = vadd.f32 %v850_v49, %v799_v56  ;;  %v874_v59 = vadd.f32 %v870_v50, %v800_v57 }
 0x15b   : > { %v947_v62 = vadd.f32 %v924_v52, %v873_v58  ;;  %v1052_v63 = vpop.f32.mrf.mxu0  ;;  %v1072_v0 = vpop.f32.mrf.mxu1  ;;  %v948_v1 = vadd.f32 %v944_v53, %v874_v59  ;;  %v1389_v53 = vld [vmem:[%s7207_s14] sm:$0xff] }
 0x160   : > { %v998_v60 = vpop.f32.mrf.mxu2  ;;  %v1018_v61 = vpop.f32.mrf.mxu3 }
 0x161   : > { %v1021_v4 = vadd.f32 %v998_v60, %v947_v62  ;;  %v1022_v5 = vadd.f32 %v1018_v61, %v948_v1  ;;  %v5030_v62 = vld [vmem:[%s7207_s14 + $0x8] sm:$0xff] }
 0x163   : > { %v1075_v6 = vadd.f32 %v1052_v63, %v1021_v4  ;;  %v1076_v9 = vadd.f32 %v1072_v0, %v1022_v5  ;;  %v5033_v63 = vld [vmem:[%s7207_s14 + $0x10] sm:$0xff] }
 0x170   : > { %v1126_v7 = vpop.f32.mrf.mxu2  ;;  %v1146_v8 = vpop.f32.mrf.mxu3 }
 0x171   : > { %v1149_v14 = vadd.f32 %v1126_v7, %v1075_v6  ;;  %v1150_v15 = vadd.f32 %v1146_v8, %v1076_v9 }
 0x172   : > { %v1200_v10 = vpop.f32.mrf.mxu0  ;;  %v1220_v11 = vpop.f32.mrf.mxu1 }
 0x173   : > { %v1223_v16 = vadd.f32 %v1200_v10, %v1149_v14  ;;  %v1224_v17 = vadd.f32 %v1220_v11, %v1150_v15  ;;  %v5036_v15 = vld [vmem:[%s7207_s14 + $0x18] sm:$0xff] }
 0x180   : > { %v1274_v18 = vpop.f32.mrf.mxu2  ;;  %v1294_v19 = vpop.f32.mrf.mxu3 }
 0x181   : > { %v1297_v20 = vadd.f32 %v1274_v18, %v1223_v16  ;;  %v1298_v24 = vadd.f32 %v1294_v19, %v1224_v17  ;;  %v5039_v16 = vld [vmem:[%s7207_s14 + $0x20] sm:$0xff] }
 0x182   : > { %v1348_v25 = vpop.f32.mrf.mxu0  ;;  %v1368_v30 = vpop.f32.mrf.mxu1 }
 0x183   : > { %v1371_v31 = vadd.f32 %v1348_v25, %v1297_v20  ;;  %v1372_v32 = vadd.f32 %v1368_v30, %v1298_v24 }
 0x185   : > { %v1373_v33 = vmax.f32 %v1371_v31, 0.0  ;;  %v1374_v34 = vmax.f32 %v1372_v32, 0.0  ;;  %v5042_v31 = vld [vmem:[%s7207_s14 + $0x28] sm:$0xff]  ;;  %v5045_v32 = vld [vmem:[%s7207_s14 + $0x30] sm:$0xff] }
 0x187   : > { %1383 = vrot.lane.b32.xlu0 %v1374_v34, %s7154_s16  ;;  %1491 = vrot.lane.b32.xlu1 %v1373_v33, %s7152_s23 }
 0x188   : > { %1381 = vrot.lane.b32.xlu2 %v1373_v33, %s7154_s16  ;;  %s7164_s16 = smov 9  }
 0x18f   : > { %1436 = vrot.lane.b32.xlu0 %v1373_v33, %s7156_s29  ;;  %1438 = vrot.lane.b32.xlu1 %v1374_v34, %s7156_s29  ;;  %s7168_s29 = smov 121  }
 0x190   : > { %1493 = vrot.lane.b32.xlu2 %v1374_v34, %s7152_s23  ;;  %s7166_s23 = smov 120  }
 0x197   : > { %1548 = vrot.lane.b32.xlu0 %v1374_v34, %s7170_s25  ;;  %1703 = vrot.lane.b32.xlu1 %v1373_v33, %s7150_s6 }
 0x198   : > { %1546 = vrot.lane.b32.xlu2 %v1373_v33, %s7170_s25 }
 0x19f   : > { %1648 = vrot.lane.b32.xlu0 %v1373_v33, %s7158_s24  ;;  %1650 = vrot.lane.b32.xlu1 %v1374_v34, %s7158_s24 }
 0x1a0   : > { %1705 = vrot.lane.b32.xlu2 %v1374_v34, %s7150_s6  ;;  %s7162_s6 = smov 7  }
 0x1a7   : > { %1815 = vrot.lane.b32.xlu0 %v1374_v34, %s7148_s0  ;;  %1758 = vrot.lane.b32.xlu1 %v1373_v33, %s7205_s2 }
 0x1a8   : > { %1813 = vrot.lane.b32.xlu2 %v1373_v33, %s7148_s0  ;;  %s7160_s0 = smov 8  }
 0x1af   : > { %1378 = vperm.xlu0 %5315, %v1375_v39  }
 0x1b0   : > { %1760 = vrot.lane.b32.xlu2 %v1374_v34, %s7205_s2 }
 0x1e2   : > { %v1382_v35 = vpop.permute.xlu2 %1381 }
 0x1ea   : > { %v1494_v38 = vpop.permute.xlu2 %1493 }
 0x1f2   : > { %v1547_v44 = vpop.permute.xlu2 %1546 }
 0x1f9   : > { %v1384_v40 = vpop.permute.xlu0 %1383  ;;  %v1492_v41 = vpop.permute.xlu1 %1491 }
 0x1fa   : > { %v1385_v45 = vsel %vm737_vm1, %v1382_v35, %v1384_v40  ;;  %v1386_v46 = vsel %vm737_vm1, %v1384_v40, %v1382_v35  ;;  %v1495_v47 = vsel %vm886_vm0, %v1492_v41, %v1494_v38  ;;  %v1496_v48 = vsel %vm886_vm0, %v1494_v38, %v1492_v41  ;;  %v1706_v0 = vpop.permute.xlu2 %1705 }
 0x1fb   : > { %v1387_v49 = vmul.f32 %v1386_v46, %v5724_v26  ;;  %v1388_v50 = vmul.f32 %v1385_v45, %v5726_v27  ;;  %v1497_v51 = vmul.f32 %v1496_v48, %v5728_v28  ;;  %v1498_v52 = vmul.f32 %v1495_v47, %v5730_v29  ;;  %v5048_v48 = vld [vmem:[%s7207_s14 + $0x38] sm:$0xff] }
 0x1fd   : > { %1409 = vmatpush.msra.mxu2 %v1387_v49  ;;  %1429 = vmatpush.msra.mxu3 %v1388_v50  ;;  %v5051_v49 = vld [vmem:[%s7207_s14 + $0x40] sm:$0xff] }
 0x1fe   : > { %5028 = vmatmul.msk.f32.vlgmr.msra.gmra.mxu2 %vm1390_vm10, %v1389_v53  ;;  %5029 = vmatmul.msk.f32.vlgmr.msra.gmra.mxu3 %vm1390_vm10, %v1389_v53 }
 0x1ff   : > { %1519 = vmatpush.msrb.mxu2 %v1497_v51  ;;  %1539 = vmatpush.msrb.mxu3 %v1498_v52 }
 0x201   : > { %1621 = vmatpush.msra.mxu2 %v1373_v33  ;;  %1641 = vmatpush.msra.mxu3 %v1374_v34  ;;  %v1437_v56 = vpop.permute.xlu0 %1436  ;;  %v1439_v57 = vpop.permute.xlu1 %1438 }
 0x202   : > { %v1440_v58 = vsel %vm812_vm4, %v1437_v56, %v1439_v57  ;;  %v1441_v59 = vsel %vm812_vm4, %v1439_v57, %v1437_v56  ;;  %v1814_v17 = vpop.permute.xlu2 %1813 }
 0x203   : > { %v1442_v60 = vmul.f32 %v1441_v59, %v5755_v42  ;;  %v1443_v61 = vmul.f32 %v1440_v58, %v5757_v43 }
 0x205   : > { %1464 = vmatpush.msrb.mxu0 %v1442_v60  ;;  %1484 = vmatpush.msrb.mxu1 %v1443_v61 }
 0x206   : > { %5031 = vmatmul.msk.f32.vlgmr.msrb.gmra.mxu0 %vm1390_vm10, %v5030_v62  ;;  %5034 = vmatmul.msk.f32.vlgmr.msrb.gmra.mxu2 %vm1390_vm10, %v5033_v63 }
 0x207   : > { %5035 = vmatmul.msk.f32.vlgmr.msrb.gmra.mxu3 %vm1390_vm10, %v5033_v63  ;;  %5032 = vmatmul.msk.f32.vlgmr.msrb.gmra.mxu1 %vm1390_vm10, %v5030_v62 }
 0x209   : > { %v1549_v1 = vpop.permute.xlu0 %1548  ;;  %v1704_v4 = vpop.permute.xlu1 %1703 }
 0x20a   : > { %v1550_v5 = vsel %vm960_vm5, %v1547_v44, %v1549_v1  ;;  %v1551_v6 = vsel %vm960_vm5, %v1549_v1, %v1547_v44  ;;  %v1707_v7 = vsel %vm1162_vm7, %v1704_v4, %v1706_v0  ;;  %v1708_v8 = vsel %vm1162_vm7, %v1706_v0, %v1704_v4  ;;  %v1761_v33 = vpop.permute.xlu2 %1760 }
 0x20b   : > { %v1552_v9 = vmul.f32 %v1551_v6, %v5786_v54  ;;  %v1553_v10 = vmul.f32 %v1550_v5, %v5788_v55  ;;  %v1709_v11 = vmul.f32 %v1707_v7, %v5835_v12  ;;  %v1710_v14 = vmul.f32 %v1708_v8, %v5837_v13 }
 0x20d   : > { %1574 = vmatpush.msra.mxu0 %v1552_v9  ;;  %1594 = vmatpush.msra.mxu1 %v1553_v10 }
 0x20e   : > { %1731 = vmatpush.msrb.mxu2 %v1709_v11  ;;  %1751 = vmatpush.msrb.mxu3 %v1710_v14 }
 0x20f   : > { %5037 = vmatmul.msk.f32.vlgmr.msra.gmra.mxu0 %vm1390_vm10, %v5036_v15  ;;  %5040 = vmatmul.msk.f32.vlgmr.msra.gmra.mxu2 %vm1390_vm10, %v5039_v16 }
 0x210   : > { %5041 = vmatmul.msk.f32.vlgmr.msra.gmra.mxu3 %vm1390_vm10, %v5039_v16  ;;  %5038 = vmatmul.msk.f32.vlgmr.msra.gmra.mxu1 %vm1390_vm10, %v5036_v15 }
 0x211   : > { %v1649_v18 = vpop.permute.xlu0 %1648  ;;  %v1651_v19 = vpop.permute.xlu1 %1650 }
 0x212   : > { %v1652_v20 = vsel %vm1088_vm6, %v1649_v18, %v1651_v19  ;;  %v1653_v24 = vsel %vm1088_vm6, %v1651_v19, %v1649_v18 }
 0x213   : > { %v1654_v25 = vmul.f32 %v1652_v20, %v5814_v2  ;;  %v1655_v30 = vmul.f32 %v1653_v24, %v5816_v3 }
 0x215   : > { %1676 = vmatpush.msrb.mxu0 %v1654_v25  ;;  %1696 = vmatpush.msrb.mxu1 %v1655_v30 }
 0x217   : > { %5043 = vmatmul.msk.f32.vlgmr.msrb.gmra.mxu0 %vm1390_vm10, %v5042_v31  ;;  %5046 = vmatmul.msk.f32.vlgmr.msrb.gmra.mxu2 %vm1390_vm10, %v5045_v32 }
 0x218   : > { %5047 = vmatmul.msk.f32.vlgmr.msrb.gmra.mxu3 %vm1390_vm10, %v5045_v32  ;;  %5044 = vmatmul.msk.f32.vlgmr.msrb.gmra.mxu1 %vm1390_vm10, %v5042_v31 }
 0x219   : > { %v1816_v34 = vpop.permute.xlu0 %1815  ;;  %v1759_v35 = vpop.permute.xlu1 %1758 }
 0x21a   : > { %v1817_v38 = vsel %vm1310_vm9, %v1814_v17, %v1816_v34  ;;  %v1818_v39 = vsel %vm1310_vm9, %v1816_v34, %v1814_v17  ;;  %v1762_v40 = vsel %vm1236_vm8, %v1759_v35, %v1761_v33  ;;  %v1763_v41 = vsel %vm1236_vm8, %v1761_v33, %v1759_v35 }
 0x21b   : > { %v1819_v44 = vmul.f32 %v1817_v38, %v5877_v36  ;;  %v1820_v45 = vmul.f32 %v1818_v39, %v5879_v37  ;;  %v1764_v46 = vmul.f32 %v1762_v40, %v5856_v21  ;;  %v1765_v47 = vmul.f32 %v1763_v41, %v5858_v23  ;;  %v1901_v40 = vld [vmem:[%s7129_s20 + $0x78] sm:$0xff] }
 0x21c   : > { %v1917_v41 = vld [vmem:[%s7129_s20 + $0xf8] sm:$0xff] }
 0x21d   : > { %1786 = vmatpush.msra.mxu0 %v1764_v46  ;;  %1806 = vmatpush.msra.mxu1 %v1765_v47  ;;  %v1899_v46 = vld [vmem:[%s7129_s20 + $0x68] sm:$0xff] }
 0x21e   : > { %1841 = vmatpush.msra.mxu2 %v1819_v44  ;;  %1861 = vmatpush.msra.mxu3 %v1820_v45  ;;  %v1900_v44 = vld [vmem:[%s7129_s20 + $0x70] sm:$0xff]  ;;  %v1915_v47 = vld [vmem:[%s7129_s20 + $0xe8] sm:$0xff] }
 0x21f   : > { %5049 = vmatmul.msk.f32.vlgmr.msra.gmra.mxu0 %vm1390_vm10, %v5048_v48  ;;  %5052 = vmatmul.msk.f32.vlgmr.msra.gmra.mxu2 %vm1390_vm10, %v5051_v49  ;;  %v1916_v45 = vld [vmem:[%s7129_s20 + $0xf0] sm:$0xff] }
 0x220   : > { %5053 = vmatmul.msk.f32.vlgmr.msra.gmra.mxu3 %vm1390_vm10, %v5051_v49  ;;  %5050 = vmatmul.msk.f32.vlgmr.msra.gmra.mxu1 %vm1390_vm10, %v5048_v48  ;;  %v1898_v48 = vld [vmem:[%s7129_s20 + $0x60] sm:$0xff] }
 0x221   : > { %v1379_v52 = vpop.permute.xlu0 %1378  ;;  %1918 = vmatpush.msrb.mxu0 %v1901_v40  ;;  %1938 = vmatpush.msrb.mxu1 %v1917_v41  ;;  %v1914_v49 = vld [vmem:[%s7129_s20 + $0xe0] sm:$0xff] }
 0x223   : > { %1919 = vmatpush.msrb.mxu0 %v1900_v44  ;;  %1939 = vmatpush.msrb.mxu1 %v1916_v45 }
 0x225   : > { %1920 = vmatpush.msrb.mxu0 %v1899_v46  ;;  %1940 = vmatpush.msrb.mxu1 %v1915_v47  ;;  %v1959_v46 = vld [vmem:[%s7208_s3 + $0x8] sm:$0xff]  ;;  %v6141_v47 = vld [vmem:[%s7128_s19] ss:$0 sm:$0xff]  ;;  %s7217_s3 = smov 120  }
 0x227   : > { %1921 = vmatpush.msrb.mxu0 %v1898_v48  ;;  %1941 = vmatpush.msrb.mxu1 %v1914_v49 }
 0x281   : > { %v1411_v50 = vpop.f32.mrf.mxu2  ;;  %v1431_v51 = vpop.f32.mrf.mxu3 }
 0x282   : > { %v1435_v56 = vadd.f32 %v1431_v51, %v1379_v52  ;;  %v1434_v61 = vadd.f32 %v1411_v50, %v1379_v52  ;;  %v1897_v50 = vld [vmem:[%s7129_s20 + $0x58] sm:$0xff]  ;;  %v1896_v52 = vld [vmem:[%s7129_s20 + $0x50] sm:$0xff] }
 0x283   : > { %v1466_v53 = vpop.f32.mrf.mxu0  ;;  %v1913_v51 = vld [vmem:[%s7129_s20 + $0xd8] sm:$0xff]  ;;  %1922 = vmatpush.msrb.mxu0 %v1897_v50 }
 0x284   : > { %v1486_v57 = vpop.f32.mrf.mxu1  ;;  %v1489_v1 = vadd.f32 %v1466_v53, %v1434_v61  ;;  %v1912_v53 = vld [vmem:[%s7129_s20 + $0xd0] sm:$0xff]  ;;  %1942 = vmatpush.msrb.mxu1 %v1913_v51  ;;  %v1909_v61 = vld [vmem:[%s7129_s20 + $0xb8] sm:$0xff] }
 0x285   : > { %v1490_v58 = vadd.f32 %v1486_v57, %v1435_v56  ;;  %v1895_v56 = vld [vmem:[%s7129_s20 + $0x48] sm:$0xff]  ;;  %1923 = vmatpush.msrb.mxu0 %v1896_v52 }
 0x286   : > { %v1911_v57 = vld [vmem:[%s7129_s20 + $0xc8] sm:$0xff]  ;;  %1943 = vmatpush.msrb.mxu1 %v1912_v53  ;;  %v6155_v53 = vld [vmem:[%s7128_s19 + $0x5] ss:$0 sm:$0xff] }
 0x287   : > { %1924 = vmatpush.msrb.mxu0 %v1895_v56 }
 0x288   : > { %1944 = vmatpush.msrb.mxu1 %v1911_v57 }
 0x289   : > { %v1521_v59 = vpop.f32.mrf.mxu2 }
 0x28a   : > { %v1541_v60 = vpop.f32.mrf.mxu3  ;;  %v1544_v5 = vadd.f32 %v1521_v59, %v1489_v1  ;;  %v1910_v59 = vld [vmem:[%s7129_s20 + $0xc0] sm:$0xff]  ;;  %v1907_v1 = vld [vmem:[%s7129_s20 + $0xa8] sm:$0xff] }
 0x28b   : > { %v1545_v62 = vadd.f32 %v1541_v60, %v1490_v58  ;;  %v1894_v58 = vld [vmem:[%s7129_s20 + $0x40] sm:$0xff]  ;;  %v1893_v60 = vld [vmem:[%s7129_s20 + $0x38] sm:$0xff]  ;;  %1945 = vmatpush.msrb.mxu1 %v1910_v59 }
 0x28c   : > { %v1576_v63 = vpop.f32.mrf.mxu0  ;;  %1925 = vmatpush.msrb.mxu0 %v1894_v58 }
 0x28d   : > { %v1596_v0 = vpop.f32.mrf.mxu1  ;;  %v1599_v10 = vadd.f32 %v1576_v63, %v1544_v5  ;;  %v1908_v63 = vld [vmem:[%s7129_s20 + $0xb0] sm:$0xff]  ;;  %1946 = vmatpush.msrb.mxu1 %v1909_v61  ;;  %v1906_v5 = vld [vmem:[%s7129_s20 + $0xa0] sm:$0xff] }
 0x28e   : > { %v1600_v4 = vadd.f32 %v1596_v0, %v1545_v62  ;;  %v1892_v62 = vld [vmem:[%s7129_s20 + $0x30] sm:$0xff]  ;;  %1926 = vmatpush.msrb.mxu0 %v1893_v60  ;;  %v1891_v0 = vld [vmem:[%s7129_s20 + $0x28] sm:$0xff]  ;;  %v6167_v60 = vld [vmem:[%s7128_s19 + $0x2] ss:$0 sm:$0xff] }
 0x28f   : > { %1947 = vmatpush.msrb.mxu1 %v1908_v63  ;;  %v6172_v61 = vld [vmem:[%s7128_s19 + $0x1] ss:$0 sm:$0xff] }
 0x290   : > { %1927 = vmatpush.msrb.mxu0 %v1892_v62  ;;  %v6179_v62 = vld [vmem:[%s7128_s19 + $0x3] ss:$0 sm:$0xff] }
 0x291   : > { %1948 = vmatpush.msrb.mxu1 %v1907_v1 }
 0x292   : > { %v1623_v6 = vpop.f32.mrf.mxu2  ;;  %1928 = vmatpush.msrb.mxu0 %v1891_v0 }
 0x293   : > { %v1643_v7 = vpop.f32.mrf.mxu3  ;;  %v1646_v14 = vadd.f32 %v1623_v6, %v1599_v10  ;;  %v1889_v6 = vld [vmem:[%s7129_s20 + $0x18] sm:$0xff]  ;;  %1949 = vmatpush.msrb.mxu1 %v1906_v5 }
 0x294   : > { %v1647_v8 = vadd.f32 %v1643_v7, %v1600_v4  ;;  %v1678_v9 = vpop.f32.mrf.mxu0  ;;  %v1890_v4 = vld [vmem:[%s7129_s20 + $0x20] sm:$0xff]  ;;  %v1905_v7 = vld [vmem:[%s7129_s20 + $0x98] sm:$0xff] }
 0x295   : > { %v1698_v11 = vpop.f32.mrf.mxu1  ;;  %v1701_v17 = vadd.f32 %v1678_v9, %v1646_v14  ;;  %1929 = vmatpush.msrb.mxu0 %v1890_v4  ;;  %1950 = vmatpush.msrb.mxu1 %v1905_v7 }
 0x296   : > { %v1702_v15 = vadd.f32 %v1698_v11, %v1647_v8 }
 0x297   : > { %1930 = vmatpush.msrb.mxu0 %v1889_v6 }
 0x29a   : > { %v1733_v16 = vpop.f32.mrf.mxu2 }
 0x29b   : > { %v1753_v18 = vpop.f32.mrf.mxu3  ;;  %v1756_v20 = vadd.f32 %v1733_v16, %v1701_v17  ;;  %v1888_v17 = vld [vmem:[%s7129_s20 + $0x10] sm:$0xff] }
 0x29c   : > { %v1757_v19 = vadd.f32 %v1753_v18, %v1702_v15  ;;  %v1788_v25 = vpop.f32.mrf.mxu0  ;;  %v1904_v18 = vld [vmem:[%s7129_s20 + $0x90] sm:$0xff]  ;;  %1931 = vmatpush.msrb.mxu0 %v1888_v17 }
 0x29d   : > { %v1808_v24 = vpop.f32.mrf.mxu1  ;;  %v1811_v31 = vadd.f32 %v1788_v25, %v1756_v20  ;;  %1951 = vmatpush.msrb.mxu1 %v1904_v18  ;;  %v1903_v20 = vld [vmem:[%s7129_s20 + $0x88] sm:$0xff]  ;;  %v1902_v25 = vld [vmem:[%s7129_s20 + $0x80] sm:$0xff] }
 0x29e   : > { %v1812_v30 = vadd.f32 %v1808_v24, %v1757_v19  ;;  %v1887_v19 = vld [vmem:[%s7129_s20 + $0x8] sm:$0xff]  ;;  %v1886_v24 = vld [vmem:[%s7129_s20] sm:$0xff] }
 0x29f   : > { %1932 = vmatpush.msrb.mxu0 %v1887_v19  ;;  %1952 = vmatpush.msrb.mxu1 %v1903_v20 }
 0x2a1   : > { %1933 = vmatpush.msrb.mxu0 %v1886_v24  ;;  %1953 = vmatpush.msrb.mxu1 %v1902_v25 }
 0x2a2   : > { %v1843_v32 = vpop.f32.mrf.mxu2 }
 0x2a3   : > { %v1866_v33 = vadd.f32 %v1843_v32, %v1811_v31  ;;  %v1863_v34 = vpop.f32.mrf.mxu3 }
 0x2a4   : > { %v1867_v35 = vadd.f32 %v1863_v34, %v1812_v30 }
 0x2a5   : > { %v6006_v38 = vmax.f32 %v1866_v33, 0.0 }
 0x2a6   : > { %v6008_v39 = vmax.f32 %v1867_v35, 0.0 }
 0x2a7   : > { %1870 = vrot.lane.b32.xlu1 %v6006_v38, %s7158_s24 }
 0x2a8   : > { %1872 = vrot.lane.b32.xlu2 %v6008_v39, %s7158_s24  ;;  %s7222_s24 = smov 17  }
 0x302   : > { %v1873_v8 = vpop.permute.xlu2 %1872 }
 0x319   : > { %v1871_v9 = vpop.permute.xlu1 %1870 }
 0x31a   : > { %v6094_v10 = vsel %vm1088_vm6, %v1871_v9, %v1873_v8  ;;  %v6098_v11 = vsel %vm1088_vm6, %v1873_v8, %v1871_v9 }
 0x31b   : > { %v1876_v14 = vmax.f32 %v6006_v38, %v6094_v10  ;;  %v1877_v15 = vmax.f32 %v6008_v39, %v6098_v11 }
 0x31d   : > { %v5316_v16 = vpack.i.bf16 %v1877_v15, %v1876_v14 }
 0x31f   : > { %5317 = vrot.lane.b32.xlu1 %v5316_v16, %s7205_s2  ;;  %v6209_v16 = vld [vmem:[%s7128_s19 + $0x6] ss:$0 sm:$0xff] }
 0x391   : > { %v5318_v30 = vpop.permute.xlu1 %5317 }
 0x392   : > { %v5320_v31 = vunpack.i.h.bf16 %v5318_v30  ;;  %v5319_v32 = vunpack.i.l.bf16 %v5318_v30  ;;  %v6226_v30 = vld [vmem:[%s7128_s19 + $0x8] ss:$0 sm:$0xff] }
 0x394   : > { %v1882_v33 = vsel %vm1236_vm8, %v5319_v32, %v5320_v31  ;;  %v1883_v34 = vsel %vm1236_vm8, %v5320_v31, %v5319_v32 }
 0x395   : > { %v1884_v35 = vmax.f32 %v1876_v14, %v1882_v33  ;;  %v1885_v40 = vmax.f32 %v1877_v15, %v1883_v34  ;;  %v1958_v14 = vld [vmem:[%s7209_s5] sm:$0xff]  ;;  %s7224_s5 = smov 113  }
 0x396   : > { %v6204_v15 = vld [vmem:[%s7128_s19 + $0x7] ss:$0 sm:$0xff] }
 0x397   : > { %1934 = vmatmul.f32.vlgmr.msrb.gmra.mxu0 %v1884_v35  ;;  %1954 = vmatmul.f32.vlgmr.msrb.gmra.mxu1 %v1885_v40 }
 0x414   : > { %v1935_v41 = vpop.f32.mrf.mxu0  ;;  %v1955_v44 = vpop.f32.mrf.mxu1 }
 0x415   : > { %v1956_v45 = vadd.f32 %v1955_v44, %v1935_v41 }
 0x417   : > { %2054 = vrot.lane.b32.xlu1 %v1956_v45, %s7162_s6  ;;  %2012 = vrot.lane.b32.xlu0 %v1956_v45, %s7160_s0  ;;  %s7210_s0 = smov 127   ;;  %s7212_s6 = smov 9  }
 0x418   : > { %1971 = vrot.lane.b32.xlu2 %v1956_v45, %s7164_s16  ;;  %2160 = vmatpush.msra.mxu0 %v1956_v45  ;;  %s7213_s16 = smov 7  }
 0x41f   : > { %2256 = vrot.lane.b32.xlu1 %v1956_v45, %s7166_s23  ;;  %2214 = vrot.lane.b32.xlu0 %v1956_v45, %s7168_s29  ;;  %s7214_s23 = smov 8   ;;  %s7215_s29 = smov 1  }
 0x420   : > { %2096 = vrot.lane.b32.xlu2 %v1956_v45, %s7170_s25  ;;  %s7211_s25 = sld [smem:[#allocation22_spill]] }
 0x426   : > { %v1977_v50 = vld [vmem:[%s7211_s25] sm:$0xff]  ;;  %v1978_v52 = vld [vmem:[%s7211_s25 + $0x8] sm:$0xff]  ;;  %v5076_v59 = vld [vmem:[%s7211_s25 + $0x50] sm:$0xff] }
 0x427   : > { %1967 = vperm.xlu1 %5314, %v1959_v46   ;;  %2298 = vrot.lane.b32.xlu0 %v1956_v45, %s7172_s27  ;;  %v5071_v58 = vld [vmem:[%s7211_s25 + $0x40] sm:$0xff]  ;;  %v5057_v5 = vld [vmem:[%s7211_s25 + $0x10] sm:$0xff]  ;;  %v5072_v7 = vld [vmem:[%s7211_s25 + $0x48] sm:$0xff]  ;;  %s7216_s27 = smov 121  }
 0x428   : > { %2172 = vrot.lane.b32.xlu2 %v1956_v45, %s7210_s0  ;;  %5073 = vmatmul.msk.f32.vlgmr.msra.gmra.mxu0 %vm1390_vm10, %v5071_v58  ;;  %v5062_v6 = vld [vmem:[%s7211_s25 + $0x20] sm:$0xff]  ;;  %v5077_v9 = vld [vmem:[%s7211_s25 + $0x58] sm:$0xff]  ;;  %v5063_v25 = vld [vmem:[%s7211_s25 + $0x28] sm:$0xff] }
 0x429   : > { %v5058_v24 = vld [vmem:[%s7211_s25 + $0x18] sm:$0xff]  ;;  %v5067_v33 = vld [vmem:[%s7211_s25 + $0x30] sm:$0xff]  ;;  %v5081_v34 = vld [vmem:[%s7211_s25 + $0x60] sm:$0xff] }
 0x42a   : > { %v5091_v35 = vld [vmem:[%s7211_s25 + $0x80] sm:$0xff]  ;;  %v5068_v40 = vld [vmem:[%s7211_s25 + $0x38] sm:$0xff]  ;;  %v5082_v41 = vld [vmem:[%s7211_s25 + $0x68] sm:$0xff] }
 0x42b   : > { %v5092_v44 = vld [vmem:[%s7211_s25 + $0x88] sm:$0xff]  ;;  %v5086_v45 = vld [vmem:[%s7211_s25 + $0x70] sm:$0xff]  ;;  %v5087_v46 = vld [vmem:[%s7211_s25 + $0x78] sm:$0xff] }
 0x430   : > { %5074 = vmatmul.msk.f32.gmra.mxu0 %vm1390_vm10, %v5072_v7  ;;  %1962 = vperm.xlu2 %5321, %v1958_v14  }
 0x472   : > { %v1972_v48 = vpop.permute.xlu2 %1971 }
 0x473   : > { %v1976_v49 = vmul.f32 %v6141_v47, %v1972_v48 }
 0x475   : > { %2000 = vmatpush.msrb.mxu2 %v1976_v49 }
 0x476   : > { %5054 = vmatmul.msk.f32.vlgmr.msrb.gmra.mxu2 %vm1390_vm10, %v1977_v50 }
 0x47a   : > { %v2097_v51 = vpop.permute.xlu2 %2096 }
 0x47b   : > { %v2101_v8 = vmul.f32 %v6179_v62, %v2097_v51 }
 0x47e   : > { %5055 = vmatmul.msk.f32.gmra.mxu2 %vm1390_vm10, %v1978_v52 }
 0x482   : > { %v2173_v56 = vpop.permute.xlu2 %2172 }
 0x483   : > { %v2177_v57 = vmul.f32 %v6155_v53, %v2173_v56 }
 0x485   : > { %2202 = vmatpush.msra.mxu1 %v2177_v57 }
 0x486   : > { %5078 = vmatmul.msk.f32.vlgmr.msra.gmra.mxu1 %vm1390_vm10, %v5076_v59 }
 0x489   : > { %v2055_v63 = vpop.permute.xlu1 %2054  ;;  %v2013_v0 = vpop.permute.xlu0 %2012 }
 0x48a   : > { %v2059_v1 = vmul.f32 %v6167_v60, %v2055_v63  ;;  %v2017_v4 = vmul.f32 %v6172_v61, %v2013_v0  ;;  %v1963_v51 = vpop.permute.xlu2 %1962 }
 0x48c   : > { %2042 = vmatpush.msrb.mxu3 %v2017_v4  ;;  %2084 = vmatpush.msra.mxu2 %v2059_v1 }
 0x48d   : > { %5059 = vmatmul.msk.f32.vlgmr.msrb.gmra.mxu3 %vm1390_vm10, %v5057_v5  ;;  %5064 = vmatmul.msk.f32.vlgmr.msra.gmra.mxu2 %vm1390_vm10, %v5062_v6 }
 0x48e   : > { %2126 = vmatpush.msra.mxu3 %v2101_v8  ;;  %5079 = vmatmul.msk.f32.gmra.mxu1 %vm1390_vm10, %v5077_v9 }
 0x491   : > { %v2257_v17 = vpop.permute.xlu1 %2256  ;;  %v2215_v18 = vpop.permute.xlu0 %2214 }
 0x492   : > { %v2261_v19 = vmul.f32 %v6204_v15, %v2257_v17  ;;  %v2219_v20 = vmul.f32 %v6209_v16, %v2215_v18 }
 0x494   : > { %2244 = vmatpush.msrb.mxu2 %v2219_v20  ;;  %2286 = vmatpush.msrb.mxu3 %v2261_v19 }
 0x495   : > { %5060 = vmatmul.msk.f32.gmra.mxu3 %vm1390_vm10, %v5058_v24  ;;  %5065 = vmatmul.msk.f32.gmra.mxu2 %vm1390_vm10, %v5063_v25 }
 0x499   : > { %v2299_v31 = vpop.permute.xlu0 %2298  ;;  %v1968_v1 = vpop.permute.xlu1 %1967 }
 0x49a   : > { %v2303_v32 = vmul.f32 %v6226_v30, %v2299_v31 }
 0x49c   : > { %2328 = vmatpush.msrb.mxu0 %v2303_v32 }
 0x49d   : > { %5069 = vmatmul.msk.f32.vlgmr.msra.gmra.mxu3 %vm1390_vm10, %v5067_v33  ;;  %5083 = vmatmul.msk.f32.vlgmr.msrb.gmra.mxu2 %vm1390_vm10, %v5081_v34 }
 0x49e   : > { %5093 = vmatmul.msk.f32.vlgmr.msrb.gmra.mxu0 %vm1390_vm10, %v5091_v35 }
 0x4a5   : > { %5070 = vmatmul.msk.f32.gmra.mxu3 %vm1390_vm10, %v5068_v40  ;;  %5084 = vmatmul.msk.f32.gmra.mxu2 %vm1390_vm10, %v5082_v41  ;;  %v2162_v58 = vpop.f32.mrf.mxu0 }
 0x4a6   : > { %5094 = vmatmul.msk.f32.gmra.mxu0 %vm1390_vm10, %v5092_v44 }
 0x4ad   : > { %5088 = vmatmul.msk.f32.vlgmr.msrb.gmra.mxu3 %vm1390_vm10, %v5086_v45  ;;  %v2165_v7 = vpop.f32.mrf.mxu0 }
 0x4b5   : > { %5089 = vmatmul.msk.f32.gmra.mxu3 %vm1390_vm10, %v5087_v46 }
 0x4f9   : > { %v2002_v48 = vpop.f32.mrf.mxu2 }
 0x4fa   : > { %v2008_v57 = vadd.f32 %v2002_v48, %v1963_v51 }
 0x501   : > { %v2005_v49 = vpop.f32.mrf.mxu2 }
 0x502   : > { %v2009_v5 = vadd.f32 %v2005_v49, %v1968_v1 }
 0x503   : > { %v2204_v9 = vpop.f32.mrf.mxu1 }
 0x50b   : > { %v2207_v33 = vpop.f32.mrf.mxu1 }
 0x510   : > { %v2044_v50 = vpop.f32.mrf.mxu3  ;;  %v2086_v52 = vpop.f32.mrf.mxu2 }
 0x511   : > { %v2050_v59 = vadd.f32 %v2044_v50, %v2008_v57  ;;  %v2341_v57 = vld [vmem:[%s7218_s8 + $0x8] sm:$0xff] }
 0x513   : > { %v2092_v0 = vadd.f32 %v2086_v52, %v2050_v59 }
 0x518   : > { %v2047_v56 = vpop.f32.mrf.mxu3  ;;  %v2089_v4 = vpop.f32.mrf.mxu2 }
 0x519   : > { %v2051_v8 = vadd.f32 %v2047_v56, %v2009_v5  ;;  %v2340_v56 = vld [vmem:[%s7218_s8] sm:$0xff]  ;;  %s7223_s8 = smov 15  }
 0x51b   : > { %v2093_v18 = vadd.f32 %v2089_v4, %v2051_v8  ;;  %v2330_v25 = vpop.f32.mrf.mxu0 }
 0x520   : > { %v2128_v63 = vpop.f32.mrf.mxu3  ;;  %v2246_v19 = vpop.f32.mrf.mxu2 }
 0x521   : > { %v2134_v6 = vadd.f32 %v2128_v63, %v2092_v0 }
 0x523   : > { %v2168_v14 = vadd.f32 %v2162_v58, %v2134_v6  ;;  %v2333_v49 = vpop.f32.mrf.mxu0 }
 0x525   : > { %v2210_v20 = vadd.f32 %v2204_v9, %v2168_v14  ;;  %v5101_v14 = vld [vmem:[%s7220_s7 + $0x20] sm:$0xff] }
 0x527   : > { %v2252_v31 = vadd.f32 %v2246_v19, %v2210_v20 }
 0x528   : > { %v2131_v17 = vpop.f32.mrf.mxu3  ;;  %v2249_v44 = vpop.f32.mrf.mxu2 }
 0x529   : > { %v2135_v24 = vadd.f32 %v2131_v17, %v2093_v18  ;;  %v2358_v18 = vld [vmem:[%s7220_s7] sm:$0xff] }
 0x52b   : > { %v2169_v32 = vadd.f32 %v2165_v7, %v2135_v24 }
 0x52d   : > { %v2211_v40 = vadd.f32 %v2207_v33, %v2169_v32  ;;  %v2359_v33 = vld [vmem:[%s7220_s7 + $0x8] sm:$0xff] }
 0x52f   : > { %v2253_v46 = vadd.f32 %v2249_v44, %v2211_v40 }
 0x530   : > { %v2288_v34 = vpop.f32.mrf.mxu3 }
 0x531   : > { %v2294_v35 = vadd.f32 %v2288_v34, %v2252_v31  ;;  %v5102_v31 = vld [vmem:[%s7220_s7 + $0x28] sm:$0xff] }
 0x533   : > { %v2336_v41 = vadd.f32 %v2330_v25, %v2294_v35  ;;  %v5097_v25 = vld [vmem:[%s7220_s7 + $0x10] sm:$0xff] }
 0x535   : > { %v2338_v45 = vmax.f32 %v2336_v41, 0.0  ;;  %v5098_v41 = vld [vmem:[%s7220_s7 + $0x18] sm:$0xff] }
 0x537   : > { %2352 = vrot.lane.b32.xlu1 %v2338_v45, %s7212_s6 }
 0x538   : > { %v2291_v48 = vpop.f32.mrf.mxu3 }
 0x539   : > { %v2295_v50 = vadd.f32 %v2291_v48, %v2253_v46  ;;  %v5105_v48 = vld [vmem:[%s7220_s7 + $0x30] sm:$0xff] }
 0x53b   : > { %v2337_v51 = vadd.f32 %v2333_v49, %v2295_v50  ;;  %v5109_v49 = vld [vmem:[%s7220_s7 + $0x40] sm:$0xff]  ;;  %v5113_v50 = vld [vmem:[%s7220_s7 + $0x50] sm:$0xff] }
 0x53d   : > { %v2339_v52 = vmax.f32 %v2337_v51, 0.0  ;;  %v5118_v51 = vld [vmem:[%s7220_s7 + $0x68] sm:$0xff] }
 0x53f   : > { %2434 = vrot.lane.b32.xlu1 %v2339_v52, %s7213_s16  ;;  %2394 = vrot.lane.b32.xlu2 %v2339_v52, %s7214_s23 }
 0x540   : > { %2354 = vrot.lane.b32.xlu0 %v2339_v52, %s7212_s6  ;;  %s7219_s6 = smov 119  }
 0x547   : > { %2472 = vrot.lane.b32.xlu1 %v2338_v45, %s7215_s29  ;;  %2432 = vrot.lane.b32.xlu2 %v2338_v45, %s7213_s16 }
 0x548   : > { %2392 = vrot.lane.b32.xlu0 %v2338_v45, %s7214_s23 }
 0x54f   : > { %2588 = vrot.lane.b32.xlu1 %v2339_v52, %s7216_s27  ;;  %2548 = vrot.lane.b32.xlu2 %v2339_v52, %s7210_s0 }
 0x550   : > { %2474 = vrot.lane.b32.xlu0 %v2339_v52, %s7215_s29 }
 0x557   : > { %2626 = vrot.lane.b32.xlu1 %v2338_v45, %s7217_s3  ;;  %2586 = vrot.lane.b32.xlu2 %v2338_v45, %s7216_s27  ;;  %s4976_s27 = sshll.u32 %s5686_s26, 2 }
 0x558   : > { %2546 = vrot.lane.b32.xlu0 %v2338_v45, %s7210_s0 }
 0x55f   : > { %2344 = vperm.xlu1 %5314, %v2340_v56   ;;  %2668 = vrot.lane.b32.xlu2 %v2339_v52, %s7219_s6  ;;  %v5110_v56 = vld [vmem:[%s7220_s7 + $0x48] sm:$0xff] }
 0x560   : > { %2628 = vrot.lane.b32.xlu0 %v2339_v52, %s7217_s3  ;;  %s7221_s3 = smov 16  }
 0x567   : > { %2349 = vperm.xlu2 %5321, %v2341_v57  }
 0x568   : > { %2666 = vrot.lane.b32.xlu0 %v2338_v45, %s7219_s6  ;;  %s5241_s6 = sshll.u32 %s5614_s4, 2  ;;  %s4870_s4 = scalar_lea.sflag [#allocation4], %s5686_s26 }
 0x599   : > { %v2395_v58 = vpop.permute.xlu2 %2394 }
 0x59a   : > { %v2397_v59 = vmul.f32 %v6172_v61, %v2395_v58 }
 0x59c   : > { %2421 = vmatpush.msra.mxu2 %v2397_v59  ;;  %v5114_v59 = vld [vmem:[%s7220_s7 + $0x58] sm:$0xff] }
 0x5a1   : > { %v2433_v63 = vpop.permute.xlu2 %2432 }
 0x5a2   : > { %v2436_v9 = vmul.f32 %v6167_v60, %v2433_v63 }
 0x5a9   : > { %v2353_v0 = vpop.permute.xlu1 %2352  ;;  %v2549_v1 = vpop.permute.xlu2 %2548 }
 0x5aa   : > { %v2356_v17 = vmul.f32 %v6141_v47, %v2353_v0  ;;  %v2551_v32 = vmul.f32 %v6155_v53, %v2549_v1  ;;  %v5121_v0 = vld [vmem:[%s7220_s7 + $0x70] sm:$0xff] }
 0x5b1   : > { %v2435_v4 = vpop.permute.xlu1 %2434  ;;  %v2587_v5 = vpop.permute.xlu2 %2586 }
 0x5b2   : > { %v2437_v6 = vmul.f32 %v6167_v60, %v2435_v4  ;;  %v2355_v7 = vpop.permute.xlu0 %2354  ;;  %v2590_v44 = vmul.f32 %v6209_v16, %v2587_v5  ;;  %v5125_v5 = vld [vmem:[%s7220_s7 + $0x80] sm:$0xff] }
 0x5b3   : > { %v2357_v8 = vmul.f32 %v6141_v47, %v2355_v7  ;;  %v2739_v7 = vld [vmem:[%s7130_s21 + $0xf8] sm:$0xff] }
 0x5b4   : > { %2461 = vmatpush.msra.mxu3 %v2437_v6  ;;  %v5126_v6 = vld [vmem:[%s7220_s7 + $0x88] sm:$0xff] }
 0x5b5   : > { %2381 = vmatpush.msrb.mxu1 %v2357_v8  ;;  %v2736_v8 = vld [vmem:[%s7130_s21 + $0xe0] sm:$0xff] }
 0x5b6   : > { %2462 = vmatpush.msra.mxu3 %v2436_v9  ;;  %v2737_v9 = vld [vmem:[%s7130_s21 + $0xe8] sm:$0xff] }
 0x5b7   : > { %2382 = vmatpush.msrb.mxu1 %v2356_v17  ;;  %5103 = vmatmul.msk.f32.vlgmr.msra.gmra.mxu3 %vm2360_vm11, %v5101_v14  ;;  %v2734_v14 = vld [vmem:[%s7130_s21 + $0xd0] sm:$0xff]  ;;  %v2735_v17 = vld [vmem:[%s7130_s21 + $0xd8] sm:$0xff] }
 0x5b8   : > { %5095 = vmatmul.msk.f32.vlgmr.msrb.gmra.mxu1 %vm2360_vm11, %v2358_v18  ;;  %v2732_v18 = vld [vmem:[%s7130_s21 + $0xc0] sm:$0xff] }
 0x5b9   : > { %2535 = vmatpush.msra.mxu1 %v2339_v52  ;;  %v2473_v60 = vpop.permute.xlu1 %2472  ;;  %v2669_v19 = vpop.permute.xlu2 %2668  ;;  %v5106_v52 = vld [vmem:[%s7220_s7 + $0x38] sm:$0xff] }
 0x5ba   : > { %v2671_v20 = vmul.f32 %v6226_v30, %v2669_v19  ;;  %v2393_v24 = vpop.permute.xlu0 %2392  ;;  %v2476_v46 = vmul.f32 %v6179_v62, %v2473_v60  ;;  %v2733_v60 = vld [vmem:[%s7130_s21 + $0xc8] sm:$0xff]  ;;  %v2730_v19 = vld [vmem:[%s7130_s21 + $0xb0] sm:$0xff] }
 0x5bb   : > { %2536 = vmatpush.msra.mxu1 %v2338_v45  ;;  %v2396_v47 = vmul.f32 %v6172_v61, %v2393_v24  ;;  %v5117_v45 = vld [vmem:[%s7220_s7 + $0x60] sm:$0xff] }
 0x5bc   : > { %v2728_v24 = vld [vmem:[%s7130_s21 + $0xa0] sm:$0xff] }
 0x5bd   : > { %2695 = vmatpush.msrb.mxu1 %v2671_v20  ;;  %2422 = vmatpush.msra.mxu2 %v2396_v47  ;;  %v2731_v20 = vld [vmem:[%s7130_s21 + $0xb8] sm:$0xff]  ;;  %v2729_v47 = vld [vmem:[%s7130_s21 + $0xa8] sm:$0xff] }
 0x5be   : > { %5099 = vmatmul.msk.f32.vlgmr.msra.gmra.mxu2 %vm2360_vm11, %v5097_v25  ;;  %v2726_v25 = vld [vmem:[%s7130_s21 + $0x90] sm:$0xff] }
 0x5bf   : > { %2575 = vmatpush.msrb.mxu2 %v2551_v32  ;;  %5104 = vmatmul.msk.f32.gmra.mxu3 %vm2360_vm11, %v5102_v31  ;;  %v2727_v31 = vld [vmem:[%s7130_s21 + $0x98] sm:$0xff]  ;;  %v2724_v32 = vld [vmem:[%s7130_s21 + $0x80] sm:$0xff] }
 0x5c0   : > { %5096 = vmatmul.msk.f32.gmra.mxu1 %vm2360_vm11, %v2359_v33  ;;  %v2725_v33 = vld [vmem:[%s7130_s21 + $0x88] sm:$0xff] }
 0x5c1   : > { %v2589_v61 = vpop.permute.xlu1 %2588 }
 0x5c2   : > { %v2591_v34 = vmul.f32 %v6209_v16, %v2589_v61  ;;  %v2475_v35 = vpop.permute.xlu0 %2474  ;;  %v2722_v61 = vld [vmem:[%s7130_s21 + $0x70] sm:$0xff] }
 0x5c3   : > { %v2477_v40 = vmul.f32 %v6179_v62, %v2475_v35  ;;  %v2720_v35 = vld [vmem:[%s7130_s21 + $0x60] sm:$0xff] }
 0x5c4   : > { %2615 = vmatpush.msrb.mxu3 %v2591_v34  ;;  %v2723_v34 = vld [vmem:[%s7130_s21 + $0x78] sm:$0xff] }
 0x5c5   : > { %2501 = vmatpush.msra.mxu0 %v2477_v40  ;;  %v2721_v40 = vld [vmem:[%s7130_s21 + $0x68] sm:$0xff] }
 0x5c6   : > { %5100 = vmatmul.msk.f32.gmra.mxu2 %vm2360_vm11, %v5098_v41  ;;  %2616 = vmatpush.msrb.mxu3 %v2590_v44  ;;  %v2718_v41 = vld [vmem:[%s7130_s21 + $0x50] sm:$0xff]  ;;  %v2719_v44 = vld [vmem:[%s7130_s21 + $0x58] sm:$0xff] }
 0x5c7   : > { %2502 = vmatpush.msra.mxu0 %v2476_v46  ;;  %5119 = vmatmul.msk.f32.vlgmr.msrb.gmra.mxu3 %vm2360_vm11, %v5117_v45  ;;  %v2716_v45 = vld [vmem:[%s7130_s21 + $0x40] sm:$0xff]  ;;  %v2717_v46 = vld [vmem:[%s7130_s21 + $0x48] sm:$0xff] }
 0x5c8   : > { %5107 = vmatmul.msk.f32.vlgmr.msra.gmra.mxu0 %vm2360_vm11, %v5105_v48  ;;  %5111 = vmatmul.msk.f32.vlgmr.msra.gmra.mxu1 %vm2360_vm11, %v5109_v49  ;;  %v2714_v49 = vld [vmem:[%s7130_s21 + $0x30] sm:$0xff] }
 0x5c9   : > { %2763 = vmatpush.msra.mxu3 %v2739_v7 }
 0x5ca   : > { %v2547_v62 = vpop.permute.xlu0 %2546 }
 0x5cb   : > { %v2550_v16 = vmul.f32 %v6155_v53, %v2547_v62  ;;  %v2627_v53 = vpop.permute.xlu1 %2626  ;;  %2764 = vmatpush.msra.mxu3 %v2737_v9  ;;  %v2715_v62 = vld [vmem:[%s7130_s21 + $0x38] sm:$0xff] }
 0x5cc   : > { %v2630_v63 = vmul.f32 %v6204_v15, %v2627_v53  ;;  %v2708_v53 = vld [vmem:[%s7130_s21] sm:$0xff] }
 0x5cd   : > { %2576 = vmatpush.msrb.mxu2 %v2550_v16  ;;  %2765 = vmatpush.msra.mxu3 %v2735_v17  ;;  %v2712_v16 = vld [vmem:[%s7130_s21 + $0x20] sm:$0xff] }
 0x5ce   : > { %5115 = vmatmul.msk.f32.vlgmr.msrb.gmra.mxu2 %vm2360_vm11, %v5113_v50  ;;  %v2713_v50 = vld [vmem:[%s7130_s21 + $0x28] sm:$0xff] }
 0x5cf   : > { %5120 = vmatmul.msk.f32.gmra.mxu3 %vm2360_vm11, %v5118_v51 }
 0x5d0   : > { %5108 = vmatmul.msk.f32.gmra.mxu0 %vm2360_vm11, %v5106_v52  ;;  %5112 = vmatmul.msk.f32.gmra.mxu1 %vm2360_vm11, %v5110_v56  ;;  %v2710_v52 = vld [vmem:[%s7130_s21 + $0x10] sm:$0xff]  ;;  %v2711_v56 = vld [vmem:[%s7130_s21 + $0x18] sm:$0xff] }
 0x5d1   : > { %2766 = vmatpush.msra.mxu3 %v2733_v60 }
 0x5d2   : > { %v2629_v57 = vpop.permute.xlu0 %2628 }
 0x5d3   : > { %v2631_v58 = vmul.f32 %v6204_v15, %v2629_v57  ;;  %v5122_v15 = vld [vmem:[%s7220_s7 + $0x78] sm:$0xff]  ;;  %2767 = vmatpush.msra.mxu3 %v2731_v20  ;;  %v2709_v57 = vld [vmem:[%s7130_s21 + $0x8] sm:$0xff] }
 0x5d5   : > { %2655 = vmatpush.msrb.mxu0 %v2631_v58  ;;  %2768 = vmatpush.msra.mxu3 %v2729_v47  ;;  %v2345_v58 = vpop.permute.xlu1 %2344 }
 0x5d6   : > { %5116 = vmatmul.msk.f32.gmra.mxu2 %vm2360_vm11, %v5114_v59 }
 0x5d7   : > { %2656 = vmatpush.msrb.mxu0 %v2630_v63  ;;  %2769 = vmatpush.msra.mxu3 %v2727_v31 }
 0x5d8   : > { %5123 = vmatmul.msk.f32.vlgmr.msrb.gmra.mxu0 %vm2360_vm11, %v5121_v0 }
 0x5d9   : > { %2770 = vmatpush.msra.mxu3 %v2725_v33 }
 0x5da   : > { %v2667_v1 = vpop.permute.xlu0 %2666 }
 0x5db   : > { %v2670_v4 = vmul.f32 %v6226_v30, %v2667_v1  ;;  %v2738_v30 = vld [vmem:[%s7130_s21 + $0xf0] sm:$0xff]  ;;  %2771 = vmatpush.msra.mxu3 %v2723_v34 }
 0x5dc   : > { %2740 = vmatpush.msra.mxu2 %v2738_v30 }
 0x5dd   : > { %2696 = vmatpush.msrb.mxu1 %v2670_v4  ;;  %2772 = vmatpush.msra.mxu3 %v2721_v40 }
 0x5de   : > { %5127 = vmatmul.msk.f32.vlgmr.msrb.gmra.mxu1 %vm2360_vm11, %v5125_v5  ;;  %2741 = vmatpush.msra.mxu2 %v2736_v8 }
 0x5df   : > { %2773 = vmatpush.msra.mxu3 %v2719_v44 }
 0x5e0   : > { %5124 = vmatmul.msk.f32.gmra.mxu0 %vm2360_vm11, %v5122_v15  ;;  %2742 = vmatpush.msra.mxu2 %v2734_v14  ;;  %v2350_v15 = vpop.permute.xlu2 %2349 }
 0x5e1   : > { %2774 = vmatpush.msra.mxu3 %v2717_v46 }
 0x5e2   : > { %2743 = vmatpush.msra.mxu2 %v2732_v18 }
 0x5e3   : > { %2775 = vmatpush.msra.mxu3 %v2715_v62 }
 0x5e4   : > { %2744 = vmatpush.msra.mxu2 %v2730_v19 }
 0x5e5   : > { %2776 = vmatpush.msra.mxu3 %v2713_v50 }
 0x5e6   : > { %5128 = vmatmul.msk.f32.gmra.mxu1 %vm2360_vm11, %v5126_v6  ;;  %2745 = vmatpush.msra.mxu2 %v2728_v24 }
 0x5e7   : > { %2777 = vmatpush.msra.mxu3 %v2711_v56 }
 0x5e8   : > { %2746 = vmatpush.msra.mxu2 %v2726_v25 }
 0x5e9   : > { %2778 = vmatpush.msra.mxu3 %v2709_v57  ;;  %v2786_v57 = vld [vmem:[%s7119_s10] sm:$0xff] }
 0x5ea   : > { %2747 = vmatpush.msra.mxu2 %v2724_v32 }
 0x5ec   : > { %2748 = vmatpush.msra.mxu2 %v2722_v61 }
 0x5ee   : > { %2749 = vmatpush.msra.mxu2 %v2720_v35 }
 0x5f0   : > { %2750 = vmatpush.msra.mxu2 %v2718_v41 }
 0x5f2   : > { %2751 = vmatpush.msra.mxu2 %v2716_v45 }
 0x5f4   : > { %2752 = vmatpush.msra.mxu2 %v2714_v49 }
 0x5f6   : > { %2753 = vmatpush.msra.mxu2 %v2712_v16 }
 0x5f8   : > { %2754 = vmatpush.msra.mxu2 %v2710_v52 }
 0x5fa   : > { %2755 = vmatpush.msra.mxu2 %v2708_v53 }
 0x635   : > { %v2384_v48 = vpop.f32.mrf.mxu1 }
 0x636   : > { %v2390_v0 = vadd.f32 %v2384_v48, %v2345_v58 }
 0x63a   : > { %v2464_v51 = vpop.f32.mrf.mxu3 }
 0x63d   : > { %v2387_v59 = vpop.f32.mrf.mxu1 }
 0x63e   : > { %v2391_v8 = vadd.f32 %v2387_v59, %v2350_v15 }
 0x641   : > { %v2424_v63 = vpop.f32.mrf.mxu2 }
 0x642   : > { %v2430_v1 = vadd.f32 %v2424_v63, %v2390_v0  ;;  %v2467_v5 = vpop.f32.mrf.mxu3 }
 0x644   : > { %v2470_v6 = vadd.f32 %v2464_v51, %v2430_v1 }
 0x645   : > { %v2504_v4 = vpop.f32.mrf.mxu0  ;;  %v2538_v30 = vpop.f32.mrf.mxu1 }
 0x646   : > { %v2510_v9 = vadd.f32 %v2504_v4, %v2470_v6 }
 0x648   : > { %v2544_v18 = vadd.f32 %v2538_v30, %v2510_v9 }
 0x649   : > { %v2427_v7 = vpop.f32.mrf.mxu2 }
 0x64a   : > { %v2431_v14 = vadd.f32 %v2427_v7, %v2391_v8  ;;  %v2618_v20 = vpop.f32.mrf.mxu3 }
 0x64c   : > { %v2471_v60 = vadd.f32 %v2467_v5, %v2431_v14 }
 0x64d   : > { %v2507_v17 = vpop.f32.mrf.mxu0  ;;  %v2541_v47 = vpop.f32.mrf.mxu1 }
 0x64e   : > { %v2511_v25 = vadd.f32 %v2507_v17, %v2471_v60 }
 0x650   : > { %v2545_v33 = vadd.f32 %v2541_v47, %v2511_v25 }
 0x651   : > { %v2578_v19 = vpop.f32.mrf.mxu2 }
 0x652   : > { %v2584_v24 = vadd.f32 %v2578_v19, %v2544_v18  ;;  %v2621_v40 = vpop.f32.mrf.mxu3 }
 0x654   : > { %v2624_v32 = vadd.f32 %v2618_v20, %v2584_v24 }
 0x655   : > { %v2658_v31 = vpop.f32.mrf.mxu0 }
 0x656   : > { %v2664_v34 = vadd.f32 %v2658_v31, %v2624_v32 }
 0x659   : > { %v2581_v61 = vpop.f32.mrf.mxu2 }
 0x65a   : > { %v2585_v35 = vadd.f32 %v2581_v61, %v2545_v33 }
 0x65b   : > { %v2698_v41 = vpop.f32.mrf.mxu1 }
 0x65c   : > { %v2704_v44 = vadd.f32 %v2698_v41, %v2664_v34  ;;  %v2625_v45 = vadd.f32 %v2621_v40, %v2585_v35  ;;  %v2808_v34 = vld [vmem:[%s7118_s9] sm:$0xff] }
 0x65d   : > { %v2661_v48 = vpop.f32.mrf.mxu0 }
 0x65e   : > { %v2706_v46 = vmax.f32 %v2704_v44, 0.0  ;;  %v2665_v49 = vadd.f32 %v2661_v48, %v2625_v45 }
 0x660   : > { %2756 = vmatmul.f32.vlgmr.msra.gmra.mxu2 %v2706_v46  ;;  %2779 = vmatmul.f32.vlgmr.msra.gmra.mxu3 %v2706_v46 }
 0x663   : > { %v2701_v62 = vpop.f32.mrf.mxu1 }
 0x664   : > { %v2705_v16 = vadd.f32 %v2701_v62, %v2665_v49 }
 0x666   : > { %v2707_v50 = vmax.f32 %v2705_v16, 0.0  ;;  %v5131_v16 = vld [vmem:[%s7118_s9 + $0x8] sm:$0xff] }
 0x668   : > { %2759 = vmatmul.f32.gmra.mxu2 %v2707_v50  ;;  %2782 = vmatmul.f32.gmra.mxu3 %v2707_v50 }
 0x6e3   : > { %v6467_v51 = vpop.f32.mrf.mxu2  ;;  %v6469_v52 = vpop.f32.mrf.mxu3 }
 0x6e4   : > { %2858 = vrot.lane.b32.xlu1 %v6469_v52, %s7221_s3  ;;  %2796 = vrot.lane.b32.xlu0 %v6469_v52, %s7222_s24 }
 0x6e5   : > { %2792 = vrot.lane.b32.xlu2 %v6467_v51, %s7222_s24 }
 0x6eb   : > { %v6483_v56 = vpop.f32.mrf.mxu3  ;;  %v6491_v53 = vpop.f32.mrf.mxu2 }
 0x6ec   : > { %2921 = vrot.lane.b32.xlu1 %v6469_v52, %s7223_s8  ;;  %2854 = vrot.lane.b32.xlu0 %v6467_v51, %s7221_s3 }
 0x6ed   : > { %2980 = vrot.lane.b32.xlu2 %v6467_v51, %s7215_s29 }
 0x6f4   : > { %3094 = vrot.lane.b32.xlu1 %v6469_v52, %s7210_s0  ;;  %2917 = vrot.lane.b32.xlu0 %v6467_v51, %s7223_s8 }
 0x6f5   : > { %2860 = vrot.lane.b32.xlu2 %v6483_v56, %s7221_s3 }
 0x6fc   : > { %2984 = vrot.lane.b32.xlu0 %v6469_v52, %s7215_s29  ;;  %2798 = vrot.lane.b32.xlu1 %v6483_v56, %s7222_s24 }
 0x6fd   : > { %2919 = vrot.lane.b32.xlu2 %v6491_v53, %s7223_s8 }
 0x704   : > { %2856 = vrot.lane.b32.xlu1 %v6491_v53, %s7221_s3  ;;  %2794 = vrot.lane.b32.xlu0 %v6491_v53, %s7222_s24 }
 0x705   : > { %3216 = vrot.lane.b32.xlu2 %v6467_v51, %s7205_s2 }
 0x70c   : > { %3157 = vrot.lane.b32.xlu1 %v6469_v52, %s7224_s5  ;;  %3090 = vrot.lane.b32.xlu0 %v6467_v51, %s7210_s0 }
 0x70d   : > { %2986 = vrot.lane.b32.xlu2 %v6483_v56, %s7215_s29 }
 0x714   : > { %2982 = vrot.lane.b32.xlu1 %v6491_v53, %s7215_s29  ;;  %2923 = vrot.lane.b32.xlu0 %v6483_v56, %s7223_s8 }
 0x715   : > { %3096 = vrot.lane.b32.xlu2 %v6483_v56, %s7210_s0 }
 0x71c   : > { %3092 = vrot.lane.b32.xlu1 %v6491_v53, %s7210_s0  ;;  %3153 = vrot.lane.b32.xlu0 %v6467_v51, %s7224_s5 }
 0x71d   : > { %3155 = vrot.lane.b32.xlu2 %v6491_v53, %s7224_s5 }
 0x724   : > { %3218 = vrot.lane.b32.xlu1 %v6491_v53, %s7205_s2  ;;  %3159 = vrot.lane.b32.xlu0 %v6483_v56, %s7224_s5 }
 0x725   : > { %3222 = vrot.lane.b32.xlu2 %v6483_v56, %s7205_s2 }
 0x72c   : > { %3281 = vrot.lane.b32.xlu1 %v6491_v53, %s7225_s22  ;;  %3220 = vrot.lane.b32.xlu0 %v6469_v52, %s7205_s2 }
 0x72d   : > { %3285 = vrot.lane.b32.xlu2 %v6483_v56, %s7225_s22 }
 0x734   : > { %3283 = vrot.lane.b32.xlu1 %v6469_v52, %s7225_s22  ;;  %3279 = vrot.lane.b32.xlu0 %v6467_v51, %s7225_s22 }
 0x735   : > { %2789 = vperm.xlu2 %5321, %v2786_v57  }
 0x73c   : > { %3515 = vrot.lane.b32.xlu1 %v6008_v39, %s7221_s3  ;;  %3406 = vrot.lane.b32.xlu0 %v6008_v39, %s7222_s24 }
 0x73d   : > { %3404 = vrot.lane.b32.xlu2 %v6006_v38, %s7222_s24 }
 0x73f   : > { %v2793_v58 = vpop.permute.xlu2 %2792 }
 0x747   : > { %v2981_v59 = vpop.permute.xlu2 %2980 }
 0x74f   : > { %v2861_v63 = vpop.permute.xlu2 %2860 }
 0x756   : > { %v2859_v0 = vpop.permute.xlu1 %2858  ;;  %v2797_v1 = vpop.permute.xlu0 %2796 }
 0x757   : > { %v2920_v4 = vpop.permute.xlu2 %2919  ;;  %v2800_v60 = vsel %vm737_vm1, %v2793_v58, %v2797_v1  ;;  %v2802_v19 = vsel %vm737_vm1, %v2797_v1, %v2793_v58 }
 0x758   : > { %v2804_v33 = vmul.f32 %v2802_v19, %v5724_v26  ;;  %v2805_v61 = vmul.f32 %v2800_v60, %v5726_v27 }
 0x75e   : > { %v2922_v5 = vpop.permute.xlu1 %2921  ;;  %v2855_v15 = vpop.permute.xlu0 %2854 }
 0x75f   : > { %v6550_v7 = vpop.permute.xlu2 %3216  ;;  %v2862_v35 = vsel %vm812_vm4, %v2855_v15, %v2859_v0  ;;  %v2864_v40 = vsel %vm812_vm4, %v2859_v0, %v2855_v15 }
 0x760   : > { %v2866_v46 = vmul.f32 %v2864_v40, %v5755_v42  ;;  %v2867_v48 = vmul.f32 %v2862_v35, %v5757_v43 }
 0x766   : > { %v6548_v6 = vpop.permute.xlu1 %3094  ;;  %v2918_v30 = vpop.permute.xlu0 %2917 }
 0x767   : > { %v2987_v14 = vpop.permute.xlu2 %2986  ;;  %v2925_v57 = vsel %vm886_vm0, %v2918_v30, %v2922_v5  ;;  %v2927_v58 = vsel %vm886_vm0, %v2922_v5, %v2918_v30 }
 0x768   : > { %v2929_v19 = vmul.f32 %v2927_v58, %v5728_v28 }
 0x76e   : > { %v2985_v8 = vpop.permute.xlu0 %2984  ;;  %v2799_v9 = vpop.permute.xlu1 %2798 }
 0x76f   : > { %v3097_v41 = vpop.permute.xlu2 %3096  ;;  %v2990_v0 = vsel %vm960_vm5, %v2985_v8, %v2981_v59 }
 0x776   : > { %v2857_v17 = vpop.permute.xlu1 %2856  ;;  %v2795_v18 = vpop.permute.xlu0 %2794 }
 0x777   : > { %v2801_v20 = vsel %vm737_vm1, %v2795_v18, %v2799_v9  ;;  %v2803_v24 = vsel %vm737_vm1, %v2799_v9, %v2795_v18  ;;  %v2863_v31 = vsel %vm812_vm4, %v2857_v17, %v2861_v63  ;;  %v2865_v32 = vsel %vm812_vm4, %v2861_v63, %v2857_v17  ;;  %v6586_v50 = vpop.permute.xlu2 %3155 }
 0x778   : > { %v2806_v47 = vmul.f32 %v2803_v24, %v5724_v26  ;;  %v2807_v25 = vmul.f32 %v2801_v20, %v5726_v27  ;;  %v2868_v44 = vmul.f32 %v2865_v32, %v5755_v42  ;;  %v2869_v45 = vmul.f32 %v2863_v31, %v5757_v43 }
 0x779   : > { %v2988_v63 = vsel %vm960_vm5, %v2981_v59, %v2985_v8  ;;  %v2930_v20 = vmul.f32 %v2925_v57, %v5730_v29 }
 0x77a   : > { %2826 = vmatpush.msra.mxu0 %v2806_v47  ;;  %2846 = vmatpush.msra.mxu1 %v2807_v25  ;;  %v2993_v24 = vmul.f32 %v2988_v63, %v5788_v55  ;;  %v5137_v47 = vld [vmem:[%s7118_s9 + $0x18] sm:$0xff] }
 0x77c   : > { %2827 = vmatpush.msra.mxu0 %v2804_v33  ;;  %2847 = vmatpush.msra.mxu1 %v2805_v61 }
 0x77d   : > { %5129 = vmatmul.msk.f32.vlgmr.msra.gmra.mxu0 %vm2360_vm11, %v2808_v34  ;;  %5130 = vmatmul.msk.f32.vlgmr.msra.gmra.mxu1 %vm2360_vm11, %v2808_v34 }
 0x77e   : > { %2889 = vmatpush.msrb.mxu0 %v2868_v44  ;;  %2909 = vmatpush.msrb.mxu1 %v2869_v45  ;;  %v6581_v49 = vpop.permute.xlu1 %3157  ;;  %v3091_v62 = vpop.permute.xlu0 %3090 }
 0x77f   : > { %v3098_v32 = vsel %vm1088_vm6, %v3091_v62, %v6548_v6  ;;  %v3223_v34 = vpop.permute.xlu2 %3222  ;;  %v3100_v35 = vsel %vm1088_vm6, %v6548_v6, %v3091_v62 }
 0x780   : > { %2890 = vmatpush.msrb.mxu0 %v2866_v46  ;;  %2910 = vmatpush.msrb.mxu1 %v2867_v48  ;;  %v3102_v45 = vmul.f32 %v3098_v32, %v5814_v2 }
 0x785   : > { %5132 = vmatmul.msk.f32.vlgmr.msrb.gmra.mxu0 %vm2360_vm11, %v5131_v16  ;;  %5133 = vmatmul.msk.f32.vlgmr.msrb.gmra.mxu1 %vm2360_vm11, %v5131_v16 }
 0x786   : > { %v2983_v1 = vpop.permute.xlu1 %2982  ;;  %v2924_v15 = vpop.permute.xlu0 %2923 }
 0x787   : > { %v2989_v9 = vsel %vm960_vm5, %v2983_v1, %v2987_v14  ;;  %v2991_v17 = vsel %vm960_vm5, %v2987_v14, %v2983_v1  ;;  %v2926_v18 = vsel %vm886_vm0, %v2920_v4, %v2924_v15  ;;  %v2928_v5 = vsel %vm886_vm0, %v2924_v15, %v2920_v4  ;;  %v5134_v4 = vld [vmem:[%s7118_s9 + $0x10] sm:$0xff]  ;;  %v3286_v1 = vpop.permute.xlu2 %3285 }
 0x788   : > { %v2994_v30 = vmul.f32 %v2991_v17, %v5786_v54  ;;  %v2995_v60 = vmul.f32 %v2989_v9, %v5788_v55  ;;  %v2931_v59 = vmul.f32 %v2928_v5, %v5728_v28  ;;  %v2932_v8 = vmul.f32 %v2926_v18, %v5730_v29  ;;  %v5146_v17 = vld [vmem:[%s7118_s9 + $0x30] sm:$0xff] }
 0x789   : > { %v2992_v14 = vmul.f32 %v2990_v0, %v5786_v54 }
 0x78a   : > { %2952 = vmatpush.msra.mxu0 %v2931_v59  ;;  %2972 = vmatpush.msra.mxu1 %v2932_v8 }
 0x78b   : > { %3015 = vmatpush.msrb.mxu2 %v2994_v30  ;;  %3035 = vmatpush.msrb.mxu3 %v2995_v60 }
 0x78c   : > { %2953 = vmatpush.msra.mxu0 %v2929_v19  ;;  %2973 = vmatpush.msra.mxu1 %v2930_v20 }
 0x78d   : > { %3016 = vmatpush.msrb.mxu2 %v2992_v14  ;;  %3036 = vmatpush.msrb.mxu3 %v2993_v24  ;;  %v5149_v24 = vld [vmem:[%s7118_s9 + $0x38] sm:$0xff] }
 0x78e   : > { %5135 = vmatmul.msk.f32.vlgmr.msra.gmra.mxu0 %vm2360_vm11, %v5134_v4  ;;  %5136 = vmatmul.msk.f32.vlgmr.msra.gmra.mxu1 %vm2360_vm11, %v5134_v4  ;;  %v3093_v25 = vpop.permute.xlu1 %3092  ;;  %v3154_v31 = vpop.permute.xlu0 %3153 }
 0x78f   : > { %5138 = vmatmul.msk.f32.vlgmr.msrb.gmra.mxu2 %vm2360_vm11, %v5137_v47  ;;  %5139 = vmatmul.msk.f32.vlgmr.msrb.gmra.mxu3 %vm2360_vm11, %v5137_v47  ;;  %v3099_v33 = vsel %vm1088_vm6, %v3093_v25, %v3097_v41  ;;  %v3101_v61 = vsel %vm1088_vm6, %v3097_v41, %v3093_v25  ;;  %v3103_v41 = vmul.f32 %v3100_v35, %v5816_v3  ;;  %v2790_v4 = vpop.permute.xlu2 %2789 }
 0x790   : > { %3062 = vmatpush.msrb.mxu0 %v6491_v53  ;;  %3082 = vmatpush.msrb.mxu1 %v6483_v56  ;;  %v3104_v40 = vmul.f32 %v3099_v33, %v5814_v2  ;;  %v3105_v44 = vmul.f32 %v3101_v61, %v5816_v3  ;;  %v5140_v53 = vld [vmem:[%s7118_s9 + $0x20] sm:$0xff]  ;;  %v5143_v56 = vld [vmem:[%s7118_s9 + $0x28] sm:$0xff] }
 0x791   : > { %v5152_v61 = vld [vmem:[%s7118_s9 + $0x40] sm:$0xff] }
 0x792   : > { %3063 = vmatpush.msrb.mxu0 %v6467_v51  ;;  %3083 = vmatpush.msrb.mxu1 %v6469_v52  ;;  %v3161_v51 = vsel %vm1162_vm7, %v3154_v31, %v6581_v49  ;;  %v3163_v52 = vsel %vm1162_vm7, %v6581_v49, %v3154_v31 }
 0x793   : > { %3125 = vmatpush.msra.mxu2 %v3104_v40  ;;  %3145 = vmatpush.msra.mxu3 %v3105_v44  ;;  %v3165_v15 = vmul.f32 %v3161_v51, %v5835_v12  ;;  %v3166_v9 = vmul.f32 %v3163_v52, %v5837_v13 }
 0x795   : > { %3126 = vmatpush.msra.mxu2 %v3102_v45  ;;  %3146 = vmatpush.msra.mxu3 %v3103_v41 }
 0x796   : > { %5141 = vmatmul.msk.f32.vlgmr.msrb.gmra.mxu0 %vm2360_vm11, %v5140_v53  ;;  %5142 = vmatmul.msk.f32.vlgmr.msrb.gmra.mxu1 %vm2360_vm11, %v5140_v53  ;;  %v3219_v6 = vpop.permute.xlu1 %3218  ;;  %v3160_v46 = vpop.permute.xlu0 %3159 }
 0x797   : > { %5144 = vmatmul.msk.f32.vlgmr.msra.gmra.mxu2 %vm2360_vm11, %v5143_v56  ;;  %5145 = vmatmul.msk.f32.vlgmr.msra.gmra.mxu3 %vm2360_vm11, %v5143_v56  ;;  %v3225_v48 = vsel %vm1236_vm8, %v3219_v6, %v3223_v34  ;;  %v3227_v62 = vsel %vm1236_vm8, %v3223_v34, %v3219_v6  ;;  %v3162_v49 = vsel %vm1162_vm7, %v6586_v50, %v3160_v46  ;;  %v3405_v34 = vpop.permute.xlu2 %3404 }
 0x798   : > { %v3230_v16 = vmul.f32 %v3225_v48, %v5856_v21  ;;  %v3231_v57 = vmul.f32 %v3227_v62, %v5858_v23  ;;  %v3164_v58 = vsel %vm1162_vm7, %v3160_v46, %v6586_v50  ;;  %v3167_v63 = vmul.f32 %v3162_v49, %v5835_v12 }
 0x799   : > { %v3168_v0 = vmul.f32 %v3164_v58, %v5837_v13 }
 0x79a   : > { %3188 = vmatpush.msra.mxu0 %v3167_v63  ;;  %3251 = vmatpush.msrb.mxu2 %v3230_v16 }
 0x79b   : > { %3208 = vmatpush.msra.mxu1 %v3168_v0  ;;  %3271 = vmatpush.msrb.mxu3 %v3231_v57 }
 0x79c   : > { %3189 = vmatpush.msra.mxu0 %v3165_v15 }
 0x79d   : > { %3209 = vmatpush.msra.mxu1 %v3166_v9 }
 0x79e   : > { %5147 = vmatmul.msk.f32.vlgmr.msra.gmra.mxu0 %vm2360_vm11, %v5146_v17  ;;  %5148 = vmatmul.msk.f32.vlgmr.msra.gmra.mxu1 %vm2360_vm11, %v5146_v17  ;;  %v3282_v50 = vpop.permute.xlu1 %3281  ;;  %v3221_v18 = vpop.permute.xlu0 %3220 }
 0x79f   : > { %v3288_v5 = vsel %vm1310_vm9, %v3282_v50, %v3286_v1  ;;  %v3290_v30 = vsel %vm1310_vm9, %v3286_v1, %v3282_v50  ;;  %v3224_v60 = vsel %vm1236_vm8, %v6550_v7, %v3221_v18  ;;  %v3226_v59 = vsel %vm1236_vm8, %v3221_v18, %v6550_v7 }
 0x7a0   : > { %v3293_v8 = vmul.f32 %v3288_v5, %v5877_v36  ;;  %v3294_v19 = vmul.f32 %v3290_v30, %v5879_v37  ;;  %v3228_v20 = vmul.f32 %v3224_v60, %v5856_v21  ;;  %v3229_v14 = vmul.f32 %v3226_v59, %v5858_v23 }
 0x7a2   : > { %3252 = vmatpush.msrb.mxu2 %v3228_v20  ;;  %3272 = vmatpush.msrb.mxu3 %v3229_v14 }
 0x7a3   : > { %3314 = vmatpush.msrb.mxu0 %v3293_v8  ;;  %3334 = vmatpush.msrb.mxu1 %v3294_v19 }
 0x7a4   : > { %5150 = vmatmul.msk.f32.vlgmr.msrb.gmra.mxu2 %vm2360_vm11, %v5149_v24  ;;  %5151 = vmatmul.msk.f32.vlgmr.msrb.gmra.mxu3 %vm2360_vm11, %v5149_v24 }
 0x7a6   : > { %v3284_v7 = vpop.permute.xlu1 %3283  ;;  %v3280_v47 = vpop.permute.xlu0 %3279 }
 0x7a7   : > { %v3287_v25 = vsel %vm1310_vm9, %v3280_v47, %v3284_v7  ;;  %v3289_v31 = vsel %vm1310_vm9, %v3284_v7, %v3280_v47 }
 0x7a8   : > { %v3291_v32 = vmul.f32 %v3287_v25, %v5877_v36  ;;  %v3292_v33 = vmul.f32 %v3289_v31, %v5879_v37 }
 0x7aa   : > { %3315 = vmatpush.msrb.mxu0 %v3291_v32  ;;  %3335 = vmatpush.msrb.mxu1 %v3292_v33 }
 0x7ab   : > { %5153 = vmatmul.msk.f32.vlgmr.msrb.gmra.mxu0 %vm2360_vm11, %v5152_v61  ;;  %5154 = vmatmul.msk.f32.vlgmr.msrb.gmra.mxu1 %vm2360_vm11, %v5152_v61 }
 0x7ae   : > { %v3407_v35 = vpop.permute.xlu0 %3406 }
 0x7af   : > { %v3408_v40 = vsel %vm737_vm1, %v3405_v34, %v3407_v35  ;;  %v3409_v44 = vsel %vm737_vm1, %v3407_v35, %v3405_v34  ;;  %v3344_v35 = vld [vmem:[%s7122_s13] sm:$0xff] }
 0x7b0   : > { %v3410_v45 = vmul.f32 %v3409_v44, %v5724_v26  ;;  %v3411_v41 = vmul.f32 %v3408_v40, %v5726_v27  ;;  %v3412_v40 = vld [vmem:[%s7121_s12] sm:$0xff] }
 0x7b2   : > { %3431 = vmatpush.msra.mxu0 %v3410_v45  ;;  %3451 = vmatpush.msra.mxu1 %v3411_v41  ;;  %v3516_v45 = vpop.permute.xlu1 %3515 }
 0x7b3   : > { %5157 = vmatmul.msk.f32.vlgmr.msra.gmra.mxu0 %vm1390_vm10, %v3412_v40  ;;  %5158 = vmatmul.msk.f32.vlgmr.msra.gmra.mxu1 %vm1390_vm10, %v3412_v40 }
 0x7fa   : > { %v2829_v53 = vpop.f32.mrf.mxu0  ;;  %v2849_v56 = vpop.f32.mrf.mxu1 }
 0x7fb   : > { %v2852_v49 = vadd.f32 %v2829_v53, %v2790_v4  ;;  %v2853_v16 = vadd.f32 %v2849_v56, %v2790_v4 }
 0x802   : > { %v2892_v51 = vpop.f32.mrf.mxu0  ;;  %v2912_v52 = vpop.f32.mrf.mxu1 }
 0x803   : > { %v2915_v63 = vadd.f32 %v2892_v51, %v2852_v49  ;;  %v2916_v0 = vadd.f32 %v2912_v52, %v2853_v16 }
 0x80b   : > { %v2955_v6 = vpop.f32.mrf.mxu0  ;;  %v2975_v46 = vpop.f32.mrf.mxu1 }
 0x80c   : > { %v2978_v1 = vadd.f32 %v2955_v6, %v2915_v63  ;;  %v2979_v15 = vadd.f32 %v2975_v46, %v2916_v0 }
 0x812   : > { %v3018_v48 = vpop.f32.mrf.mxu2  ;;  %v3038_v62 = vpop.f32.mrf.mxu3 }
 0x813   : > { %v3065_v57 = vpop.f32.mrf.mxu0  ;;  %v3085_v58 = vpop.f32.mrf.mxu1  ;;  %v3041_v9 = vadd.f32 %v3018_v48, %v2978_v1  ;;  %v3042_v17 = vadd.f32 %v3038_v62, %v2979_v15  ;;  %v3358_v48 = vld [vmem:[%s7120_s11] sm:$0xff] }
 0x815   : > { %v3088_v5 = vadd.f32 %v3065_v57, %v3041_v9  ;;  %v3089_v30 = vadd.f32 %v3085_v58, %v3042_v17 }
 0x81a   : > { %v3128_v50 = vpop.f32.mrf.mxu2  ;;  %v3148_v18 = vpop.f32.mrf.mxu3 }
 0x81b   : > { %v3191_v60 = vpop.f32.mrf.mxu0  ;;  %v3211_v59 = vpop.f32.mrf.mxu1  ;;  %v3151_v8 = vadd.f32 %v3128_v50, %v3088_v5  ;;  %v3152_v19 = vadd.f32 %v3148_v18, %v3089_v30  ;;  %v5159_v50 = vld [vmem:[%s7120_s11 + $0x8] sm:$0xff] }
 0x81c   : > { %v5162_v18 = vld [vmem:[%s7121_s12 + $0x8] sm:$0xff] }
 0x81d   : > { %v3214_v20 = vadd.f32 %v3191_v60, %v3151_v8  ;;  %v3215_v14 = vadd.f32 %v3211_v59, %v3152_v19 }
 0x827   : > { %v3254_v24 = vpop.f32.mrf.mxu2  ;;  %v3274_v4 = vpop.f32.mrf.mxu3 }
 0x828   : > { %v3277_v7 = vadd.f32 %v3254_v24, %v3214_v20  ;;  %v3278_v47 = vadd.f32 %v3274_v4, %v3215_v14  ;;  %v3317_v25 = vpop.f32.mrf.mxu0  ;;  %v3337_v31 = vpop.f32.mrf.mxu1 }
 0x82a   : > { %v3340_v32 = vadd.f32 %v3317_v25, %v3277_v7  ;;  %v3341_v33 = vadd.f32 %v3337_v31, %v3278_v47  ;;  %v5165_v47 = vld [vmem:[%s7120_s11 + $0x10] sm:$0xff] }
 0x82b   : > { %v5168_v25 = vld [vmem:[%s7121_s12 + $0x10] sm:$0xff] }
 0x82c   : > { %v6715_v61 = vmax.f32 %v3340_v32, 0.0  ;;  %v6717_v34 = vmax.f32 %v3341_v33, 0.0 }
 0x82e   : > { %3460 = vrot.lane.b32.xlu2 %v6717_v34, %s7221_s3  ;;  %3352 = vrot.lane.b32.xlu1 %v6717_v34, %s7222_s24 }
 0x82f   : > { %3350 = vrot.lane.b32.xlu0 %v6715_v61, %s7222_s24 }
 0x836   : > { %3568 = vrot.lane.b32.xlu2 %v6715_v61, %s7223_s8  ;;  %3458 = vrot.lane.b32.xlu1 %v6715_v61, %s7221_s3 }
 0x837   : > { %3513 = vrot.lane.b32.xlu0 %v6006_v38, %s7221_s3 }
 0x83e   : > { %3625 = vrot.lane.b32.xlu2 %v6008_v39, %s7223_s8  ;;  %3623 = vrot.lane.b32.xlu1 %v6006_v38, %s7223_s8 }
 0x83f   : > { %3570 = vrot.lane.b32.xlu0 %v6717_v34, %s7223_s8 }
 0x846   : > { %3733 = vrot.lane.b32.xlu2 %v6006_v38, %s7215_s29  ;;  %3680 = vrot.lane.b32.xlu1 %v6717_v34, %s7215_s29 }
 0x847   : > { %3678 = vrot.lane.b32.xlu0 %v6715_v61, %s7215_s29 }
 0x84e   : > { %3884 = vrot.lane.b32.xlu2 %v6717_v34, %s7210_s0  ;;  %3882 = vrot.lane.b32.xlu1 %v6715_v61, %s7210_s0 }
 0x84f   : > { %3735 = vrot.lane.b32.xlu0 %v6008_v39, %s7215_s29 }
 0x856   : > { %4041 = vrot.lane.b32.xlu2 %v6006_v38, %s7224_s5  ;;  %3988 = vrot.lane.b32.xlu1 %v6717_v34, %s7224_s5 }
 0x857   : > { %4043 = vrot.lane.b32.xlu0 %v6008_v39, %s7224_s5 }
 0x85e   : > { %4098 = vrot.lane.b32.xlu2 %v6717_v34, %s7205_s2  ;;  %4096 = vrot.lane.b32.xlu1 %v6715_v61, %s7205_s2 }
 0x85f   : > { %3986 = vrot.lane.b32.xlu0 %v6715_v61, %s7224_s5 }
 0x866   : > { %4206 = vrot.lane.b32.xlu2 %v6715_v61, %s7225_s22  ;;  %4153 = vrot.lane.b32.xlu1 %v6008_v39, %s7205_s2 }
 0x867   : > { %4151 = vrot.lane.b32.xlu0 %v6006_v38, %s7205_s2 }
 0x86e   : > { %4263 = vrot.lane.b32.xlu2 %v6008_v39, %s7225_s22  ;;  %4261 = vrot.lane.b32.xlu1 %v6006_v38, %s7225_s22 }
 0x86f   : > { %4208 = vrot.lane.b32.xlu0 %v6717_v34, %s7225_s22 }
 0x877   : > { %3347 = vperm.xlu0 %5315, %v3344_v35  }
 0x888   : > { %v3461_v44 = vpop.permute.xlu2 %3460 }
 0x890   : > { %v3569_v41 = vpop.permute.xlu2 %3568 }
 0x898   : > { %v3626_v62 = vpop.permute.xlu2 %3625 }
 0x8a0   : > { %v3353_v53 = vpop.permute.xlu1 %3352  ;;  %v3734_v5 = vpop.permute.xlu2 %3733 }
 0x8a1   : > { %v3351_v56 = vpop.permute.xlu0 %3350 }
 0x8a2   : > { %v3354_v51 = vsel %vm737_vm1, %v3351_v56, %v3353_v53  ;;  %v3355_v52 = vsel %vm737_vm1, %v3353_v53, %v3351_v56 }
 0x8a3   : > { %v3356_v6 = vmul.f32 %v3355_v52, %v5724_v26  ;;  %v3357_v46 = vmul.f32 %v3354_v51, %v5726_v27 }
 0x8a5   : > { %3377 = vmatpush.msra.mxu2 %v3356_v6  ;;  %3397 = vmatpush.msra.mxu3 %v3357_v46 }
 0x8a6   : > { %5155 = vmatmul.msk.f32.vlgmr.msra.gmra.mxu2 %vm1390_vm10, %v3358_v48  ;;  %5156 = vmatmul.msk.f32.vlgmr.msra.gmra.mxu3 %vm1390_vm10, %v3358_v48 }
 0x8a8   : > { %v3459_v49 = vpop.permute.xlu1 %3458  ;;  %v3885_v31 = vpop.permute.xlu2 %3884 }
 0x8a9   : > { %v3462_v16 = vsel %vm812_vm4, %v3459_v49, %v3461_v44  ;;  %v3463_v57 = vsel %vm812_vm4, %v3461_v44, %v3459_v49  ;;  %v3514_v58 = vpop.permute.xlu0 %3513 }
 0x8aa   : > { %v3464_v63 = vmul.f32 %v3463_v57, %v5755_v42  ;;  %v3465_v0 = vmul.f32 %v3462_v16, %v5757_v43  ;;  %v3517_v1 = vsel %vm812_vm4, %v3514_v58, %v3516_v45  ;;  %v3518_v15 = vsel %vm812_vm4, %v3516_v45, %v3514_v58  ;;  %v5174_v16 = vld [vmem:[%s7121_s12 + $0x18] sm:$0xff]  ;;  %v5177_v57 = vld [vmem:[%s7120_s11 + $0x20] sm:$0xff] }
 0x8ab   : > { %v3519_v9 = vmul.f32 %v3518_v15, %v5755_v42  ;;  %v3520_v17 = vmul.f32 %v3517_v1, %v5757_v43  ;;  %v3937_v58 = vmul.f32 %v6094_v10, %v5814_v2 }
 0x8ac   : > { %3486 = vmatpush.msrb.mxu2 %v3464_v63  ;;  %3506 = vmatpush.msrb.mxu3 %v3465_v0  ;;  %v3938_v63 = vmul.f32 %v6098_v11, %v5816_v3  ;;  %v5180_v11 = vld [vmem:[%s7121_s12 + $0x20] sm:$0xff] }
 0x8ad   : > { %3541 = vmatpush.msrb.mxu0 %v3519_v9  ;;  %3561 = vmatpush.msrb.mxu1 %v3520_v17 }
 0x8ae   : > { %5160 = vmatmul.msk.f32.vlgmr.msrb.gmra.mxu2 %vm1390_vm10, %v5159_v50  ;;  %5161 = vmatmul.msk.f32.vlgmr.msrb.gmra.mxu3 %vm1390_vm10, %v5159_v50 }
 0x8af   : > { %5163 = vmatmul.msk.f32.vlgmr.msrb.gmra.mxu0 %vm1390_vm10, %v5162_v18  ;;  %5164 = vmatmul.msk.f32.vlgmr.msrb.gmra.mxu1 %vm1390_vm10, %v5162_v18 }
 0x8b0   : > { %v3624_v30 = vpop.permute.xlu1 %3623  ;;  %v4042_v6 = vpop.permute.xlu2 %4041 }
 0x8b1   : > { %v3627_v60 = vsel %vm886_vm0, %v3624_v30, %v3626_v62  ;;  %v3628_v59 = vsel %vm886_vm0, %v3626_v62, %v3624_v30  ;;  %v3571_v8 = vpop.permute.xlu0 %3570 }
 0x8b2   : > { %v3629_v19 = vmul.f32 %v3628_v59, %v5728_v28  ;;  %v3630_v20 = vmul.f32 %v3627_v60, %v5730_v29  ;;  %v3572_v14 = vsel %vm886_vm0, %v3569_v41, %v3571_v8  ;;  %v3573_v24 = vsel %vm886_vm0, %v3571_v8, %v3569_v41  ;;  %v5171_v41 = vld [vmem:[%s7120_s11 + $0x18] sm:$0xff] }
 0x8b3   : > { %v3574_v4 = vmul.f32 %v3573_v24, %v5728_v28  ;;  %v3575_v7 = vmul.f32 %v3572_v14, %v5730_v29 }
 0x8b4   : > { %3651 = vmatpush.msra.mxu0 %v3629_v19  ;;  %3671 = vmatpush.msra.mxu1 %v3630_v20  ;;  %v5186_v20 = vld [vmem:[%s7121_s12 + $0x28] sm:$0xff] }
 0x8b5   : > { %3596 = vmatpush.msra.mxu2 %v3574_v4  ;;  %3616 = vmatpush.msra.mxu3 %v3575_v7  ;;  %v5189_v4 = vld [vmem:[%s7120_s11 + $0x30] sm:$0xff] }
 0x8b6   : > { %5166 = vmatmul.msk.f32.vlgmr.msra.gmra.mxu2 %vm1390_vm10, %v5165_v47  ;;  %5167 = vmatmul.msk.f32.vlgmr.msra.gmra.mxu3 %vm1390_vm10, %v5165_v47 }
 0x8b7   : > { %5169 = vmatmul.msk.f32.vlgmr.msra.gmra.mxu0 %vm1390_vm10, %v5168_v25  ;;  %5170 = vmatmul.msk.f32.vlgmr.msra.gmra.mxu1 %vm1390_vm10, %v5168_v25 }
 0x8b8   : > { %v3681_v32 = vpop.permute.xlu1 %3680  ;;  %v4099_v9 = vpop.permute.xlu2 %4098 }
 0x8b9   : > { %v3679_v33 = vpop.permute.xlu0 %3678 }
 0x8ba   : > { %v3682_v35 = vsel %vm960_vm5, %v3679_v33, %v3681_v32  ;;  %v3683_v40 = vsel %vm960_vm5, %v3681_v32, %v3679_v33 }
 0x8bb   : > { %v3684_v44 = vmul.f32 %v3683_v40, %v5786_v54  ;;  %v3685_v45 = vmul.f32 %v3682_v35, %v5788_v55  ;;  %v5192_v40 = vld [vmem:[%s7121_s12 + $0x30] sm:$0xff] }
 0x8bd   : > { %3706 = vmatpush.msrb.mxu2 %v3684_v44  ;;  %3726 = vmatpush.msrb.mxu3 %v3685_v45  ;;  %v5195_v44 = vld [vmem:[%s7120_s11 + $0x38] sm:$0xff] }
 0x8be   : > { %5172 = vmatmul.msk.f32.vlgmr.msrb.gmra.mxu2 %vm1390_vm10, %v5171_v41  ;;  %5173 = vmatmul.msk.f32.vlgmr.msrb.gmra.mxu3 %vm1390_vm10, %v5171_v41 }
 0x8bf   : > { %3808 = vmatpush.msra.mxu2 %v6715_v61  ;;  %3828 = vmatpush.msra.mxu3 %v6717_v34 }
 0x8c0   : > { %v3883_v53 = vpop.permute.xlu1 %3882  ;;  %v4207_v7 = vpop.permute.xlu2 %4206 }
 0x8c1   : > { %v3886_v56 = vsel %vm1088_vm6, %v3883_v53, %v3885_v31  ;;  %v3887_v51 = vsel %vm1088_vm6, %v3885_v31, %v3883_v53  ;;  %v3736_v52 = vpop.permute.xlu0 %3735 }
 0x8c2   : > { %v3888_v46 = vmul.f32 %v3886_v56, %v5814_v2  ;;  %v3889_v48 = vmul.f32 %v3887_v51, %v5816_v3  ;;  %v3737_v62 = vsel %vm960_vm5, %v3734_v5, %v3736_v52  ;;  %v3738_v61 = vsel %vm960_vm5, %v3736_v52, %v3734_v5 }
 0x8c3   : > { %v3739_v34 = vmul.f32 %v3738_v61, %v5786_v54  ;;  %v3740_v49 = vmul.f32 %v3737_v62, %v5788_v55 }
 0x8c4   : > { %3910 = vmatpush.msrb.mxu2 %v3888_v46  ;;  %3930 = vmatpush.msrb.mxu3 %v3889_v48 }
 0x8c5   : > { %3761 = vmatpush.msrb.mxu0 %v3739_v34  ;;  %3781 = vmatpush.msrb.mxu1 %v3740_v49  ;;  %v5198_v34 = vld [vmem:[%s7121_s12 + $0x38] sm:$0xff]  ;;  %v5201_v49 = vld [vmem:[%s7120_s11 + $0x40] sm:$0xff] }
 0x8c6   : > { %5175 = vmatmul.msk.f32.vlgmr.msrb.gmra.mxu0 %vm1390_vm10, %v5174_v16  ;;  %5176 = vmatmul.msk.f32.vlgmr.msrb.gmra.mxu1 %vm1390_vm10, %v5174_v16  ;;  %v5204_v16 = vld [vmem:[%s7121_s12 + $0x40] sm:$0xff] }
 0x8c7   : > { %5178 = vmatmul.msk.f32.vlgmr.msra.gmra.mxu2 %vm1390_vm10, %v5177_v57  ;;  %5179 = vmatmul.msk.f32.vlgmr.msra.gmra.mxu3 %vm1390_vm10, %v5177_v57  ;;  %v3433_v57 = vpop.f32.mrf.mxu0 }
 0x8c8   : > { %3855 = vmatpush.msra.mxu0 %v6006_v38  ;;  %3875 = vmatpush.msra.mxu1 %v6008_v39  ;;  %v3989_v0 = vpop.permute.xlu1 %3988  ;;  %v5183_v39 = vld [vmem:[%s7120_s11 + $0x28] sm:$0xff]  ;;  %v4264_v45 = vpop.permute.xlu2 %4263 }
 0x8c9   : > { %v4044_v1 = vpop.permute.xlu0 %4043 }
 0x8ca   : > { %3959 = vmatpush.msrb.mxu0 %v3937_v58  ;;  %3979 = vmatpush.msrb.mxu1 %v3938_v63  ;;  %v4045_v15 = vsel %vm1162_vm7, %v4042_v6, %v4044_v1  ;;  %v4046_v10 = vsel %vm1162_vm7, %v4044_v1, %v4042_v6  ;;  %v3453_v58 = vpop.f32.mrf.mxu1 }
 0x8cb   : > { %v4047_v17 = vmul.f32 %v4045_v15, %v5835_v12  ;;  %v4048_v38 = vmul.f32 %v4046_v10, %v5837_v13 }
 0x8ce   : > { %5181 = vmatmul.msk.f32.vlgmr.msra.gmra.mxu0 %vm1390_vm10, %v5180_v11  ;;  %5182 = vmatmul.msk.f32.vlgmr.msra.gmra.mxu1 %vm1390_vm10, %v5180_v11 }
 0x8cf   : > { %5184 = vmatmul.msk.f32.vlgmr.msrb.gmra.mxu2 %vm1390_vm10, %v5183_v39  ;;  %5185 = vmatmul.msk.f32.vlgmr.msrb.gmra.mxu3 %vm1390_vm10, %v5183_v39 }
 0x8d0   : > { %4069 = vmatpush.msra.mxu0 %v4047_v17  ;;  %4089 = vmatpush.msra.mxu1 %v4048_v38  ;;  %v4097_v50 = vpop.permute.xlu1 %4096 }
 0x8d1   : > { %v4100_v18 = vsel %vm1236_vm8, %v4097_v50, %v4099_v9  ;;  %v4101_v5 = vsel %vm1236_vm8, %v4099_v9, %v4097_v50  ;;  %v3987_v30 = vpop.permute.xlu0 %3986 }
 0x8d2   : > { %v3990_v60 = vsel %vm1162_vm7, %v3987_v30, %v3989_v0  ;;  %v3991_v59 = vsel %vm1162_vm7, %v3989_v0, %v3987_v30  ;;  %v4102_v14 = vmul.f32 %v4100_v18, %v5856_v21  ;;  %v4103_v24 = vmul.f32 %v4101_v5, %v5858_v23 }
 0x8d3   : > { %v3992_v8 = vmul.f32 %v3990_v60, %v5835_v12  ;;  %v3993_v19 = vmul.f32 %v3991_v59, %v5837_v13 }
 0x8d5   : > { %4014 = vmatpush.msra.mxu2 %v3992_v8  ;;  %4034 = vmatpush.msra.mxu3 %v3993_v19 }
 0x8d6   : > { %5187 = vmatmul.msk.f32.vlgmr.msrb.gmra.mxu0 %vm1390_vm10, %v5186_v20  ;;  %5188 = vmatmul.msk.f32.vlgmr.msrb.gmra.mxu1 %vm1390_vm10, %v5186_v20 }
 0x8d7   : > { %5190 = vmatmul.msk.f32.vlgmr.msra.gmra.mxu2 %vm1390_vm10, %v5189_v4  ;;  %5191 = vmatmul.msk.f32.vlgmr.msra.gmra.mxu3 %vm1390_vm10, %v5189_v4 }
 0x8d8   : > { %4124 = vmatpush.msrb.mxu2 %v4102_v14  ;;  %4144 = vmatpush.msrb.mxu3 %v4103_v24  ;;  %v4154_v47 = vpop.permute.xlu1 %4153 }
 0x8d9   : > { %v4152_v25 = vpop.permute.xlu0 %4151 }
 0x8da   : > { %v4155_v31 = vsel %vm1236_vm8, %v4152_v25, %v4154_v47  ;;  %v4156_v32 = vsel %vm1236_vm8, %v4154_v47, %v4152_v25 }
 0x8db   : > { %v4157_v33 = vmul.f32 %v4155_v31, %v5856_v21  ;;  %v4158_v35 = vmul.f32 %v4156_v32, %v5858_v23 }
 0x8dd   : > { %4179 = vmatpush.msrb.mxu0 %v4157_v33  ;;  %4199 = vmatpush.msrb.mxu1 %v4158_v35 }
 0x8de   : > { %5193 = vmatmul.msk.f32.vlgmr.msra.gmra.mxu0 %vm1390_vm10, %v5192_v40  ;;  %5194 = vmatmul.msk.f32.vlgmr.msra.gmra.mxu1 %vm1390_vm10, %v5192_v40 }
 0x8df   : > { %5196 = vmatmul.msk.f32.vlgmr.msrb.gmra.mxu2 %vm1390_vm10, %v5195_v44  ;;  %5197 = vmatmul.msk.f32.vlgmr.msrb.gmra.mxu3 %vm1390_vm10, %v5195_v44 }
 0x8e0   : > { %v4262_v41 = vpop.permute.xlu1 %4261 }
 0x8e1   : > { %v4265_v53 = vsel %vm1310_vm9, %v4262_v41, %v4264_v45  ;;  %v4266_v56 = vsel %vm1310_vm9, %v4264_v45, %v4262_v41  ;;  %v4209_v51 = vpop.permute.xlu0 %4208 }
 0x8e2   : > { %v4267_v52 = vmul.f32 %v4265_v53, %v5877_v36  ;;  %v4268_v6 = vmul.f32 %v4266_v56, %v5879_v37  ;;  %v4210_v46 = vsel %vm1310_vm9, %v4207_v7, %v4209_v51  ;;  %v4211_v48 = vsel %vm1310_vm9, %v4209_v51, %v4207_v7 }
 0x8e3   : > { %v4212_v62 = vmul.f32 %v4210_v46, %v5877_v36  ;;  %v4213_v61 = vmul.f32 %v4211_v48, %v5879_v37 }
 0x8e4   : > { %4289 = vmatpush.msra.mxu0 %v4267_v52  ;;  %4309 = vmatpush.msra.mxu1 %v4268_v6 }
 0x8e5   : > { %4234 = vmatpush.msra.mxu2 %v4212_v62  ;;  %4254 = vmatpush.msra.mxu3 %v4213_v61 }
 0x8e6   : > { %5199 = vmatmul.msk.f32.vlgmr.msrb.gmra.mxu0 %vm1390_vm10, %v5198_v34  ;;  %5200 = vmatmul.msk.f32.vlgmr.msrb.gmra.mxu1 %vm1390_vm10, %v5198_v34 }
 0x8e7   : > { %5202 = vmatmul.msk.f32.vlgmr.msra.gmra.mxu2 %vm1390_vm10, %v5201_v49  ;;  %5203 = vmatmul.msk.f32.vlgmr.msra.gmra.mxu3 %vm1390_vm10, %v5201_v49 }
 0x8e9   : > { %v3348_v50 = vpop.permute.xlu0 %3347 }
 0x8ee   : > { %5205 = vmatmul.msk.f32.vlgmr.msra.gmra.mxu0 %vm1390_vm10, %v5204_v16  ;;  %5206 = vmatmul.msk.f32.vlgmr.msra.gmra.mxu1 %vm1390_vm10, %v5204_v16 }
 0x929   : > { %v3379_v63 = vpop.f32.mrf.mxu2  ;;  %v3399_v0 = vpop.f32.mrf.mxu3 }
 0x92a   : > { %v3402_v18 = vadd.f32 %v3379_v63, %v3348_v50  ;;  %v3403_v5 = vadd.f32 %v3399_v0, %v3348_v50 }
 0x92c   : > { %v3543_v1 = vpop.f32.mrf.mxu0  ;;  %v3563_v15 = vpop.f32.mrf.mxu1  ;;  %v3456_v30 = vadd.f32 %v3433_v57, %v3402_v18  ;;  %v3457_v60 = vadd.f32 %v3453_v58, %v3403_v5 }
 0x931   : > { %v3488_v10 = vpop.f32.mrf.mxu2  ;;  %v3508_v11 = vpop.f32.mrf.mxu3 }
 0x932   : > { %v3511_v59 = vadd.f32 %v3488_v10, %v3456_v30  ;;  %v3512_v8 = vadd.f32 %v3508_v11, %v3457_v60 }
 0x934   : > { %v3653_v9 = vpop.f32.mrf.mxu0  ;;  %v3673_v17 = vpop.f32.mrf.mxu1  ;;  %v3566_v4 = vadd.f32 %v3543_v1, %v3511_v59  ;;  %v3567_v7 = vadd.f32 %v3563_v15, %v3512_v8 }
 0x939   : > { %v3598_v38 = vpop.f32.mrf.mxu2  ;;  %v3618_v39 = vpop.f32.mrf.mxu3 }
 0x93a   : > { %v3621_v47 = vadd.f32 %v3598_v38, %v3566_v4  ;;  %v3622_v25 = vadd.f32 %v3618_v39, %v3567_v7 }
 0x93c   : > { %v3676_v33 = vadd.f32 %v3653_v9, %v3621_v47  ;;  %v3677_v35 = vadd.f32 %v3673_v17, %v3622_v25 }
 0x941   : > { %v3708_v19 = vpop.f32.mrf.mxu2  ;;  %v3728_v20 = vpop.f32.mrf.mxu3 }
 0x942   : > { %v3731_v45 = vadd.f32 %v3708_v19, %v3676_v33  ;;  %v3732_v41 = vadd.f32 %v3728_v20, %v3677_v35  ;;  %v4813_v33 = vld [vmem:[%s7226_s1] sm:$0x3] }
 0x943   : > { %v3763_v14 = vpop.f32.mrf.mxu0  ;;  %v3783_v24 = vpop.f32.mrf.mxu1 }
 0x944   : > { %v3786_v53 = vadd.f32 %v3763_v14, %v3731_v45  ;;  %v3787_v56 = vadd.f32 %v3783_v24, %v3732_v41 }
 0x94a   : > { %v3810_v31 = vpop.f32.mrf.mxu2  ;;  %v3830_v32 = vpop.f32.mrf.mxu3 }
 0x94b   : > { %v3857_v40 = vpop.f32.mrf.mxu0  ;;  %v3877_v44 = vpop.f32.mrf.mxu1  ;;  %v3833_v6 = vadd.f32 %v3810_v31, %v3786_v53  ;;  %v3834_v46 = vadd.f32 %v3830_v32, %v3787_v56  ;;  %v4318_v32 = vld [vmem:[%s7124_s15] sm:$0xff] }
 0x94d   : > { %v3880_v61 = vadd.f32 %v3857_v40, %v3833_v6  ;;  %v3881_v34 = vadd.f32 %v3877_v44, %v3834_v46 }
 0x952   : > { %v3912_v51 = vpop.f32.mrf.mxu2  ;;  %v3932_v52 = vpop.f32.mrf.mxu3 }
 0x953   : > { %v3961_v48 = vpop.f32.mrf.mxu0  ;;  %v3981_v62 = vpop.f32.mrf.mxu1  ;;  %v3935_v49 = vadd.f32 %v3912_v51, %v3880_v61  ;;  %v3936_v16 = vadd.f32 %v3932_v52, %v3881_v34 }
 0x955   : > { %v3984_v1 = vadd.f32 %v3961_v48, %v3935_v49  ;;  %v3985_v15 = vadd.f32 %v3981_v62, %v3936_v16 }
 0x95a   : > { %v4016_v57 = vpop.f32.mrf.mxu2  ;;  %v4036_v58 = vpop.f32.mrf.mxu3 }
 0x95b   : > { %v4071_v63 = vpop.f32.mrf.mxu0  ;;  %v4091_v0 = vpop.f32.mrf.mxu1  ;;  %v4039_v10 = vadd.f32 %v4016_v57, %v3984_v1  ;;  %v4040_v11 = vadd.f32 %v4036_v58, %v3985_v15 }
 0x95d   : > { %v4094_v38 = vadd.f32 %v4071_v63, %v4039_v10  ;;  %v4095_v39 = vadd.f32 %v4091_v0, %v4040_v11 }
 0x962   : > { %v4126_v9 = vpop.f32.mrf.mxu2  ;;  %v4146_v17 = vpop.f32.mrf.mxu3 }
 0x963   : > { %v4181_v50 = vpop.f32.mrf.mxu0  ;;  %v4201_v18 = vpop.f32.mrf.mxu1  ;;  %v4149_v5 = vadd.f32 %v4126_v9, %v4094_v38  ;;  %v4150_v30 = vadd.f32 %v4146_v17, %v4095_v39 }
 0x965   : > { %v4204_v60 = vadd.f32 %v4181_v50, %v4149_v5  ;;  %v4205_v59 = vadd.f32 %v4201_v18, %v4150_v30 }
 0x96a   : > { %v4236_v8 = vpop.f32.mrf.mxu2  ;;  %v4256_v19 = vpop.f32.mrf.mxu3 }
 0x96b   : > { %v4259_v20 = vadd.f32 %v4236_v8, %v4204_v60  ;;  %v4260_v14 = vadd.f32 %v4256_v19, %v4205_v59  ;;  %v4291_v24 = vpop.f32.mrf.mxu0  ;;  %v4311_v4 = vpop.f32.mrf.mxu1 }
 0x96d   : > { %v4314_v7 = vadd.f32 %v4291_v24, %v4259_v20  ;;  %v4315_v47 = vadd.f32 %v4311_v4, %v4260_v14 }
 0x96f   : > { %v4316_v25 = vmax.f32 %v4314_v7, 0.0  ;;  %v4317_v31 = vmax.f32 %v4315_v47, 0.0 }
 0x971   : > { %4326 = vrot.lane.b32.xlu2 %v4317_v31, %s7222_s24  ;;  %4433 = vrot.lane.b32.xlu0 %v4316_v25, %s7223_s8 }
 0x972   : > { %4324 = vrot.lane.b32.xlu1 %v4316_v25, %s7222_s24 }
 0x979   : > { %4378 = vrot.lane.b32.xlu2 %v4316_v25, %s7221_s3  ;;  %4380 = vrot.lane.b32.xlu0 %v4317_v31, %s7221_s3  ;;  %s7228_s3 = sld [smem:[#allocation29_spill]] }
 0x97a   : > { %4435 = vrot.lane.b32.xlu1 %v4317_v31, %s7223_s8 }
 0x97f   : > { %s7229_s24 = smov %s7228_s3  ;;  %s4881_s8 = scalar_lea.hbm %s7228_s3, %s5241_s6 }
 0x981   : > { %4490 = vrot.lane.b32.xlu2 %v4317_v31, %s7215_s29  ;;  %4645 = vrot.lane.b32.xlu0 %v4316_v25, %s7224_s5 }
 0x982   : > { %4488 = vrot.lane.b32.xlu1 %v4316_v25, %s7215_s29 }
 0x989   : > { %4590 = vrot.lane.b32.xlu2 %v4316_v25, %s7210_s0  ;;  %4592 = vrot.lane.b32.xlu0 %v4317_v31, %s7210_s0  ;;  %s716_s0 = scalar_lea.vmem [#allocation7], %s4976_s27  ;;  %s5410_s27 = scalar_lea.hbm %s7229_s24, 8 }
 0x98a   : > { %4647 = vrot.lane.b32.xlu1 %v4317_v31, %s7224_s5  ;;  %s7227_s5 = sld [smem:[#allocation26_spill]]  ;;  %s4883_s29 = sshll.u32 %s716_s0, 4  ;;  %s4884_s29 = int_to_ptr.vmem [resolvable:$true] %s4883_s29 }
 0x990   : > { %v4332_v52 = vld [vmem:[%s7227_s5] sm:$0xff]  ;;  %v5209_v57 = vld [vmem:[%s7227_s5 + $0x8] sm:$0xff]  ;;  %v5215_v15 = vld [vmem:[%s7227_s5 + $0x18] sm:$0xff] }
 0x991   : > { %4757 = vrot.lane.b32.xlu2 %v4317_v31, %s7225_s22  ;;  %4700 = vrot.lane.b32.xlu0 %v4316_v25, %s7205_s2  ;;  %v5218_v10 = vld [vmem:[%s7227_s5 + $0x20] sm:$0xff]  ;;  %v5221_v60 = vld [vmem:[%s7227_s5 + $0x28] sm:$0xff] }
 0x992   : > { %4755 = vrot.lane.b32.xlu1 %v4316_v25, %s7225_s22  ;;  %v5230_v20 = vld [vmem:[%s7227_s5 + $0x40] sm:$0xff]  ;;  %v5227_v47 = vld [vmem:[%s7227_s5 + $0x38] sm:$0xff] }
 0x999   : > { %4321 = vperm.xlu2 %5321, %v4318_v32   ;;  %4816 = vperm.xlu0 %5315, %v4813_v33  }
 0x99a   : > { %4702 = vrot.lane.b32.xlu1 %v4317_v31, %s7205_s2  ;;  %s4885_s2 = sshll.u32 %s4881_s8, 4  ;;  %s4886_s2 = int_to_ptr.hbm [resolvable:$true] %s4885_s2 }
 0x99b   : > { %s5404_s22 = sshra.s32 %s4886_s2, 4  ;;  %s5405_s22 = int_to_ptr.hbm [resolvable:$true] %s5404_s22 }
 0x99c   : > { %s5406_s23 = scalar_lea.hbm %s5405_s22, 4  ;;  %p5411_p9 = scmp.lt.s32.totalorder %s5405_s22, %s7229_s24 }
 0x99d   : > { %p5407_p1 = scmp.ne.s32.totalorder %s5405_s22, %s5406_s23  ;;  %p5412_p10 = scmp.lt.s32.totalorder %s5410_s27, %s5406_s23 }
 0x99f   : > { %p5408_p4 = pnand %p5407_p1, %p5659_p3  ;;  %p5413_p2 = por %p5412_p10, %p5411_p9 }
 0x9a1   : > { %p5409_p8 = pneg %p5408_p4 }
 0x9a3   : > { %p5414_p11 = pnand %p5413_p2, %p5409_p8 }
 0x9cb   : > { %v4327_v35 = vpop.permute.xlu2 %4326 }
 0x9d3   : > { %v4379_v53 = vpop.permute.xlu2 %4378 }
 0x9e3   : > { %v4434_v40 = vpop.permute.xlu0 %4433 }
 0x9e4   : > { %v4325_v44 = vpop.permute.xlu1 %4324 }
 0x9e5   : > { %v4328_v45 = vsel %vm737_vm1, %v4325_v44, %v4327_v35  ;;  %v4329_v41 = vsel %vm737_vm1, %v4327_v35, %v4325_v44 }
 0x9e6   : > { %v4330_v56 = vmul.f32 %v4329_v41, %v5724_v26  ;;  %v4331_v51 = vmul.f32 %v4328_v45, %v5726_v27 }
 0x9e8   : > { %4351 = vmatpush.msrb.mxu2 %v4330_v56  ;;  %4371 = vmatpush.msrb.mxu3 %v4331_v51 }
 0x9e9   : > { %5207 = vmatmul.msk.f32.vlgmr.msrb.gmra.mxu2 %vm1390_vm10, %v4332_v52  ;;  %5208 = vmatmul.msk.f32.vlgmr.msrb.gmra.mxu3 %vm1390_vm10, %v4332_v52 }
 0x9eb   : > { %v4381_v6 = vpop.permute.xlu0 %4380 }
 0x9ec   : > { %v4382_v46 = vsel %vm812_vm4, %v4379_v53, %v4381_v6  ;;  %v4383_v48 = vsel %vm812_vm4, %v4381_v6, %v4379_v53  ;;  %v4436_v26 = vpop.permute.xlu1 %4435 }
 0x9ed   : > { %v4384_v27 = vmul.f32 %v4383_v48, %v5755_v42  ;;  %v4385_v62 = vmul.f32 %v4382_v46, %v5757_v43  ;;  %v4437_v61 = vsel %vm886_vm0, %v4434_v40, %v4436_v26  ;;  %v4438_v34 = vsel %vm886_vm0, %v4436_v26, %v4434_v40  ;;  %v5212_v42 = vld [vmem:[%s7227_s5 + $0x10] sm:$0xff]  ;;  %v4491_v43 = vpop.permute.xlu2 %4490 }
 0x9ee   : > { %v4439_v49 = vmul.f32 %v4438_v34, %v5728_v28  ;;  %v4440_v16 = vmul.f32 %v4437_v61, %v5730_v29 }
 0x9ef   : > { %4406 = vmatpush.msrb.mxu0 %v4384_v27  ;;  %4426 = vmatpush.msrb.mxu1 %v4385_v62 }
 0x9f0   : > { %4461 = vmatpush.msra.mxu2 %v4439_v49  ;;  %4481 = vmatpush.msra.mxu3 %v4440_v16 }
 0x9f1   : > { %5210 = vmatmul.msk.f32.vlgmr.msrb.gmra.mxu0 %vm1390_vm10, %v5209_v57  ;;  %5211 = vmatmul.msk.f32.vlgmr.msrb.gmra.mxu1 %vm1390_vm10, %v5209_v57 }
 0x9f2   : > { %5213 = vmatmul.msk.f32.vlgmr.msra.gmra.mxu2 %vm1390_vm10, %v5212_v42  ;;  %5214 = vmatmul.msk.f32.vlgmr.msra.gmra.mxu3 %vm1390_vm10, %v5212_v42 }
 0x9f3   : > { %4563 = vmatpush.msrb.mxu2 %v4316_v25  ;;  %4583 = vmatpush.msrb.mxu3 %v4317_v31  ;;  %v4646_v28 = vpop.permute.xlu0 %4645 }
 0x9f4   : > { %v4489_v29 = vpop.permute.xlu1 %4488 }
 0x9f5   : > { %v4492_v58 = vsel %vm960_vm5, %v4489_v29, %v4491_v43  ;;  %v4493_v63 = vsel %vm960_vm5, %v4491_v43, %v4489_v29  ;;  %v4591_v11 = vpop.permute.xlu2 %4590 }
 0x9f6   : > { %v4494_v0 = vmul.f32 %v4493_v63, %v5786_v54  ;;  %v4495_v1 = vmul.f32 %v4492_v58, %v5788_v55 }
 0x9f8   : > { %4516 = vmatpush.msra.mxu0 %v4494_v0  ;;  %4536 = vmatpush.msra.mxu1 %v4495_v1 }
 0x9f9   : > { %5216 = vmatmul.msk.f32.vlgmr.msra.gmra.mxu0 %vm1390_vm10, %v5215_v15  ;;  %5217 = vmatmul.msk.f32.vlgmr.msra.gmra.mxu1 %vm1390_vm10, %v5215_v15 }
 0x9fa   : > { %5219 = vmatmul.msk.f32.vlgmr.msrb.gmra.mxu2 %vm1390_vm10, %v5218_v10  ;;  %5220 = vmatmul.msk.f32.vlgmr.msrb.gmra.mxu3 %vm1390_vm10, %v5218_v10 }
 0x9fb   : > { %v4593_v54 = vpop.permute.xlu0 %4592 }
 0x9fc   : > { %v4594_v55 = vsel %vm1088_vm6, %v4591_v11, %v4593_v54  ;;  %v4595_v9 = vsel %vm1088_vm6, %v4593_v54, %v4591_v11  ;;  %v4648_v17 = vpop.permute.xlu1 %4647 }
 0x9fd   : > { %v4596_v38 = vmul.f32 %v4594_v55, %v5814_v2  ;;  %v4597_v39 = vmul.f32 %v4595_v9, %v5816_v3  ;;  %v4649_v50 = vsel %vm1162_vm7, %v4646_v28, %v4648_v17  ;;  %v4650_v18 = vsel %vm1162_vm7, %v4648_v17, %v4646_v28  ;;  %v5224_v2 = vld [vmem:[%s7227_s5 + $0x30] sm:$0xff]  ;;  %v4758_v3 = vpop.permute.xlu2 %4757  ;;  %v4812_v55 = vld [vmem:[#allocation5] sm:$0x3] }
 0x9fe   : > { %v4651_v5 = vmul.f32 %v4649_v50, %v5835_v12  ;;  %v4652_v30 = vmul.f32 %v4650_v18, %v5837_v13 }
 0x9ff   : > { %4618 = vmatpush.msrb.mxu0 %v4596_v38  ;;  %4638 = vmatpush.msrb.mxu1 %v4597_v39 }
 0xa00   : > { %4673 = vmatpush.msra.mxu2 %v4651_v5  ;;  %4693 = vmatpush.msra.mxu3 %v4652_v30 }
 0xa01   : > { %5222 = vmatmul.msk.f32.vlgmr.msrb.gmra.mxu0 %vm1390_vm10, %v5221_v60  ;;  %5223 = vmatmul.msk.f32.vlgmr.msrb.gmra.mxu1 %vm1390_vm10, %v5221_v60 }
 0xa02   : > { %5225 = vmatmul.msk.f32.vlgmr.msra.gmra.mxu2 %vm1390_vm10, %v5224_v2  ;;  %5226 = vmatmul.msk.f32.vlgmr.msra.gmra.mxu3 %vm1390_vm10, %v5224_v2 }
 0xa03   : > { %v4701_v14 = vpop.permute.xlu0 %4700 }
 0xa04   : > { %v4756_v12 = vpop.permute.xlu1 %4755 }
 0xa05   : > { %v4759_v13 = vsel %vm1310_vm9, %v4756_v12, %v4758_v3  ;;  %v4760_v59 = vsel %vm1310_vm9, %v4758_v3, %v4756_v12  ;;  %v4322_v40 = vpop.permute.xlu2 %4321 }
 0xa06   : > { %v4761_v8 = vmul.f32 %v4759_v13, %v5877_v36  ;;  %v4762_v19 = vmul.f32 %v4760_v59, %v5879_v37 }
 0xa08   : > { %4783 = vmatpush.msrb.mxu2 %v4761_v8  ;;  %4803 = vmatpush.msrb.mxu3 %v4762_v19 }
 0xa0a   : > { %5231 = vmatmul.msk.f32.vlgmr.msrb.gmra.mxu2 %vm1390_vm10, %v5230_v20  ;;  %5232 = vmatmul.msk.f32.vlgmr.msrb.gmra.mxu3 %vm1390_vm10, %v5230_v20 }
 0xa0b   : > { %v4817_v9 = vpop.permute.xlu0 %4816 }
 0xa0c   : > { %v4703_v24 = vpop.permute.xlu1 %4702 }
 0xa0d   : > { %v4704_v4 = vsel %vm1236_vm8, %v4701_v14, %v4703_v24  ;;  %v4705_v36 = vsel %vm1236_vm8, %v4703_v24, %v4701_v14 }
 0xa0e   : > { %v4706_v37 = vmul.f32 %v4704_v4, %v5856_v21  ;;  %v4707_v7 = vmul.f32 %v4705_v36, %v5858_v23 }
 0xa10   : > { %4728 = vmatpush.msra.mxu0 %v4706_v37  ;;  %4748 = vmatpush.msra.mxu1 %v4707_v7 }
 0xa11   : > { %5228 = vmatmul.msk.f32.vlgmr.msra.gmra.mxu0 %vm1390_vm10, %v5227_v47  ;;  %5229 = vmatmul.msk.f32.vlgmr.msra.gmra.mxu1 %vm1390_vm10, %v5227_v47 }
 0xa6c   : > { %v4353_v25 = vpop.f32.mrf.mxu2  ;;  %v4373_v31 = vpop.f32.mrf.mxu3 }
 0xa6d   : > { %v4376_v21 = vadd.f32 %v4353_v25, %v4322_v40  ;;  %v4377_v44 = vadd.f32 %v4373_v31, %v4322_v40 }
 0xa6e   : > { %v4408_v32 = vpop.f32.mrf.mxu0  ;;  %v4428_v33 = vpop.f32.mrf.mxu1 }
 0xa6f   : > { %v4431_v56 = vadd.f32 %v4408_v32, %v4376_v21  ;;  %v4432_v51 = vadd.f32 %v4428_v33, %v4377_v44 }
 0xa75   : > { %v4463_v22 = vpop.f32.mrf.mxu2  ;;  %v4483_v35 = vpop.f32.mrf.mxu3 }
 0xa76   : > { %v4518_v23 = vpop.f32.mrf.mxu0  ;;  %v4538_v45 = vpop.f32.mrf.mxu1  ;;  %v4486_v52 = vadd.f32 %v4463_v22, %v4431_v56  ;;  %v4487_v6 = vadd.f32 %v4483_v35, %v4432_v51 }
 0xa78   : > { %v4541_v46 = vadd.f32 %v4518_v23, %v4486_v52  ;;  %v4542_v48 = vadd.f32 %v4538_v45, %v4487_v6 }
 0xa7d   : > { %v4565_v41 = vpop.f32.mrf.mxu2  ;;  %v4585_v53 = vpop.f32.mrf.mxu3 }
 0xa7e   : > { %v4620_v62 = vpop.f32.mrf.mxu0  ;;  %v4640_v61 = vpop.f32.mrf.mxu1  ;;  %v4588_v34 = vadd.f32 %v4565_v41, %v4541_v46  ;;  %v4589_v49 = vadd.f32 %v4585_v53, %v4542_v48 }
 0xa80   : > { %v4643_v16 = vadd.f32 %v4620_v62, %v4588_v34  ;;  %v4644_v57 = vadd.f32 %v4640_v61, %v4589_v49 }
 0xa85   : > { %v4675_v26 = vpop.f32.mrf.mxu2  ;;  %v4695_v27 = vpop.f32.mrf.mxu3 }
 0xa86   : > { %v4698_v42 = vadd.f32 %v4675_v26, %v4643_v16  ;;  %v4699_v43 = vadd.f32 %v4695_v27, %v4644_v57 }
 0xa8d   : > { %v4785_v28 = vpop.f32.mrf.mxu2  ;;  %v4805_v29 = vpop.f32.mrf.mxu3 }
 0xa8e   : > { %v4730_v58 = vpop.f32.mrf.mxu0  ;;  %v4750_v63 = vpop.f32.mrf.mxu1 }
 0xa8f   : > { %v4753_v0 = vadd.f32 %v4730_v58, %v4698_v42  ;;  %v4754_v1 = vadd.f32 %v4750_v63, %v4699_v43 }
 0xa91   : > { %v4808_v15 = vadd.f32 %v4785_v28, %v4753_v0  ;;  %v4809_v10 = vadd.f32 %v4805_v29, %v4754_v1 }
 0xa93   : > { %v4810_v11 = vmax.f32 %v4808_v15, 0.0  ;;  %v4811_v54 = vmax.f32 %v4809_v10, 0.0 }
 0xa95   : > { %4837 = vmatpush.msrb.mxu0 %v4810_v11  ;;  %4857 = vmatpush.msrb.mxu1 %v4811_v54 }
 0xa96   : > { %5233 = vmatmul.msk.f32.vlgmr.msrb.gmra.mxu0 %vm1390_vm10, %v4812_v55  ;;  %5234 = vmatmul.msk.f32.vlgmr.msrb.gmra.mxu1 %vm1390_vm10, %v4812_v55 }
 0xb13   : > { %v4839_v17 = vpop.f32.mrf.mxu0  ;;  %v4859_v38 = vpop.f32.mrf.mxu1 }
 0xb14   : > { %v4860_v39 = vadd.f32 %v4859_v38, %v4817_v9  ;;  %v4840_v50 = vadd.f32 %v4839_v17, %v4817_v9 }
 0xb16   : > { %v4864_v18 = vrot.slane %v4860_v39, 6 }
 0xb18   : > { %v4866_v5 = vsel %vm4865_vm12, %v4840_v50, %v4864_v18 }
 0xb19   : > { %4868 = vst [vmem:[%s716_s0] sm:$0xf] %v4866_v5 }
 0xb1a   : > { %5417 = shalt.err (!%p5414_p11)
}
 0xb1b   : > { %5248 = dma.vmem_to_hbm [thread:$0]  (%p5659_p3), %s4884_s29, 64, %s4886_s2, %s4870_s4  }
 0xb1c PF: > { %s7231_s26 = sld [smem:[#allocation11_spill]]  ;;  %p7233_p12 = scmp.ge.s32.totalorder %s5460_s30, 2 }
 0xb1e   : > { %p5259_p13 = pnand %p7233_p12, %p5628_p6 }
 0xb20   : > { %p5260_p0 = pneg %p5259_p13 }
 0xb22   : > { %s4897_s0 = sand.u32 1, %s7231_s26  }
 0xb23   : > { %s4898_s6 = scalar_lea.sflag [#allocation4], %s4897_s0 }
 0xb24   : > { %5443 = dma.done.wait (%p5260_p0), %s4898_s6, 64  }
 0xb25   : > { %5445 = vsyncadd (%p5260_p0), %s4898_s6, 4294967232  ;;  %s7234_s30 = sld [smem:[#allocation14_spill]]  ;;  %s7237_s3 = smov %s5452_s28 }
 0xb26   : > { %s7235_s22 = sld [smem:[#allocation12_spill]] }
 0xb27   : > { %s7236_s29 = sld [smem:[#allocation15_spill]] }
 0xb2b   : > { %p36_p5 = scmp.ge.s32.totalorder %s7234_s30, 4  }
 0xb2c   : > { %s7238_s28 = smov %s7235_s22 }
 0xb2d   :  { %38 = sbr.rel (!%p36_p5) target bundleno = 20 (0x14), region = 235 }
 0xb32   :  { %4904 = vsyncpa [#allocation3], 1 }
 0xb33   :  { %4906 = vsyncpa [#allocation3 + $0x1], 1 }
 0xb34   :  { %4907 = vsyncpa [#allocation6], 1 }
 0xb35   :  { %4908 = vsyncpa [#allocation4], 1 }
 0xb36   :  { %4910 = vsyncpa [#allocation4 + $0x1], 1 }

</bundles_post_ra>
